<compile_context>
chip_gen: v7x
topology: tpu7x:2x2x1
jax: 0.10.0
libtpu: 0.0.40
codegen_flags: <defaults>
</compile_context>

<pallas_src>
import functools

import numpy as np
import jax
import jax.numpy as jnp
from jax.experimental import pallas as pl
from jax.experimental.pallas import tpu as pltpu

alpha_level = float(np.sqrt(23.0 / 32.0))
beta_level = float(np.sqrt(3.0 / 2.0))

_SINGLE_BLOCK_ROW_LIMIT = 2048       # 2048 x 128 x 4B = 1 MiB per operand slab
_TILE_CANDIDATES = (1024, 512, 256)


# ----------------------------------------------------------------------------
# Pallas kernels
# ----------------------------------------------------------------------------
@functools.lru_cache(maxsize=None)
def _build_lifting(rows, lanes, ca, cb):
    """out = ca * base + cb * (w0*m0 + w1*m1) over a lane-dense (rows, lanes) slab."""

    def kernel(base_ref, w0_ref, m0_ref, w1_ref, m1_ref, out_ref):
        out_ref[...] = (ca * base_ref[...]
                        + cb * (w0_ref[...] * m0_ref[...]
                                + w1_ref[...] * m1_ref[...]))

    out_shape = jax.ShapeDtypeStruct((rows, lanes), jnp.float32)

    # Small (typical) case: single whole-array VMEM block, no grid, no per-step
    # pipeline overhead.
    if rows <= _SINGLE_BLOCK_ROW_LIMIT:
        return pl.pallas_call(kernel, out_shape=out_shape)

    # Large case: row-tiled, parallel grid, blocks kept small enough for v7x's
    # 64 MiB VMEM (6 operands x 2 buffers).
    for tr in _TILE_CANDIDATES:
        if rows % tr == 0:
            spec = pl.BlockSpec((tr, lanes), lambda i: (i, 0))
            return pl.pallas_call(
                kernel,
                out_shape=out_shape,
                grid_spec=pl.GridSpec(grid=(rows // tr,),
                                      in_specs=[spec] * 5, out_specs=spec),
                compiler_params=pltpu.CompilerParams(
                    dimension_semantics=("parallel",)),
            )
    return pl.pallas_call(kernel, out_shape=out_shape)


@functools.lru_cache(maxsize=None)
def _build_lifting_entropy(rows, lanes, ca, cb, graded_rows):
    """Fused lifting + quantise/dequantise + bit cost over one lane-dense slab.

    Outputs: lifted (rows, lanes), rec (rows, lanes), bits (1, 1).
    The bit cost only counts the first `graded_rows` rows (graded tensors of
    that wavelet level); the rest are the no-grad duplicates.
    """
    out_shapes = (jax.ShapeDtypeStruct((rows, lanes), jnp.float32),
                  jax.ShapeDtypeStruct((rows, lanes), jnp.float32),
                  jax.ShapeDtypeStruct((1, 1), jnp.float32))

    if rows <= _SINGLE_BLOCK_ROW_LIMIT:
        def kernel(scale_ref, inv_ref, base_ref, w0_ref, m0_ref, w1_ref, m1_ref,
                   out_ref, rec_ref, bits_ref):
            lifted = (ca * base_ref[...]
                      + cb * (w0_ref[...] * m0_ref[...]
                              + w1_ref[...] * m1_ref[...]))
            out_ref[...] = lifted
            q = jnp.round(lifted * inv_ref[...])
            rec_ref[...] = q * scale_ref[...]
            row_ids = jax.lax.broadcasted_iota(jnp.int32, (rows, lanes), 0)
            gmask = (row_ids < graded_rows).astype(jnp.float32)
            bits_ref[...] = jnp.sum(jnp.log2(1.0 + jnp.abs(q)) * gmask,
                                    keepdims=True)

        return pl.pallas_call(kernel, out_shape=out_shapes)

    # Large case: row-tiled grid, bits accumulated across the (reduction) axis.
    tr = rows
    for cand in _TILE_CANDIDATES:
        if rows % cand == 0:
            tr = cand
            break

    def kernel(scale_ref, inv_ref, base_ref, w0_ref, m0_ref, w1_ref, m1_ref,
               out_ref, rec_ref, bits_ref):
        i = pl.program_id(0)

        @pl.when(i == 0)
        def _():
            bits_ref[...] = jnp.zeros_like(bits_ref)

        lifted = (ca * base_ref[...]
                  + cb * (w0_ref[...] * m0_ref[...]
                          + w1_ref[...] * m1_ref[...]))
        out_ref[...] = lifted
        q = jnp.round(lifted * inv_ref[...])
        rec_ref[...] = q * scale_ref[...]
        row_ids = jax.lax.broadcasted_iota(jnp.int32, (tr, lanes), 0) + i * tr
        gmask = (row_ids < graded_rows).astype(jnp.float32)
        bits_ref[...] += jnp.sum(jnp.log2(1.0 + jnp.abs(q)) * gmask,
                                 keepdims=True)

    tile = pl.BlockSpec((tr, lanes), lambda i: (i, 0))
    scalar = pl.BlockSpec((1, 1), lambda i: (0, 0))
    return pl.pallas_call(
        kernel,
        out_shape=out_shapes,
        grid_spec=pl.GridSpec(
            grid=(rows // tr,),
            in_specs=[scalar, scalar, tile, tile, tile, tile, tile],
            out_specs=(tile, tile, scalar)),
        compiler_params=pltpu.CompilerParams(
            dimension_semantics=("arbitrary",)),
    )


# ----------------------------------------------------------------------------
# Batched sub-module equivalents (glue in JAX, hot path in Pallas)
# ----------------------------------------------------------------------------
def _lifting(base, w0, m0, w1, m1, ca, cb, entropy=None):
    """All operands are stacks of shape (S, B, H, W).

    entropy: optional (rec_items, graded_items, scale_2d, inv_2d); when given,
    quantise/dequantise + bit cost run inside the same fused Pallas kernel and
    (lifted, rec_stack, bits) is returned.
    """
    shape = base.shape
    S = shape[0]
    item = int(np.prod(shape[1:]))
    lanes = 128 if item % 128 == 0 else shape[-1]
    item_rows = item // lanes
    rows = S * item_rows
    flat = lambda t: t.reshape(rows, lanes).astype(jnp.float32)
    ops = [flat(t) for t in (base, w0, m0, w1, m1)]

    if entropy is None:
        out = _build_lifting(rows, lanes, float(ca), float(cb))(*ops)
        return out.reshape(shape)

    rec_items, graded_items, scale, inv = entropy
    graded_rows = graded_items * item_rows
    out, rec, bits = _build_lifting_entropy(
        rows, lanes, float(ca), float(cb), graded_rows)(scale, inv, *ops)
    rec = rec[:rec_items * item_rows].reshape((rec_items,) + shape[1:])
    return out.reshape(shape), rec, bits[0, 0]


def _warp_nn(x, mvp, px, py):
    # TODO(synk): original code uses torch grid_sample (bilinear); a data-
    # dependent 2-D gather has no clean Pallas equivalent here, so a nearest-
    # neighbour motion-compensated gather is done in plain JAX glue (fused by
    # XLA under the single jit); grid_org is unused.
    S, B, H, W = x.shape
    ix = jnp.clip(jnp.round(px[None] + mvp[:, :, 0]).astype(jnp.int32), 0, W - 1)
    iy = jnp.clip(jnp.round(py[None] + mvp[:, :, 1]).astype(jnp.int32), 0, H - 1)
    s_idx = jnp.arange(S)[:, None, None, None]
    b_idx = jnp.arange(B)[None, :, None, None]
    return x[s_idx, b_idx, iy, ix]


def _predict(encode, f0, mv0, m0, f1, mv1, m1, px, py, mid_or_rec, alpha, rank,
             entropy=None):
    # TODO(synk): Model_train_predict internals not provided; synthetic lifting.
    w0 = _warp_nn(f0, mv0, px, py)
    w1 = _warp_nn(f1, mv1, px, py)
    if encode:                                   # H = alpha * (mid - pred)
        return _lifting(mid_or_rec, w0, m0, w1, m1, alpha, -0.5 * alpha, entropy)
    return _lifting(mid_or_rec, w0, m0, w1, m1, 1.0 / alpha, 0.5, entropy)


def _update(encode, h0, mv0, m0, h1, mv1, m1, px, py, base, alpha, beta, rank,
            entropy=None):
    # TODO(synk): Model_train_update internals not provided; synthetic lifting.
    w0 = _warp_nn(h0, mv0, px, py)
    w1 = _warp_nn(h1, mv1, px, py)
    if encode:                                   # L = beta*base + 0.5*upd
        return _lifting(base, w0, m0, w1, m1, beta, 0.5, entropy)
    return _lifting(base, w0, m0, w1, m1, 1.0 / beta, -0.5 / beta, entropy)


def _entropy_params(alpha_vec, scale_param):
    # TODO(synk): Model_space_entropy internals not provided; synthetic
    # quantise/dequantise + bit-cost proxy (part_bitplane unused).
    wavelet_scale = jax.nn.softplus(scale_param) * jnp.mean(alpha_vec)
    scale = wavelet_scale.reshape(1, 1).astype(jnp.float32)
    inv = (1.0 / wavelet_scale).reshape(1, 1).astype(jnp.float32)
    return scale, inv, wavelet_scale


# ----------------------------------------------------------------------------
# Model_all forward (same control flow / lifting schedule as the PyTorch module,
# but with every stage batched into one Pallas call and entropy fused into the
# lifting call that produces its input)
# ----------------------------------------------------------------------------
class ModelAll:
    def __init__(self, wavelet_trainable_set=True, train_step=0):
        self.part_bitplane = 4
        # deterministic parameter init for the four entropy modules
        self.scale_H1 = jnp.float32(0.3)
        self.scale_H2 = jnp.float32(0.4)
        self.scale_H3 = jnp.float32(0.5)
        self.scale_L = jnp.float32(0.6)
        self._jitted = jax.jit(self._forward)

    def __call__(self, frame, mask, mv, grid_up, grid_org, train, alpha_list):
        # `train` is unused by the synthetic entropy stand-in (signature parity).
        return self._jitted(frame, mask, mv, grid_up, grid_org, alpha_list)

    def _forward(self, frame, mask, mv, grid_up, grid_org, alpha_list):
        al, bl, rank = alpha_level, beta_level, 0
        B, _, H, W = frame.shape

        # pixel-centre warp coordinates hoisted out of every stage
        px = (grid_up[..., 0] + 1.0) * 0.5 * (W - 1)
        py = (grid_up[..., 1] + 1.0) * 0.5 * (H - 1)

        def F(idxs):   # (S, B, H, W)
            return jnp.stack([frame[:, c] for c in idxs], axis=0)

        def M(idxs):   # (S, B, H, W)
            return jnp.stack([mask[:, c] for c in idxs], axis=0)

        def MV(starts):  # (S, B, 2, H, W)
            return jnp.stack([mv[:, s:s + 2] for s in starts], axis=0)

        ix = lambda lst: np.array(lst, dtype=np.int32)

        sH1, iH1, ws_H1 = _entropy_params(alpha_list[:, 0], self.scale_H1)
        sH2, iH2, ws_H2 = _entropy_params(alpha_list[:, 1], self.scale_H2)
        sH3, iH3, ws_H3 = _entropy_params(alpha_list[:, 2], self.scale_H3)
        sL, iL, ws_L = _entropy_params(alpha_list[:, 3], self.scale_L)

        # ---------------- level 1 encode (predict fused with entropy) -------
        r = list(range(11))
        H1, rec_H1, bits_H1 = _predict(
            1, F([2 * i for i in r]), MV([4 * i for i in r]), M([2 * i for i in r]),
            F([2 * i + 2 for i in r]), MV([4 * i + 2 for i in r]), M([2 * i + 1 for i in r]),
            px, py, F([2 * i + 1 for i in r]), al, rank,
            entropy=(5, 4, sH1, iH1))                                           # (11,...), (5,...)
        L1 = _update(1, H1[ix([0] + r[:-1])], -MV([44 + 4 * i for i in r]), M([22 + 2 * i for i in r]),
                     H1, -MV([46 + 4 * i for i in r]), M([23 + 2 * i for i in r]),
                     px, py, F([2 * i for i in r]), al, bl, rank)                # (11,B,H,W)

        # ---------------- level 2 encode ----------------
        r = list(range(5))
        H2, rec_H2, bits_H2 = _predict(
            1, L1[ix([2 * i for i in r])], MV([88 + 4 * i for i in r]), M([44 + 2 * i for i in r]),
            L1[ix([2 * i + 2 for i in r])], MV([90 + 4 * i for i in r]), M([45 + 2 * i for i in r]),
            px, py, L1[ix([2 * i + 1 for i in r])], al, rank,
            entropy=(3, 2, sH2, iH2))                                            # (5,...), (3,...)
        L2 = _update(1, H2[ix([0, 0, 1, 2, 3])], -MV([108 + 4 * i for i in r]), M([54 + 2 * i for i in r]),
                     H2, -MV([110 + 4 * i for i in r]), M([55 + 2 * i for i in r]),
                     px, py, L1[ix([0, 2, 4, 6, 8])], al, bl, rank)              # (5,B,H,W)

        # ---------------- level 3 encode ----------------
        H3, rec_H3, bits_H3 = _predict(
            1, L2[ix([0, 2])], MV([128, 132]), M([64, 66]),
            L2[ix([2, 4])], MV([130, 134]), M([65, 67]),
            px, py, L2[ix([1, 3])], al, rank,
            entropy=(2, 1, sH3, iH3))                                            # (2,...), (2,...)
        L3, rec_L, bits_L = _update(
            1, H3[ix([0, 0])], -MV([136, 140]), M([68, 70]),
            H3[ix([0, 1])], -MV([138, 142]), M([69, 71]),
            px, py, L2[ix([0, 2])], al, bl, rank,
            entropy=(2, 1, sL, iL))                                              # (2,...), (2,...)

        # ---------------- level 3 decode ----------------
        L3u = _update(0, rec_H3[ix([0, 0])], -MV([136, 140]), M([68, 70]),
                      rec_H3[ix([0, 1])], -MV([138, 142]), M([69, 71]),
                      px, py, rec_L, al, bl, rank)                               # (2,B,H,W)
        H3d = _predict(0, L3u[ix([0])], MV([128]), M([64]),
                       L3u[ix([1])], MV([130]), M([65]),
                       px, py, rec_H3[ix([0])], al, rank)                        # (1,B,H,W)
        L3_dec = jnp.stack([L3u[0], H3d[0], L3u[1]], axis=0)                     # (3,B,H,W)

        # ---------------- level 2 decode ----------------
        r = list(range(3))
        L2u = _update(0, rec_H2[ix([0, 0, 1])], -MV([108 + 4 * i for i in r]), M([54 + 2 * i for i in r]),
                      rec_H2[ix([0, 1, 2])], -MV([110 + 4 * i for i in r]), M([55 + 2 * i for i in r]),
                      px, py, L3_dec, al, bl, rank)                              # (3,B,H,W)
        H2d = _predict(0, L2u[ix([0, 1])], MV([88, 92]), M([44, 46]),
                       L2u[ix([1, 2])], MV([90, 94]), M([45, 47]),
                       px, py, rec_H2[ix([0, 1])], al, rank)                     # (2,B,H,W)
        L2_dec = jnp.stack([L2u[0], H2d[0], L2u[1], H2d[1], L2u[2]], axis=0)     # (5,B,H,W)

        # ---------------- level 1 decode ----------------
        r = list(range(5))
        L1u = _update(0, rec_H1[ix([0, 0, 1, 2, 3])], -MV([44 + 4 * i for i in r]), M([22 + 2 * i for i in r]),
                      rec_H1[ix([0, 1, 2, 3, 4])], -MV([46 + 4 * i for i in r]), M([23 + 2 * i for i in r]),
                      px, py, L2_dec, al, bl, rank)                              # (5,B,H,W)
        r = list(range(4))
        H1d = _predict(0, L1u[ix([0, 1, 2, 3])], MV([4 * i for i in r]), M([2 * i for i in r]),
                       L1u[ix([1, 2, 3, 4])], MV([4 * i + 2 for i in r]), M([2 * i + 1 for i in r]),
                       px, py, rec_H1[ix([0, 1, 2, 3])], al, rank)               # (4,B,H,W)

        final = [L1u[0], H1d[0], L1u[1], H1d[1], L1u[2], H1d[2], L1u[3], H1d[3], L1u[4]]
        out = jnp.stack(final, axis=1)                                           # (B,9,H,W)
        return (out,
                [bits_H1, bits_H2, bits_H3, bits_L],
                [ws_H1, ws_H2, ws_H3, ws_L])


# ----------------------------------------------------------------------------
if __name__ == "__main__":
    key = jax.random.PRNGKey(0)
    k0, k1, k2, k3 = jax.random.split(key, 4)
    B, H, W = 2, 16, 16

    frame = jax.random.normal(k0, (B, 23, H, W), jnp.float32)
    mask = jax.random.uniform(k1, (B, 72, H, W), jnp.float32)
    mv = jax.random.normal(k2, (B, 144, H, W), jnp.float32)
    ys, xs = jnp.meshgrid(jnp.linspace(-1.0, 1.0, H), jnp.linspace(-1.0, 1.0, W),
                          indexing="ij")
    base_grid = jnp.stack([xs, ys], -1).astype(jnp.float32)        # (H, W, 2)
    grid_up = jnp.broadcast_to(base_grid, (B, H, W, 2))
    grid_org = grid_up
    alpha_list = jax.random.uniform(k3, (B, 4), jnp.float32, 0.5, 1.5)

    model = ModelAll(wavelet_trainable_set=True, train_step=0)
    out, bits, scales = model(frame, mask, mv, grid_up, grid_org, True, alpha_list)

    out = jax.block_until_ready(out)
    bits = [jax.block_until_ready(b) for b in bits]
    assert out.shape == (B, 9, H, W), out.shape
    assert all(jnp.isfinite(b) for b in bits)
    print("KERNEL_OK")
</pallas_src>

<mosaic_0001>
module attributes {stable_mosaic.version = 11 : i64} {
  func.func private @main(%arg0: i32) attributes {dimension_semantics = [#tpu.dimension_semantics<core_parallel>], iteration_bounds = array<i64: 2>, tpu.core_type = #tpu.core_type<sc_scalar_subcore>, window_params = []} {
    return
  }
}

module attributes {stable_mosaic.version = 11 : i64} {
  func.func private @main(%arg0: i32) attributes {dimension_semantics = [#tpu.dimension_semantics<core_parallel>], iteration_bounds = array<i64: 2>, tpu.core_type = #tpu.core_type<sc_scalar_subcore>, window_params = []} {
    return
  }
}

module attributes {stable_mosaic.version = 11 : i64} {
  func.func @kernel(%arg0: memref<1x1xf32, #tpu.memory_space<vmem>>, %arg1: memref<1x1xf32, #tpu.memory_space<vmem>>, %arg2: memref<44x128xf32, #tpu.memory_space<vmem>>, %arg3: memref<44x128xf32, #tpu.memory_space<vmem>>, %arg4: memref<44x128xf32, #tpu.memory_space<vmem>>, %arg5: memref<44x128xf32, #tpu.memory_space<vmem>>, %arg6: memref<44x128xf32, #tpu.memory_space<vmem>>, %arg7: memref<44x128xf32, #tpu.memory_space<vmem>>, %arg8: memref<44x128xf32, #tpu.memory_space<vmem>>, %arg9: memref<1x1xf32, #tpu.memory_space<vmem>>) attributes {dimension_semantics = [], scalar_prefetch = 0 : i64, scratch_operands = 0 : i64, tpu.core_type = #tpu.core_type<tc>} {
    %c0 = arith.constant 0 : index
    %c0_0 = arith.constant 0 : index
    %0 = vector.load %arg2[%c0, %c0_0] : memref<44x128xf32, #tpu.memory_space<vmem>>, vector<44x128xf32>
    %cst = arith.constant 0.847791254 : f32
    %1 = vector.broadcast %cst : f32 to vector<44x128xf32>
    %2 = arith.mulf %1, %0 : vector<44x128xf32>
    %c0_1 = arith.constant 0 : index
    %c0_2 = arith.constant 0 : index
    %3 = vector.load %arg3[%c0_1, %c0_2] : memref<44x128xf32, #tpu.memory_space<vmem>>, vector<44x128xf32>
    %c0_3 = arith.constant 0 : index
    %c0_4 = arith.constant 0 : index
    %4 = vector.load %arg4[%c0_3, %c0_4] : memref<44x128xf32, #tpu.memory_space<vmem>>, vector<44x128xf32>
    %5 = arith.mulf %3, %4 : vector<44x128xf32>
    %c0_5 = arith.constant 0 : index
    %c0_6 = arith.constant 0 : index
    %6 = vector.load %arg5[%c0_5, %c0_6] : memref<44x128xf32, #tpu.memory_space<vmem>>, vector<44x128xf32>
    %c0_7 = arith.constant 0 : index
    %c0_8 = arith.constant 0 : index
    %7 = vector.load %arg6[%c0_7, %c0_8] : memref<44x128xf32, #tpu.memory_space<vmem>>, vector<44x128xf32>
    %8 = arith.mulf %6, %7 : vector<44x128xf32>
    %9 = arith.addf %5, %8 : vector<44x128xf32>
    %cst_9 = arith.constant -0.423895627 : f32
    %10 = vector.broadcast %cst_9 : f32 to vector<44x128xf32>
    %11 = arith.mulf %10, %9 : vector<44x128xf32>
    %12 = arith.addf %2, %11 : vector<44x128xf32>
    %c0_10 = arith.constant 0 : index
    %c0_11 = arith.constant 0 : index
    %13 = vector.load %arg7[%c0_10, %c0_11] : memref<44x128xf32, #tpu.memory_space<vmem>>, vector<44x128xf32>
    tpu.vector_store %arg7[%c0_10, %c0_11], %12 {strides = array<i32>} : memref<44x128xf32, #tpu.memory_space<vmem>>, vector<44x128xf32>,
    %c0_12 = arith.constant 0 : index
    %c0_13 = arith.constant 0 : index
    %14 = vector.load %arg1[%c0_12, %c0_13] : memref<1x1xf32, #tpu.memory_space<vmem>>, vector<1x1xf32>
    %15 = vector.broadcast %14 : vector<1x1xf32> to vector<44x128xf32>
    %16 = arith.mulf %12, %15 : vector<44x128xf32>
    %17 = math.roundeven %16 : vector<44x128xf32>
    %c0_14 = arith.constant 0 : index
    %c0_15 = arith.constant 0 : index
    %18 = vector.load %arg0[%c0_14, %c0_15] : memref<1x1xf32, #tpu.memory_space<vmem>>, vector<1x1xf32>
    %19 = vector.broadcast %18 : vector<1x1xf32> to vector<44x128xf32>
    %20 = arith.mulf %17, %19 : vector<44x128xf32>
    %c0_16 = arith.constant 0 : index
    %c0_17 = arith.constant 0 : index
    %21 = vector.load %arg8[%c0_16, %c0_17] : memref<44x128xf32, #tpu.memory_space<vmem>>, vector<44x128xf32>
    tpu.vector_store %arg8[%c0_16, %c0_17], %20 {strides = array<i32>} : memref<44x128xf32, #tpu.memory_space<vmem>>, vector<44x128xf32>,
    %22 = tpu.iota {dimensions = array<i32: 0>} : vector<44x128xi32>
    %c16_i32 = arith.constant 16 : i32
    %23 = vector.broadcast %c16_i32 : i32 to vector<44x128xi32>
    %24 = arith.cmpi slt, %22, %23 : vector<44x128xi32>
    %25 = arith.extui %24 : vector<44x128xi1> to vector<44x128xi32>
    %26 = arith.sitofp %25 : vector<44x128xi32> to vector<44x128xf32>
    %27 = math.absf %17 : vector<44x128xf32>
    %cst_18 = arith.constant 1.000000e+00 : f32
    %28 = vector.broadcast %cst_18 : f32 to vector<44x128xf32>
    %29 = arith.addf %28, %27 : vector<44x128xf32>
    %30 = math.log %29 : vector<44x128xf32>
    %cst_19 = arith.constant 2.000000e+00 : f32
    %31 = math.log %cst_19 : f32
    %32 = vector.broadcast %31 : f32 to vector<44x128xf32>
    %33 = arith.divf %30, %32 : vector<44x128xf32>
    %34 = arith.mulf %33, %26 : vector<44x128xf32>
    %35 = vector.shape_cast %34 : vector<44x128xf32> to vector<1x44x128xf32>
    %cst_20 = arith.constant dense<0.000000e+00> : vector<1xf32>
    %36 = vector.multi_reduction <add>, %35, %cst_20 [1, 2] : vector<1x44x128xf32> to vector<1xf32>
    %37 = vector.shape_cast %36 : vector<1xf32> to vector<1x1x1xf32>
    %38 = vector.extract %37[0, 0, 0] : f32 from vector<1x1x1xf32>
    %39 = vector.broadcast %38 : f32 to vector<1x1xf32>
    %c0_21 = arith.constant 0 : index
    %c0_22 = arith.constant 0 : index
    %40 = vector.load %arg9[%c0_21, %c0_22] : memref<1x1xf32, #tpu.memory_space<vmem>>, vector<1x1xf32>
    tpu.vector_store %arg9[%c0_21, %c0_22], %39 {strides = array<i32>} : memref<1x1xf32, #tpu.memory_space<vmem>>, vector<1x1xf32>,
    return
  }
}

module attributes {stable_mosaic.version = 11 : i64} {
  func.func @kernel(%arg0: memref<44x128xf32, #tpu.memory_space<vmem>>, %arg1: memref<44x128xf32, #tpu.memory_space<vmem>>, %arg2: memref<44x128xf32, #tpu.memory_space<vmem>>, %arg3: memref<44x128xf32, #tpu.memory_space<vmem>>, %arg4: memref<44x128xf32, #tpu.memory_space<vmem>>, %arg5: memref<44x128xf32, #tpu.memory_space<vmem>>) attributes {dimension_semantics = [], scalar_prefetch = 0 : i64, scratch_operands = 0 : i64, tpu.core_type = #tpu.core_type<tc>} {
    %c0 = arith.constant 0 : index
    %c0_0 = arith.constant 0 : index
    %0 = vector.load %arg0[%c0, %c0_0] : memref<44x128xf32, #tpu.memory_space<vmem>>, vector<44x128xf32>
    %cst = arith.constant 1.22474492 : f32
    %1 = vector.broadcast %cst : f32 to vector<44x128xf32>
    %2 = arith.mulf %1, %0 : vector<44x128xf32>
    %c0_1 = arith.constant 0 : index
    %c0_2 = arith.constant 0 : index
    %3 = vector.load %arg1[%c0_1, %c0_2] : memref<44x128xf32, #tpu.memory_space<vmem>>, vector<44x128xf32>
    %c0_3 = arith.constant 0 : index
    %c0_4 = arith.constant 0 : index
    %4 = vector.load %arg2[%c0_3, %c0_4] : memref<44x128xf32, #tpu.memory_space<vmem>>, vector<44x128xf32>
    %5 = arith.mulf %3, %4 : vector<44x128xf32>
    %c0_5 = arith.constant 0 : index
    %c0_6 = arith.constant 0 : index
    %6 = vector.load %arg3[%c0_5, %c0_6] : memref<44x128xf32, #tpu.memory_space<vmem>>, vector<44x128xf32>
    %c0_7 = arith.constant 0 : index
    %c0_8 = arith.constant 0 : index
    %7 = vector.load %arg4[%c0_7, %c0_8] : memref<44x128xf32, #tpu.memory_space<vmem>>, vector<44x128xf32>
    %8 = arith.mulf %6, %7 : vector<44x128xf32>
    %9 = arith.addf %5, %8 : vector<44x128xf32>
    %cst_9 = arith.constant 5.000000e-01 : f32
    %10 = vector.broadcast %cst_9 : f32 to vector<44x128xf32>
    %11 = arith.mulf %10, %9 : vector<44x128xf32>
    %12 = arith.addf %2, %11 : vector<44x128xf32>
    %c0_10 = arith.constant 0 : index
    %c0_11 = arith.constant 0 : index
    %13 = vector.load %arg5[%c0_10, %c0_11] : memref<44x128xf32, #tpu.memory_space<vmem>>, vector<44x128xf32>
    tpu.vector_store %arg5[%c0_10, %c0_11], %12 {strides = array<i32>} : memref<44x128xf32, #tpu.memory_space<vmem>>, vector<44x128xf32>,
    return
  }
}

module attributes {stable_mosaic.version = 11 : i64} {
  func.func @kernel(%arg0: memref<1x1xf32, #tpu.memory_space<vmem>>, %arg1: memref<1x1xf32, #tpu.memory_space<vmem>>, %arg2: memref<20x128xf32, #tpu.memory_space<vmem>>, %arg3: memref<20x128xf32, #tpu.memory_space<vmem>>, %arg4: memref<20x128xf32, #tpu.memory_space<vmem>>, %arg5: memref<20x128xf32, #tpu.memory_space<vmem>>, %arg6: memref<20x128xf32, #tpu.memory_space<vmem>>, %arg7: memref<20x128xf32, #tpu.memory_space<vmem>>, %arg8: memref<20x128xf32, #tpu.memory_space<vmem>>, %arg9: memref<1x1xf32, #tpu.memory_space<vmem>>) attributes {dimension_semantics = [], scalar_prefetch = 0 : i64, scratch_operands = 0 : i64, tpu.core_type = #tpu.core_type<tc>} {
    %c0 = arith.constant 0 : index
    %c0_0 = arith.constant 0 : index
    %0 = vector.load %arg2[%c0, %c0_0] : memref<20x128xf32, #tpu.memory_space<vmem>>, vector<20x128xf32>
    %cst = arith.constant 0.847791254 : f32
    %1 = vector.broadcast %cst : f32 to vector<20x128xf32>
    %2 = arith.mulf %1, %0 : vector<20x128xf32>
    %c0_1 = arith.constant 0 : index
    %c0_2 = arith.constant 0 : index
    %3 = vector.load %arg3[%c0_1, %c0_2] : memref<20x128xf32, #tpu.memory_space<vmem>>, vector<20x128xf32>
    %c0_3 = arith.constant 0 : index
    %c0_4 = arith.constant 0 : index
    %4 = vector.load %arg4[%c0_3, %c0_4] : memref<20x128xf32, #tpu.memory_space<vmem>>, vector<20x128xf32>
    %5 = arith.mulf %3, %4 : vector<20x128xf32>
    %c0_5 = arith.constant 0 : index
    %c0_6 = arith.constant 0 : index
    %6 = vector.load %arg5[%c0_5, %c0_6] : memref<20x128xf32, #tpu.memory_space<vmem>>, vector<20x128xf32>
    %c0_7 = arith.constant 0 : index
    %c0_8 = arith.constant 0 : index
    %7 = vector.load %arg6[%c0_7, %c0_8] : memref<20x128xf32, #tpu.memory_space<vmem>>, vector<20x128xf32>
    %8 = arith.mulf %6, %7 : vector<20x128xf32>
    %9 = arith.addf %5, %8 : vector<20x128xf32>
    %cst_9 = arith.constant -0.423895627 : f32
    %10 = vector.broadcast %cst_9 : f32 to vector<20x128xf32>
    %11 = arith.mulf %10, %9 : vector<20x128xf32>
    %12 = arith.addf %2, %11 : vector<20x128xf32>
    %c0_10 = arith.constant 0 : index
    %c0_11 = arith.constant 0 : index
    %13 = vector.load %arg7[%c0_10, %c0_11] : memref<20x128xf32, #tpu.memory_space<vmem>>, vector<20x128xf32>
    tpu.vector_store %arg7[%c0_10, %c0_11], %12 {strides = array<i32>} : memref<20x128xf32, #tpu.memory_space<vmem>>, vector<20x128xf32>,
    %c0_12 = arith.constant 0 : index
    %c0_13 = arith.constant 0 : index
    %14 = vector.load %arg1[%c0_12, %c0_13] : memref<1x1xf32, #tpu.memory_space<vmem>>, vector<1x1xf32>
    %15 = vector.broadcast %14 : vector<1x1xf32> to vector<20x128xf32>
    %16 = arith.mulf %12, %15 : vector<20x128xf32>
    %17 = math.roundeven %16 : vector<20x128xf32>
    %c0_14 = arith.constant 0 : index
    %c0_15 = arith.constant 0 : index
    %18 = vector.load %arg0[%c0_14, %c0_15] : memref<1x1xf32, #tpu.memory_space<vmem>>, vector<1x1xf32>
    %19 = vector.broadcast %18 : vector<1x1xf32> to vector<20x128xf32>
    %20 = arith.mulf %17, %19 : vector<20x128xf32>
    %c0_16 = arith.constant 0 : index
    %c0_17 = arith.constant 0 : index
    %21 = vector.load %arg8[%c0_16, %c0_17] : memref<20x128xf32, #tpu.memory_space<vmem>>, vector<20x128xf32>
    tpu.vector_store %arg8[%c0_16, %c0_17], %20 {strides = array<i32>} : memref<20x128xf32, #tpu.memory_space<vmem>>, vector<20x128xf32>,
    %22 = tpu.iota {dimensions = array<i32: 0>} : vector<20x128xi32>
    %c8_i32 = arith.constant 8 : i32
    %23 = vector.broadcast %c8_i32 : i32 to vector<20x128xi32>
    %24 = arith.cmpi slt, %22, %23 : vector<20x128xi32>
    %25 = arith.extui %24 : vector<20x128xi1> to vector<20x128xi32>
    %26 = arith.sitofp %25 : vector<20x128xi32> to vector<20x128xf32>
    %27 = math.absf %17 : vector<20x128xf32>
    %cst_18 = arith.constant 1.000000e+00 : f32
    %28 = vector.broadcast %cst_18 : f32 to vector<20x128xf32>
    %29 = arith.addf %28, %27 : vector<20x128xf32>
    %30 = math.log %29 : vector<20x128xf32>
    %cst_19 = arith.constant 2.000000e+00 : f32
    %31 = math.log %cst_19 : f32
    %32 = vector.broadcast %31 : f32 to vector<20x128xf32>
    %33 = arith.divf %30, %32 : vector<20x128xf32>
    %34 = arith.mulf %33, %26 : vector<20x128xf32>
    %35 = vector.shape_cast %34 : vector<20x128xf32> to vector<1x20x128xf32>
    %cst_20 = arith.constant dense<0.000000e+00> : vector<1xf32>
    %36 = vector.multi_reduction <add>, %35, %cst_20 [1, 2] : vector<1x20x128xf32> to vector<1xf32>
    %37 = vector.shape_cast %36 : vector<1xf32> to vector<1x1x1xf32>
    %38 = vector.extract %37[0, 0, 0] : f32 from vector<1x1x1xf32>
    %39 = vector.broadcast %38 : f32 to vector<1x1xf32>
    %c0_21 = arith.constant 0 : index
    %c0_22 = arith.constant 0 : index
    %40 = vector.load %arg9[%c0_21, %c0_22] : memref<1x1xf32, #tpu.memory_space<vmem>>, vector<1x1xf32>
    tpu.vector_store %arg9[%c0_21, %c0_22], %39 {strides = array<i32>} : memref<1x1xf32, #tpu.memory_space<vmem>>, vector<1x1xf32>,
    return
  }
}

module attributes {stable_mosaic.version = 11 : i64} {
  func.func @kernel(%arg0: memref<20x128xf32, #tpu.memory_space<vmem>>, %arg1: memref<20x128xf32, #tpu.memory_space<vmem>>, %arg2: memref<20x128xf32, #tpu.memory_space<vmem>>, %arg3: memref<20x128xf32, #tpu.memory_space<vmem>>, %arg4: memref<20x128xf32, #tpu.memory_space<vmem>>, %arg5: memref<20x128xf32, #tpu.memory_space<vmem>>) attributes {dimension_semantics = [], scalar_prefetch = 0 : i64, scratch_operands = 0 : i64, tpu.core_type = #tpu.core_type<tc>} {
    %c0 = arith.constant 0 : index
    %c0_0 = arith.constant 0 : index
    %0 = vector.load %arg0[%c0, %c0_0] : memref<20x128xf32, #tpu.memory_space<vmem>>, vector<20x128xf32>
    %cst = arith.constant 1.22474492 : f32
    %1 = vector.broadcast %cst : f32 to vector<20x128xf32>
    %2 = arith.mulf %1, %0 : vector<20x128xf32>
    %c0_1 = arith.constant 0 : index
    %c0_2 = arith.constant 0 : index
    %3 = vector.load %arg1[%c0_1, %c0_2] : memref<20x128xf32, #tpu.memory_space<vmem>>, vector<20x128xf32>
    %c0_3 = arith.constant 0 : index
    %c0_4 = arith.constant 0 : index
    %4 = vector.load %arg2[%c0_3, %c0_4] : memref<20x128xf32, #tpu.memory_space<vmem>>, vector<20x128xf32>
    %5 = arith.mulf %3, %4 : vector<20x128xf32>
    %c0_5 = arith.constant 0 : index
    %c0_6 = arith.constant 0 : index
    %6 = vector.load %arg3[%c0_5, %c0_6] : memref<20x128xf32, #tpu.memory_space<vmem>>, vector<20x128xf32>
    %c0_7 = arith.constant 0 : index
    %c0_8 = arith.constant 0 : index
    %7 = vector.load %arg4[%c0_7, %c0_8] : memref<20x128xf32, #tpu.memory_space<vmem>>, vector<20x128xf32>
    %8 = arith.mulf %6, %7 : vector<20x128xf32>
    %9 = arith.addf %5, %8 : vector<20x128xf32>
    %cst_9 = arith.constant 5.000000e-01 : f32
    %10 = vector.broadcast %cst_9 : f32 to vector<20x128xf32>
    %11 = arith.mulf %10, %9 : vector<20x128xf32>
    %12 = arith.addf %2, %11 : vector<20x128xf32>
    %c0_10 = arith.constant 0 : index
    %c0_11 = arith.constant 0 : index
    %13 = vector.load %arg5[%c0_10, %c0_11] : memref<20x128xf32, #tpu.memory_space<vmem>>, vector<20x128xf32>
    tpu.vector_store %arg5[%c0_10, %c0_11], %12 {strides = array<i32>} : memref<20x128xf32, #tpu.memory_space<vmem>>, vector<20x128xf32>,
    return
  }
}

module attributes {stable_mosaic.version = 11 : i64} {
  func.func @kernel(%arg0: memref<1x1xf32, #tpu.memory_space<vmem>>, %arg1: memref<1x1xf32, #tpu.memory_space<vmem>>, %arg2: memref<8x128xf32, #tpu.memory_space<vmem>>, %arg3: memref<8x128xf32, #tpu.memory_space<vmem>>, %arg4: memref<8x128xf32, #tpu.memory_space<vmem>>, %arg5: memref<8x128xf32, #tpu.memory_space<vmem>>, %arg6: memref<8x128xf32, #tpu.memory_space<vmem>>, %arg7: memref<8x128xf32, #tpu.memory_space<vmem>>, %arg8: memref<8x128xf32, #tpu.memory_space<vmem>>, %arg9: memref<1x1xf32, #tpu.memory_space<vmem>>) attributes {dimension_semantics = [], scalar_prefetch = 0 : i64, scratch_operands = 0 : i64, tpu.core_type = #tpu.core_type<tc>} {
    %c0 = arith.constant 0 : index
    %c0_0 = arith.constant 0 : index
    %0 = vector.load %arg2[%c0, %c0_0] : memref<8x128xf32, #tpu.memory_space<vmem>>, vector<8x128xf32>
    %cst = arith.constant 0.847791254 : f32
    %1 = vector.broadcast %cst : f32 to vector<8x128xf32>
    %2 = arith.mulf %1, %0 : vector<8x128xf32>
    %c0_1 = arith.constant 0 : index
    %c0_2 = arith.constant 0 : index
    %3 = vector.load %arg3[%c0_1, %c0_2] : memref<8x128xf32, #tpu.memory_space<vmem>>, vector<8x128xf32>
    %c0_3 = arith.constant 0 : index
    %c0_4 = arith.constant 0 : index
    %4 = vector.load %arg4[%c0_3, %c0_4] : memref<8x128xf32, #tpu.memory_space<vmem>>, vector<8x128xf32>
    %5 = arith.mulf %3, %4 : vector<8x128xf32>
    %c0_5 = arith.constant 0 : index
    %c0_6 = arith.constant 0 : index
    %6 = vector.load %arg5[%c0_5, %c0_6] : memref<8x128xf32, #tpu.memory_space<vmem>>, vector<8x128xf32>
    %c0_7 = arith.constant 0 : index
    %c0_8 = arith.constant 0 : index
    %7 = vector.load %arg6[%c0_7, %c0_8] : memref<8x128xf32, #tpu.memory_space<vmem>>, vector<8x128xf32>
    %8 = arith.mulf %6, %7 : vector<8x128xf32>
    %9 = arith.addf %5, %8 : vector<8x128xf32>
    %cst_9 = arith.constant -0.423895627 : f32
    %10 = vector.broadcast %cst_9 : f32 to vector<8x128xf32>
    %11 = arith.mulf %10, %9 : vector<8x128xf32>
    %12 = arith.addf %2, %11 : vector<8x128xf32>
    %c0_10 = arith.constant 0 : index
    %c0_11 = arith.constant 0 : index
    %13 = vector.load %arg7[%c0_10, %c0_11] : memref<8x128xf32, #tpu.memory_space<vmem>>, vector<8x128xf32>
    tpu.vector_store %arg7[%c0_10, %c0_11], %12 {strides = array<i32>} : memref<8x128xf32, #tpu.memory_space<vmem>>, vector<8x128xf32>,
    %c0_12 = arith.constant 0 : index
    %c0_13 = arith.constant 0 : index
    %14 = vector.load %arg1[%c0_12, %c0_13] : memref<1x1xf32, #tpu.memory_space<vmem>>, vector<1x1xf32>
    %15 = vector.broadcast %14 : vector<1x1xf32> to vector<8x128xf32>
    %16 = arith.mulf %12, %15 : vector<8x128xf32>
    %17 = math.roundeven %16 : vector<8x128xf32>
    %c0_14 = arith.constant 0 : index
    %c0_15 = arith.constant 0 : index
    %18 = vector.load %arg0[%c0_14, %c0_15] : memref<1x1xf32, #tpu.memory_space<vmem>>, vector<1x1xf32>
    %19 = vector.broadcast %18 : vector<1x1xf32> to vector<8x128xf32>
    %20 = arith.mulf %17, %19 : vector<8x128xf32>
    %c0_16 = arith.constant 0 : index
    %c0_17 = arith.constant 0 : index
    %21 = vector.load %arg8[%c0_16, %c0_17] : memref<8x128xf32, #tpu.memory_space<vmem>>, vector<8x128xf32>
    tpu.vector_store %arg8[%c0_16, %c0_17], %20 {strides = array<i32>} : memref<8x128xf32, #tpu.memory_space<vmem>>, vector<8x128xf32>,
    %22 = tpu.iota {dimensions = array<i32: 0>} : vector<8x128xi32>
    %c4_i32 = arith.constant 4 : i32
    %23 = vector.broadcast %c4_i32 : i32 to vector<8x128xi32>
    %24 = arith.cmpi slt, %22, %23 : vector<8x128xi32>
    %25 = arith.extui %24 : vector<8x128xi1> to vector<8x128xi32>
    %26 = arith.sitofp %25 : vector<8x128xi32> to vector<8x128xf32>
    %27 = math.absf %17 : vector<8x128xf32>
    %cst_18 = arith.constant 1.000000e+00 : f32
    %28 = vector.broadcast %cst_18 : f32 to vector<8x128xf32>
    %29 = arith.addf %28, %27 : vector<8x128xf32>
    %30 = math.log %29 : vector<8x128xf32>
    %cst_19 = arith.constant 2.000000e+00 : f32
    %31 = math.log %cst_19 : f32
    %32 = vector.broadcast %31 : f32 to vector<8x128xf32>
    %33 = arith.divf %30, %32 : vector<8x128xf32>
    %34 = arith.mulf %33, %26 : vector<8x128xf32>
    %35 = vector.shape_cast %34 : vector<8x128xf32> to vector<1x8x128xf32>
    %cst_20 = arith.constant dense<0.000000e+00> : vector<1xf32>
    %36 = vector.multi_reduction <add>, %35, %cst_20 [1, 2] : vector<1x8x128xf32> to vector<1xf32>
    %37 = vector.shape_cast %36 : vector<1xf32> to vector<1x1x1xf32>
    %38 = vector.extract %37[0, 0, 0] : f32 from vector<1x1x1xf32>
    %39 = vector.broadcast %38 : f32 to vector<1x1xf32>
    %c0_21 = arith.constant 0 : index
    %c0_22 = arith.constant 0 : index
    %40 = vector.load %arg9[%c0_21, %c0_22] : memref<1x1xf32, #tpu.memory_space<vmem>>, vector<1x1xf32>
    tpu.vector_store %arg9[%c0_21, %c0_22], %39 {strides = array<i32>} : memref<1x1xf32, #tpu.memory_space<vmem>>, vector<1x1xf32>,
    return
  }
}

module attributes {stable_mosaic.version = 11 : i64} {
  func.func @kernel(%arg0: memref<1x1xf32, #tpu.memory_space<vmem>>, %arg1: memref<1x1xf32, #tpu.memory_space<vmem>>, %arg2: memref<8x128xf32, #tpu.memory_space<vmem>>, %arg3: memref<8x128xf32, #tpu.memory_space<vmem>>, %arg4: memref<8x128xf32, #tpu.memory_space<vmem>>, %arg5: memref<8x128xf32, #tpu.memory_space<vmem>>, %arg6: memref<8x128xf32, #tpu.memory_space<vmem>>, %arg7: memref<8x128xf32, #tpu.memory_space<vmem>>, %arg8: memref<8x128xf32, #tpu.memory_space<vmem>>, %arg9: memref<1x1xf32, #tpu.memory_space<vmem>>) attributes {dimension_semantics = [], scalar_prefetch = 0 : i64, scratch_operands = 0 : i64, tpu.core_type = #tpu.core_type<tc>} {
    %c0 = arith.constant 0 : index
    %c0_0 = arith.constant 0 : index
    %0 = vector.load %arg2[%c0, %c0_0] : memref<8x128xf32, #tpu.memory_space<vmem>>, vector<8x128xf32>
    %cst = arith.constant 1.22474492 : f32
    %1 = vector.broadcast %cst : f32 to vector<8x128xf32>
    %2 = arith.mulf %1, %0 : vector<8x128xf32>
    %c0_1 = arith.constant 0 : index
    %c0_2 = arith.constant 0 : index
    %3 = vector.load %arg3[%c0_1, %c0_2] : memref<8x128xf32, #tpu.memory_space<vmem>>, vector<8x128xf32>
    %c0_3 = arith.constant 0 : index
    %c0_4 = arith.constant 0 : index
    %4 = vector.load %arg4[%c0_3, %c0_4] : memref<8x128xf32, #tpu.memory_space<vmem>>, vector<8x128xf32>
    %5 = arith.mulf %3, %4 : vector<8x128xf32>
    %c0_5 = arith.constant 0 : index
    %c0_6 = arith.constant 0 : index
    %6 = vector.load %arg5[%c0_5, %c0_6] : memref<8x128xf32, #tpu.memory_space<vmem>>, vector<8x128xf32>
    %c0_7 = arith.constant 0 : index
    %c0_8 = arith.constant 0 : index
    %7 = vector.load %arg6[%c0_7, %c0_8] : memref<8x128xf32, #tpu.memory_space<vmem>>, vector<8x128xf32>
    %8 = arith.mulf %6, %7 : vector<8x128xf32>
    %9 = arith.addf %5, %8 : vector<8x128xf32>
    %cst_9 = arith.constant 5.000000e-01 : f32
    %10 = vector.broadcast %cst_9 : f32 to vector<8x128xf32>
    %11 = arith.mulf %10, %9 : vector<8x128xf32>
    %12 = arith.addf %2, %11 : vector<8x128xf32>
    %c0_10 = arith.constant 0 : index
    %c0_11 = arith.constant 0 : index
    %13 = vector.load %arg7[%c0_10, %c0_11] : memref<8x128xf32, #tpu.memory_space<vmem>>, vector<8x128xf32>
    tpu.vector_store %arg7[%c0_10, %c0_11], %12 {strides = array<i32>} : memref<8x128xf32, #tpu.memory_space<vmem>>, vector<8x128xf32>,
    %c0_12 = arith.constant 0 : index
    %c0_13 = arith.constant 0 : index
    %14 = vector.load %arg1[%c0_12, %c0_13] : memref<1x1xf32, #tpu.memory_space<vmem>>, vector<1x1xf32>
    %15 = vector.broadcast %14 : vector<1x1xf32> to vector<8x128xf32>
    %16 = arith.mulf %12, %15 : vector<8x128xf32>
    %17 = math.roundeven %16 : vector<8x128xf32>
    %c0_14 = arith.constant 0 : index
    %c0_15 = arith.constant 0 : index
    %18 = vector.load %arg0[%c0_14, %c0_15] : memref<1x1xf32, #tpu.memory_space<vmem>>, vector<1x1xf32>
    %19 = vector.broadcast %18 : vector<1x1xf32> to vector<8x128xf32>
    %20 = arith.mulf %17, %19 : vector<8x128xf32>
    %c0_16 = arith.constant 0 : index
    %c0_17 = arith.constant 0 : index
    %21 = vector.load %arg8[%c0_16, %c0_17] : memref<8x128xf32, #tpu.memory_space<vmem>>, vector<8x128xf32>
    tpu.vector_store %arg8[%c0_16, %c0_17], %20 {strides = array<i32>} : memref<8x128xf32, #tpu.memory_space<vmem>>, vector<8x128xf32>,
    %22 = tpu.iota {dimensions = array<i32: 0>} : vector<8x128xi32>
    %c4_i32 = arith.constant 4 : i32
    %23 = vector.broadcast %c4_i32 : i32 to vector<8x128xi32>
    %24 = arith.cmpi slt, %22, %23 : vector<8x128xi32>
    %25 = arith.extui %24 : vector<8x128xi1> to vector<8x128xi32>
    %26 = arith.sitofp %25 : vector<8x128xi32> to vector<8x128xf32>
    %27 = math.absf %17 : vector<8x128xf32>
    %cst_18 = arith.constant 1.000000e+00 : f32
    %28 = vector.broadcast %cst_18 : f32 to vector<8x128xf32>
    %29 = arith.addf %28, %27 : vector<8x128xf32>
    %30 = math.log %29 : vector<8x128xf32>
    %cst_19 = arith.constant 2.000000e+00 : f32
    %31 = math.log %cst_19 : f32
    %32 = vector.broadcast %31 : f32 to vector<8x128xf32>
    %33 = arith.divf %30, %32 : vector<8x128xf32>
    %34 = arith.mulf %33, %26 : vector<8x128xf32>
    %35 = vector.shape_cast %34 : vector<8x128xf32> to vector<1x8x128xf32>
    %cst_20 = arith.constant dense<0.000000e+00> : vector<1xf32>
    %36 = vector.multi_reduction <add>, %35, %cst_20 [1, 2] : vector<1x8x128xf32> to vector<1xf32>
    %37 = vector.shape_cast %36 : vector<1xf32> to vector<1x1x1xf32>
    %38 = vector.extract %37[0, 0, 0] : f32 from vector<1x1x1xf32>
    %39 = vector.broadcast %38 : f32 to vector<1x1xf32>
    %c0_21 = arith.constant 0 : index
    %c0_22 = arith.constant 0 : index
    %40 = vector.load %arg9[%c0_21, %c0_22] : memref<1x1xf32, #tpu.memory_space<vmem>>, vector<1x1xf32>
    tpu.vector_store %arg9[%c0_21, %c0_22], %39 {strides = array<i32>} : memref<1x1xf32, #tpu.memory_space<vmem>>, vector<1x1xf32>,
    return
  }
}

module attributes {stable_mosaic.version = 11 : i64} {
  func.func @kernel(%arg0: memref<8x128xf32, #tpu.memory_space<vmem>>, %arg1: memref<8x128xf32, #tpu.memory_space<vmem>>, %arg2: memref<8x128xf32, #tpu.memory_space<vmem>>, %arg3: memref<8x128xf32, #tpu.memory_space<vmem>>, %arg4: memref<8x128xf32, #tpu.memory_space<vmem>>, %arg5: memref<8x128xf32, #tpu.memory_space<vmem>>) attributes {dimension_semantics = [], scalar_prefetch = 0 : i64, scratch_operands = 0 : i64, tpu.core_type = #tpu.core_type<tc>} {
    %c0 = arith.constant 0 : index
    %c0_0 = arith.constant 0 : index
    %0 = vector.load %arg0[%c0, %c0_0] : memref<8x128xf32, #tpu.memory_space<vmem>>, vector<8x128xf32>
    %cst = arith.constant 0.816496611 : f32
    %1 = vector.broadcast %cst : f32 to vector<8x128xf32>
    %2 = arith.mulf %1, %0 : vector<8x128xf32>
    %c0_1 = arith.constant 0 : index
    %c0_2 = arith.constant 0 : index
    %3 = vector.load %arg1[%c0_1, %c0_2] : memref<8x128xf32, #tpu.memory_space<vmem>>, vector<8x128xf32>
    %c0_3 = arith.constant 0 : index
    %c0_4 = arith.constant 0 : index
    %4 = vector.load %arg2[%c0_3, %c0_4] : memref<8x128xf32, #tpu.memory_space<vmem>>, vector<8x128xf32>
    %5 = arith.mulf %3, %4 : vector<8x128xf32>
    %c0_5 = arith.constant 0 : index
    %c0_6 = arith.constant 0 : index
    %6 = vector.load %arg3[%c0_5, %c0_6] : memref<8x128xf32, #tpu.memory_space<vmem>>, vector<8x128xf32>
    %c0_7 = arith.constant 0 : index
    %c0_8 = arith.constant 0 : index
    %7 = vector.load %arg4[%c0_7, %c0_8] : memref<8x128xf32, #tpu.memory_space<vmem>>, vector<8x128xf32>
    %8 = arith.mulf %6, %7 : vector<8x128xf32>
    %9 = arith.addf %5, %8 : vector<8x128xf32>
    %cst_9 = arith.constant -0.408248305 : f32
    %10 = vector.broadcast %cst_9 : f32 to vector<8x128xf32>
    %11 = arith.mulf %10, %9 : vector<8x128xf32>
    %12 = arith.addf %2, %11 : vector<8x128xf32>
    %c0_10 = arith.constant 0 : index
    %c0_11 = arith.constant 0 : index
    %13 = vector.load %arg5[%c0_10, %c0_11] : memref<8x128xf32, #tpu.memory_space<vmem>>, vector<8x128xf32>
    tpu.vector_store %arg5[%c0_10, %c0_11], %12 {strides = array<i32>} : memref<8x128xf32, #tpu.memory_space<vmem>>, vector<8x128xf32>,
    return
  }
}

module attributes {stable_mosaic.version = 11 : i64} {
  func.func @kernel(%arg0: memref<4x128xf32, #tpu.memory_space<vmem>>, %arg1: memref<4x128xf32, #tpu.memory_space<vmem>>, %arg2: memref<4x128xf32, #tpu.memory_space<vmem>>, %arg3: memref<4x128xf32, #tpu.memory_space<vmem>>, %arg4: memref<4x128xf32, #tpu.memory_space<vmem>>, %arg5: memref<4x128xf32, #tpu.memory_space<vmem>>) attributes {dimension_semantics = [], scalar_prefetch = 0 : i64, scratch_operands = 0 : i64, tpu.core_type = #tpu.core_type<tc>} {
    %c0 = arith.constant 0 : index
    %c0_0 = arith.constant 0 : index
    %0 = vector.load %arg0[%c0, %c0_0] : memref<4x128xf32, #tpu.memory_space<vmem>>, vector<4x128xf32>
    %cst = arith.constant 1.17953563 : f32
    %1 = vector.broadcast %cst : f32 to vector<4x128xf32>
    %2 = arith.mulf %1, %0 : vector<4x128xf32>
    %c0_1 = arith.constant 0 : index
    %c0_2 = arith.constant 0 : index
    %3 = vector.load %arg1[%c0_1, %c0_2] : memref<4x128xf32, #tpu.memory_space<vmem>>, vector<4x128xf32>
    %c0_3 = arith.constant 0 : index
    %c0_4 = arith.constant 0 : index
    %4 = vector.load %arg2[%c0_3, %c0_4] : memref<4x128xf32, #tpu.memory_space<vmem>>, vector<4x128xf32>
    %5 = arith.mulf %3, %4 : vector<4x128xf32>
    %c0_5 = arith.constant 0 : index
    %c0_6 = arith.constant 0 : index
    %6 = vector.load %arg3[%c0_5, %c0_6] : memref<4x128xf32, #tpu.memory_space<vmem>>, vector<4x128xf32>
    %c0_7 = arith.constant 0 : index
    %c0_8 = arith.constant 0 : index
    %7 = vector.load %arg4[%c0_7, %c0_8] : memref<4x128xf32, #tpu.memory_space<vmem>>, vector<4x128xf32>
    %8 = arith.mulf %6, %7 : vector<4x128xf32>
    %9 = arith.addf %5, %8 : vector<4x128xf32>
    %cst_9 = arith.constant 5.000000e-01 : f32
    %10 = vector.broadcast %cst_9 : f32 to vector<4x128xf32>
    %11 = arith.mulf %10, %9 : vector<4x128xf32>
    %12 = arith.addf %2, %11 : vector<4x128xf32>
    %c0_10 = arith.constant 0 : index
    %c0_11 = arith.constant 0 : index
    %13 = vector.load %arg5[%c0_10, %c0_11] : memref<4x128xf32, #tpu.memory_space<vmem>>, vector<4x128xf32>
    tpu.vector_store %arg5[%c0_10, %c0_11], %12 {strides = array<i32>} : memref<4x128xf32, #tpu.memory_space<vmem>>, vector<4x128xf32>,
    return
  }
}

module attributes {stable_mosaic.version = 11 : i64} {
  func.func @kernel(%arg0: memref<12x128xf32, #tpu.memory_space<vmem>>, %arg1: memref<12x128xf32, #tpu.memory_space<vmem>>, %arg2: memref<12x128xf32, #tpu.memory_space<vmem>>, %arg3: memref<12x128xf32, #tpu.memory_space<vmem>>, %arg4: memref<12x128xf32, #tpu.memory_space<vmem>>, %arg5: memref<12x128xf32, #tpu.memory_space<vmem>>) attributes {dimension_semantics = [], scalar_prefetch = 0 : i64, scratch_operands = 0 : i64, tpu.core_type = #tpu.core_type<tc>} {
    %c0 = arith.constant 0 : index
    %c0_0 = arith.constant 0 : index
    %0 = vector.load %arg0[%c0, %c0_0] : memref<12x128xf32, #tpu.memory_space<vmem>>, vector<12x128xf32>
    %cst = arith.constant 0.816496611 : f32
    %1 = vector.broadcast %cst : f32 to vector<12x128xf32>
    %2 = arith.mulf %1, %0 : vector<12x128xf32>
    %c0_1 = arith.constant 0 : index
    %c0_2 = arith.constant 0 : index
    %3 = vector.load %arg1[%c0_1, %c0_2] : memref<12x128xf32, #tpu.memory_space<vmem>>, vector<12x128xf32>
    %c0_3 = arith.constant 0 : index
    %c0_4 = arith.constant 0 : index
    %4 = vector.load %arg2[%c0_3, %c0_4] : memref<12x128xf32, #tpu.memory_space<vmem>>, vector<12x128xf32>
    %5 = arith.mulf %3, %4 : vector<12x128xf32>
    %c0_5 = arith.constant 0 : index
    %c0_6 = arith.constant 0 : index
    %6 = vector.load %arg3[%c0_5, %c0_6] : memref<12x128xf32, #tpu.memory_space<vmem>>, vector<12x128xf32>
    %c0_7 = arith.constant 0 : index
    %c0_8 = arith.constant 0 : index
    %7 = vector.load %arg4[%c0_7, %c0_8] : memref<12x128xf32, #tpu.memory_space<vmem>>, vector<12x128xf32>
    %8 = arith.mulf %6, %7 : vector<12x128xf32>
    %9 = arith.addf %5, %8 : vector<12x128xf32>
    %cst_9 = arith.constant -0.408248305 : f32
    %10 = vector.broadcast %cst_9 : f32 to vector<12x128xf32>
    %11 = arith.mulf %10, %9 : vector<12x128xf32>
    %12 = arith.addf %2, %11 : vector<12x128xf32>
    %c0_10 = arith.constant 0 : index
    %c0_11 = arith.constant 0 : index
    %13 = vector.load %arg5[%c0_10, %c0_11] : memref<12x128xf32, #tpu.memory_space<vmem>>, vector<12x128xf32>
    tpu.vector_store %arg5[%c0_10, %c0_11], %12 {strides = array<i32>} : memref<12x128xf32, #tpu.memory_space<vmem>>, vector<12x128xf32>,
    return
  }
}

module attributes {stable_mosaic.version = 11 : i64} {
  func.func @kernel(%arg0: memref<8x128xf32, #tpu.memory_space<vmem>>, %arg1: memref<8x128xf32, #tpu.memory_space<vmem>>, %arg2: memref<8x128xf32, #tpu.memory_space<vmem>>, %arg3: memref<8x128xf32, #tpu.memory_space<vmem>>, %arg4: memref<8x128xf32, #tpu.memory_space<vmem>>, %arg5: memref<8x128xf32, #tpu.memory_space<vmem>>) attributes {dimension_semantics = [], scalar_prefetch = 0 : i64, scratch_operands = 0 : i64, tpu.core_type = #tpu.core_type<tc>} {
    %c0 = arith.constant 0 : index
    %c0_0 = arith.constant 0 : index
    %0 = vector.load %arg0[%c0, %c0_0] : memref<8x128xf32, #tpu.memory_space<vmem>>, vector<8x128xf32>
    %cst = arith.constant 1.17953563 : f32
    %1 = vector.broadcast %cst : f32 to vector<8x128xf32>
    %2 = arith.mulf %1, %0 : vector<8x128xf32>
    %c0_1 = arith.constant 0 : index
    %c0_2 = arith.constant 0 : index
    %3 = vector.load %arg1[%c0_1, %c0_2] : memref<8x128xf32, #tpu.memory_space<vmem>>, vector<8x128xf32>
    %c0_3 = arith.constant 0 : index
    %c0_4 = arith.constant 0 : index
    %4 = vector.load %arg2[%c0_3, %c0_4] : memref<8x128xf32, #tpu.memory_space<vmem>>, vector<8x128xf32>
    %5 = arith.mulf %3, %4 : vector<8x128xf32>
    %c0_5 = arith.constant 0 : index
    %c0_6 = arith.constant 0 : index
    %6 = vector.load %arg3[%c0_5, %c0_6] : memref<8x128xf32, #tpu.memory_space<vmem>>, vector<8x128xf32>
    %c0_7 = arith.constant 0 : index
    %c0_8 = arith.constant 0 : index
    %7 = vector.load %arg4[%c0_7, %c0_8] : memref<8x128xf32, #tpu.memory_space<vmem>>, vector<8x128xf32>
    %8 = arith.mulf %6, %7 : vector<8x128xf32>
    %9 = arith.addf %5, %8 : vector<8x128xf32>
    %cst_9 = arith.constant 5.000000e-01 : f32
    %10 = vector.broadcast %cst_9 : f32 to vector<8x128xf32>
    %11 = arith.mulf %10, %9 : vector<8x128xf32>
    %12 = arith.addf %2, %11 : vector<8x128xf32>
    %c0_10 = arith.constant 0 : index
    %c0_11 = arith.constant 0 : index
    %13 = vector.load %arg5[%c0_10, %c0_11] : memref<8x128xf32, #tpu.memory_space<vmem>>, vector<8x128xf32>
    tpu.vector_store %arg5[%c0_10, %c0_11], %12 {strides = array<i32>} : memref<8x128xf32, #tpu.memory_space<vmem>>, vector<8x128xf32>,
    return
  }
}

module attributes {stable_mosaic.version = 11 : i64} {
  func.func @kernel(%arg0: memref<20x128xf32, #tpu.memory_space<vmem>>, %arg1: memref<20x128xf32, #tpu.memory_space<vmem>>, %arg2: memref<20x128xf32, #tpu.memory_space<vmem>>, %arg3: memref<20x128xf32, #tpu.memory_space<vmem>>, %arg4: memref<20x128xf32, #tpu.memory_space<vmem>>, %arg5: memref<20x128xf32, #tpu.memory_space<vmem>>) attributes {dimension_semantics = [], scalar_prefetch = 0 : i64, scratch_operands = 0 : i64, tpu.core_type = #tpu.core_type<tc>} {
    %c0 = arith.constant 0 : index
    %c0_0 = arith.constant 0 : index
    %0 = vector.load %arg0[%c0, %c0_0] : memref<20x128xf32, #tpu.memory_space<vmem>>, vector<20x128xf32>
    %cst = arith.constant 0.816496611 : f32
    %1 = vector.broadcast %cst : f32 to vector<20x128xf32>
    %2 = arith.mulf %1, %0 : vector<20x128xf32>
    %c0_1 = arith.constant 0 : index
    %c0_2 = arith.constant 0 : index
    %3 = vector.load %arg1[%c0_1, %c0_2] : memref<20x128xf32, #tpu.memory_space<vmem>>, vector<20x128xf32>
    %c0_3 = arith.constant 0 : index
    %c0_4 = arith.constant 0 : index
    %4 = vector.load %arg2[%c0_3, %c0_4] : memref<20x128xf32, #tpu.memory_space<vmem>>, vector<20x128xf32>
    %5 = arith.mulf %3, %4 : vector<20x128xf32>
    %c0_5 = arith.constant 0 : index
    %c0_6 = arith.constant 0 : index
    %6 = vector.load %arg3[%c0_5, %c0_6] : memref<20x128xf32, #tpu.memory_space<vmem>>, vector<20x128xf32>
    %c0_7 = arith.constant 0 : index
    %c0_8 = arith.constant 0 : index
    %7 = vector.load %arg4[%c0_7, %c0_8] : memref<20x128xf32, #tpu.memory_space<vmem>>, vector<20x128xf32>
    %8 = arith.mulf %6, %7 : vector<20x128xf32>
    %9 = arith.addf %5, %8 : vector<20x128xf32>
    %cst_9 = arith.constant -0.408248305 : f32
    %10 = vector.broadcast %cst_9 : f32 to vector<20x128xf32>
    %11 = arith.mulf %10, %9 : vector<20x128xf32>
    %12 = arith.addf %2, %11 : vector<20x128xf32>
    %c0_10 = arith.constant 0 : index
    %c0_11 = arith.constant 0 : index
    %13 = vector.load %arg5[%c0_10, %c0_11] : memref<20x128xf32, #tpu.memory_space<vmem>>, vector<20x128xf32>
    tpu.vector_store %arg5[%c0_10, %c0_11], %12 {strides = array<i32>} : memref<20x128xf32, #tpu.memory_space<vmem>>, vector<20x128xf32>,
    return
  }
}

module attributes {stable_mosaic.version = 11 : i64} {
  func.func @kernel(%arg0: memref<16x128xf32, #tpu.memory_space<vmem>>, %arg1: memref<16x128xf32, #tpu.memory_space<vmem>>, %arg2: memref<16x128xf32, #tpu.memory_space<vmem>>, %arg3: memref<16x128xf32, #tpu.memory_space<vmem>>, %arg4: memref<16x128xf32, #tpu.memory_space<vmem>>, %arg5: memref<16x128xf32, #tpu.memory_space<vmem>>) attributes {dimension_semantics = [], scalar_prefetch = 0 : i64, scratch_operands = 0 : i64, tpu.core_type = #tpu.core_type<tc>} {
    %c0 = arith.constant 0 : index
    %c0_0 = arith.constant 0 : index
    %0 = vector.load %arg0[%c0, %c0_0] : memref<16x128xf32, #tpu.memory_space<vmem>>, vector<16x128xf32>
    %cst = arith.constant 1.17953563 : f32
    %1 = vector.broadcast %cst : f32 to vector<16x128xf32>
    %2 = arith.mulf %1, %0 : vector<16x128xf32>
    %c0_1 = arith.constant 0 : index
    %c0_2 = arith.constant 0 : index
    %3 = vector.load %arg1[%c0_1, %c0_2] : memref<16x128xf32, #tpu.memory_space<vmem>>, vector<16x128xf32>
    %c0_3 = arith.constant 0 : index
    %c0_4 = arith.constant 0 : index
    %4 = vector.load %arg2[%c0_3, %c0_4] : memref<16x128xf32, #tpu.memory_space<vmem>>, vector<16x128xf32>
    %5 = arith.mulf %3, %4 : vector<16x128xf32>
    %c0_5 = arith.constant 0 : index
    %c0_6 = arith.constant 0 : index
    %6 = vector.load %arg3[%c0_5, %c0_6] : memref<16x128xf32, #tpu.memory_space<vmem>>, vector<16x128xf32>
    %c0_7 = arith.constant 0 : index
    %c0_8 = arith.constant 0 : index
    %7 = vector.load %arg4[%c0_7, %c0_8] : memref<16x128xf32, #tpu.memory_space<vmem>>, vector<16x128xf32>
    %8 = arith.mulf %6, %7 : vector<16x128xf32>
    %9 = arith.addf %5, %8 : vector<16x128xf32>
    %cst_9 = arith.constant 5.000000e-01 : f32
    %10 = vector.broadcast %cst_9 : f32 to vector<16x128xf32>
    %11 = arith.mulf %10, %9 : vector<16x128xf32>
    %12 = arith.addf %2, %11 : vector<16x128xf32>
    %c0_10 = arith.constant 0 : index
    %c0_11 = arith.constant 0 : index
    %13 = vector.load %arg5[%c0_10, %c0_11] : memref<16x128xf32, #tpu.memory_space<vmem>>, vector<16x128xf32>
    tpu.vector_store %arg5[%c0_10, %c0_11], %12 {strides = array<i32>} : memref<16x128xf32, #tpu.memory_space<vmem>>, vector<16x128xf32>,
    return
  }
}

</mosaic_0001>

<bundles_post_ra>
// kernel: neg.14
= control target key start
LH: loop header
LB: loop body
LE: loop exit
PB: predicated region body
PF: predicated region fallthrough
CT: control target
= control target key end

     0   :  { %s1416_s0 = inlined_call_operand.vmem [shape: f32[11,2,2,16,16], index: 0, kind: input, shape index: {}]   ;;  %s1417_s1 = inlined_call_operand.vmem [shape: f32[11,2,2,16,16], index: 1, kind: output, shape index: {}]  }
   0x1   :  { %v2_v0 = vld [vmem:[%s1416_s0] sm:$0xff]  ;;  %v746_v43 = vld [vmem:[%s1416_s0 + $0x10] sm:$0xff] }
   0x2   :  { %v704_v1 = vld [vmem:[%s1416_s0 + $0x160] sm:$0xff]  ;;  %v5_v3 = vxor.u32 2147483648, %v2_v0  ;;  %v748_v44 = vld [vmem:[%s1416_s0 + $0x170] sm:$0xff]  ;;  %v180_v46 = vxor.u32 2147483648, %v746_v43 }
   0x3   :  { %v706_v2 = vld [vmem:[%s1416_s0 + $0x20] sm:$0xff]  ;;  %v12_v4 = vxor.u32 2147483648, %v704_v1  ;;  %v188_v47 = vxor.u32 2147483648, %v748_v44  ;;  %v750_v48 = vld [vmem:[%s1416_s0 + $0x30] sm:$0xff]  ;;  %v810_v44 = vld [vmem:[%s1416_s0 + $0xa8] sm:$0xff] }
   0x4   :  { %v20_v5 = vxor.u32 2147483648, %v706_v2  ;;  %v708_v6 = vld [vmem:[%s1416_s0 + $0x180] sm:$0xff]  ;;  %7 = vst [vmem:[%s1417_s1] sm:$0xff] %v5_v3  ;;  %v752_v49 = vld [vmem:[%s1416_s0 + $0x190] sm:$0xff]  ;;  %v196_v51 = vxor.u32 2147483648, %v750_v48  ;;  %747 = vst [vmem:[%s1417_s1 + $0x10] sm:$0xff] %v180_v46 }
   0x5   :  { %v710_v7 = vld [vmem:[%s1416_s0 + $0x40] sm:$0xff]  ;;  %v28_v9 = vxor.u32 2147483648, %v708_v6  ;;  %705 = vst [vmem:[%s1417_s1 + $0x160] sm:$0xff] %v12_v4  ;;  %v754_v50 = vld [vmem:[%s1416_s0 + $0x50] sm:$0xff]  ;;  %v204_v52 = vxor.u32 2147483648, %v752_v49  ;;  %749 = vst [vmem:[%s1417_s1 + $0x170] sm:$0xff] %v188_v47 }
   0x6   :  { %v712_v8 = vld [vmem:[%s1416_s0 + $0x1a0] sm:$0xff]  ;;  %v36_v10 = vxor.u32 2147483648, %v710_v7  ;;  %707 = vst [vmem:[%s1417_s1 + $0x20] sm:$0xff] %v20_v5  ;;  %v212_v53 = vxor.u32 2147483648, %v754_v50  ;;  %v756_v54 = vld [vmem:[%s1416_s0 + $0x1b0] sm:$0xff]  ;;  %751 = vst [vmem:[%s1417_s1 + $0x30] sm:$0xff] %v196_v51 }
   0x7   :  { %v44_v11 = vxor.u32 2147483648, %v712_v8  ;;  %v714_v12 = vld [vmem:[%s1416_s0 + $0x60] sm:$0xff]  ;;  %709 = vst [vmem:[%s1417_s1 + $0x180] sm:$0xff] %v28_v9  ;;  %v758_v55 = vld [vmem:[%s1416_s0 + $0x70] sm:$0xff]  ;;  %v220_v57 = vxor.u32 2147483648, %v756_v54  ;;  %753 = vst [vmem:[%s1417_s1 + $0x190] sm:$0xff] %v204_v52 }
   0x8   :  { %v716_v13 = vld [vmem:[%s1416_s0 + $0x1c0] sm:$0xff]  ;;  %v52_v15 = vxor.u32 2147483648, %v714_v12  ;;  %711 = vst [vmem:[%s1417_s1 + $0x40] sm:$0xff] %v36_v10  ;;  %v760_v56 = vld [vmem:[%s1416_s0 + $0x1d0] sm:$0xff]  ;;  %v228_v58 = vxor.u32 2147483648, %v758_v55  ;;  %755 = vst [vmem:[%s1417_s1 + $0x50] sm:$0xff] %v212_v53 }
   0x9   :  { %v718_v14 = vld [vmem:[%s1416_s0 + $0x80] sm:$0xff]  ;;  %v60_v16 = vxor.u32 2147483648, %v716_v13  ;;  %713 = vst [vmem:[%s1417_s1 + $0x1a0] sm:$0xff] %v44_v11  ;;  %v236_v59 = vxor.u32 2147483648, %v760_v56  ;;  %v762_v60 = vld [vmem:[%s1416_s0 + $0x90] sm:$0xff]  ;;  %757 = vst [vmem:[%s1417_s1 + $0x1b0] sm:$0xff] %v220_v57 }
   0xa   :  { %v68_v17 = vxor.u32 2147483648, %v718_v14  ;;  %v720_v18 = vld [vmem:[%s1416_s0 + $0x1e0] sm:$0xff]  ;;  %715 = vst [vmem:[%s1417_s1 + $0x60] sm:$0xff] %v52_v15  ;;  %v764_v61 = vld [vmem:[%s1416_s0 + $0x1f0] sm:$0xff]  ;;  %v244_v63 = vxor.u32 2147483648, %v762_v60  ;;  %759 = vst [vmem:[%s1417_s1 + $0x70] sm:$0xff] %v228_v58 }
   0xb   :  { %v722_v19 = vld [vmem:[%s1416_s0 + $0xa0] sm:$0xff]  ;;  %v76_v21 = vxor.u32 2147483648, %v720_v18  ;;  %717 = vst [vmem:[%s1417_s1 + $0x1c0] sm:$0xff] %v60_v16  ;;  %v766_v62 = vld [vmem:[%s1416_s0 + $0xb0] sm:$0xff]  ;;  %v252_v0 = vxor.u32 2147483648, %v764_v61  ;;  %761 = vst [vmem:[%s1417_s1 + $0x1d0] sm:$0xff] %v236_v59 }
   0xc   :  { %v724_v20 = vld [vmem:[%s1416_s0 + $0x200] sm:$0xff]  ;;  %v84_v22 = vxor.u32 2147483648, %v722_v19  ;;  %719 = vst [vmem:[%s1417_s1 + $0x80] sm:$0xff] %v68_v17  ;;  %v260_v1 = vxor.u32 2147483648, %v766_v62  ;;  %v768_v2 = vld [vmem:[%s1416_s0 + $0x210] sm:$0xff]  ;;  %763 = vst [vmem:[%s1417_s1 + $0x90] sm:$0xff] %v244_v63 }
   0xd   :  { %v92_v23 = vxor.u32 2147483648, %v724_v20  ;;  %v726_v24 = vld [vmem:[%s1416_s0 + $0xc0] sm:$0xff]  ;;  %721 = vst [vmem:[%s1417_s1 + $0x1e0] sm:$0xff] %v76_v21  ;;  %v770_v3 = vld [vmem:[%s1416_s0 + $0xd0] sm:$0xff]  ;;  %v268_v5 = vxor.u32 2147483648, %v768_v2  ;;  %765 = vst [vmem:[%s1417_s1 + $0x1f0] sm:$0xff] %v252_v0 }
   0xe   :  { %v728_v25 = vld [vmem:[%s1416_s0 + $0x220] sm:$0xff]  ;;  %v100_v27 = vxor.u32 2147483648, %v726_v24  ;;  %723 = vst [vmem:[%s1417_s1 + $0xa0] sm:$0xff] %v84_v22  ;;  %v772_v4 = vld [vmem:[%s1416_s0 + $0x230] sm:$0xff]  ;;  %v276_v6 = vxor.u32 2147483648, %v770_v3  ;;  %767 = vst [vmem:[%s1417_s1 + $0xb0] sm:$0xff] %v260_v1 }
   0xf   :  { %v730_v26 = vld [vmem:[%s1416_s0 + $0xe0] sm:$0xff]  ;;  %v108_v28 = vxor.u32 2147483648, %v728_v25  ;;  %725 = vst [vmem:[%s1417_s1 + $0x200] sm:$0xff] %v92_v23  ;;  %v284_v7 = vxor.u32 2147483648, %v772_v4  ;;  %v774_v8 = vld [vmem:[%s1416_s0 + $0xf0] sm:$0xff]  ;;  %769 = vst [vmem:[%s1417_s1 + $0x210] sm:$0xff] %v268_v5 }
  0x10   :  { %v116_v29 = vxor.u32 2147483648, %v730_v26  ;;  %v732_v30 = vld [vmem:[%s1416_s0 + $0x240] sm:$0xff]  ;;  %727 = vst [vmem:[%s1417_s1 + $0xc0] sm:$0xff] %v100_v27  ;;  %v776_v9 = vld [vmem:[%s1416_s0 + $0x250] sm:$0xff]  ;;  %v292_v11 = vxor.u32 2147483648, %v774_v8  ;;  %771 = vst [vmem:[%s1417_s1 + $0xd0] sm:$0xff] %v276_v6 }
  0x11   :  { %v734_v31 = vld [vmem:[%s1416_s0 + $0x100] sm:$0xff]  ;;  %v124_v33 = vxor.u32 2147483648, %v732_v30  ;;  %729 = vst [vmem:[%s1417_s1 + $0x220] sm:$0xff] %v108_v28  ;;  %v778_v10 = vld [vmem:[%s1416_s0 + $0x110] sm:$0xff]  ;;  %v300_v12 = vxor.u32 2147483648, %v776_v9  ;;  %773 = vst [vmem:[%s1417_s1 + $0x230] sm:$0xff] %v284_v7 }
  0x12   :  { %v736_v32 = vld [vmem:[%s1416_s0 + $0x260] sm:$0xff]  ;;  %v132_v34 = vxor.u32 2147483648, %v734_v31  ;;  %731 = vst [vmem:[%s1417_s1 + $0xe0] sm:$0xff] %v116_v29  ;;  %v308_v13 = vxor.u32 2147483648, %v778_v10  ;;  %v780_v14 = vld [vmem:[%s1416_s0 + $0x270] sm:$0xff]  ;;  %v790_v22 = vld [vmem:[%s1416_s0 + $0x8] sm:$0xff] }
  0x13   :  { %v140_v35 = vxor.u32 2147483648, %v736_v32  ;;  %v738_v36 = vld [vmem:[%s1416_s0 + $0x120] sm:$0xff]  ;;  %733 = vst [vmem:[%s1417_s1 + $0x240] sm:$0xff] %v124_v33  ;;  %v782_v15 = vld [vmem:[%s1416_s0 + $0x130] sm:$0xff]  ;;  %v316_v17 = vxor.u32 2147483648, %v780_v14  ;;  %775 = vst [vmem:[%s1417_s1 + $0xf0] sm:$0xff] %v292_v11 }
  0x14   :  { %v740_v37 = vld [vmem:[%s1416_s0 + $0x280] sm:$0xff]  ;;  %v148_v39 = vxor.u32 2147483648, %v738_v36  ;;  %735 = vst [vmem:[%s1417_s1 + $0x100] sm:$0xff] %v132_v34  ;;  %v784_v16 = vld [vmem:[%s1416_s0 + $0x290] sm:$0xff]  ;;  %v324_v18 = vxor.u32 2147483648, %v782_v15  ;;  %777 = vst [vmem:[%s1417_s1 + $0x250] sm:$0xff] %v300_v12 }
  0x15   :  { %v742_v38 = vld [vmem:[%s1416_s0 + $0x140] sm:$0xff]  ;;  %v156_v40 = vxor.u32 2147483648, %v740_v37  ;;  %737 = vst [vmem:[%s1417_s1 + $0x260] sm:$0xff] %v140_v35  ;;  %v332_v19 = vxor.u32 2147483648, %v784_v16  ;;  %v786_v20 = vld [vmem:[%s1416_s0 + $0x150] sm:$0xff]  ;;  %779 = vst [vmem:[%s1417_s1 + $0x110] sm:$0xff] %v308_v13 }
  0x16   :  { %v164_v41 = vxor.u32 2147483648, %v742_v38  ;;  %v744_v42 = vld [vmem:[%s1416_s0 + $0x2a0] sm:$0xff]  ;;  %739 = vst [vmem:[%s1417_s1 + $0x120] sm:$0xff] %v148_v39  ;;  %v788_v21 = vld [vmem:[%s1416_s0 + $0x2b0] sm:$0xff]  ;;  %v340_v23 = vxor.u32 2147483648, %v786_v20  ;;  %v356_v25 = vxor.u32 2147483648, %v790_v22 }
  0x17   :  { %v172_v45 = vxor.u32 2147483648, %v744_v42  ;;  %741 = vst [vmem:[%s1417_s1 + $0x280] sm:$0xff] %v156_v40  ;;  %v348_v24 = vxor.u32 2147483648, %v788_v21  ;;  %v792_v26 = vld [vmem:[%s1416_s0 + $0x168] sm:$0xff]  ;;  %781 = vst [vmem:[%s1417_s1 + $0x270] sm:$0xff] %v316_v17  ;;  %v436_v47 = vxor.u32 2147483648, %v810_v44 }
  0x18   :  { %743 = vst [vmem:[%s1417_s1 + $0x140] sm:$0xff] %v164_v41  ;;  %v794_v27 = vld [vmem:[%s1416_s0 + $0x28] sm:$0xff]  ;;  %783 = vst [vmem:[%s1417_s1 + $0x130] sm:$0xff] %v324_v18  ;;  %v364_v29 = vxor.u32 2147483648, %v792_v26  ;;  %v834_v4 = vld [vmem:[%s1416_s0 + $0x18] sm:$0xff] }
  0x19   :  { %745 = vst [vmem:[%s1417_s1 + $0x2a0] sm:$0xff] %v172_v45  ;;  %v796_v28 = vld [vmem:[%s1416_s0 + $0x188] sm:$0xff]  ;;  %785 = vst [vmem:[%s1417_s1 + $0x290] sm:$0xff] %v332_v19  ;;  %v372_v30 = vxor.u32 2147483648, %v794_v27  ;;  %v836_v5 = vld [vmem:[%s1416_s0 + $0x178] sm:$0xff]  ;;  %v532_v7 = vxor.u32 2147483648, %v834_v4 }
  0x1a   :  { %v380_v31 = vxor.u32 2147483648, %v796_v28  ;;  %v798_v32 = vld [vmem:[%s1416_s0 + $0x48] sm:$0xff]  ;;  %787 = vst [vmem:[%s1417_s1 + $0x150] sm:$0xff] %v340_v23  ;;  %789 = vst [vmem:[%s1417_s1 + $0x2b0] sm:$0xff] %v348_v24  ;;  %v838_v6 = vld [vmem:[%s1416_s0 + $0x38] sm:$0xff]  ;;  %v540_v8 = vxor.u32 2147483648, %v836_v5 }
  0x1b   :  { %v800_v33 = vld [vmem:[%s1416_s0 + $0x1a8] sm:$0xff]  ;;  %791 = vst [vmem:[%s1417_s1 + $0x8] sm:$0xff] %v356_v25  ;;  %v388_v35 = vxor.u32 2147483648, %v798_v32  ;;  %793 = vst [vmem:[%s1417_s1 + $0x168] sm:$0xff] %v364_v29  ;;  %v548_v9 = vxor.u32 2147483648, %v838_v6  ;;  %v840_v10 = vld [vmem:[%s1416_s0 + $0x198] sm:$0xff] }
  0x1c   :  { %v802_v34 = vld [vmem:[%s1416_s0 + $0x68] sm:$0xff]  ;;  %v396_v36 = vxor.u32 2147483648, %v800_v33  ;;  %795 = vst [vmem:[%s1417_s1 + $0x28] sm:$0xff] %v372_v30  ;;  %797 = vst [vmem:[%s1417_s1 + $0x188] sm:$0xff] %v380_v31  ;;  %v842_v11 = vld [vmem:[%s1416_s0 + $0x58] sm:$0xff]  ;;  %v556_v13 = vxor.u32 2147483648, %v840_v10 }
  0x1d   :  { %v404_v37 = vxor.u32 2147483648, %v802_v34  ;;  %v804_v38 = vld [vmem:[%s1416_s0 + $0x1c8] sm:$0xff]  ;;  %799 = vst [vmem:[%s1417_s1 + $0x48] sm:$0xff] %v388_v35  ;;  %811 = vst [vmem:[%s1417_s1 + $0xa8] sm:$0xff] %v436_v47  ;;  %v844_v12 = vld [vmem:[%s1416_s0 + $0x1b8] sm:$0xff]  ;;  %v564_v14 = vxor.u32 2147483648, %v842_v11 }
  0x1e   :  { %v806_v39 = vld [vmem:[%s1416_s0 + $0x88] sm:$0xff]  ;;  %v412_v41 = vxor.u32 2147483648, %v804_v38  ;;  %801 = vst [vmem:[%s1417_s1 + $0x1a8] sm:$0xff] %v396_v36  ;;  %v572_v15 = vxor.u32 2147483648, %v844_v12  ;;  %v846_v16 = vld [vmem:[%s1416_s0 + $0x78] sm:$0xff]  ;;  %835 = vst [vmem:[%s1417_s1 + $0x18] sm:$0xff] %v532_v7 }
  0x1f   :  { %v808_v40 = vld [vmem:[%s1416_s0 + $0x1e8] sm:$0xff]  ;;  %v420_v42 = vxor.u32 2147483648, %v806_v39  ;;  %803 = vst [vmem:[%s1417_s1 + $0x68] sm:$0xff] %v404_v37  ;;  %v848_v17 = vld [vmem:[%s1416_s0 + $0x1d8] sm:$0xff]  ;;  %837 = vst [vmem:[%s1417_s1 + $0x178] sm:$0xff] %v540_v8  ;;  %v580_v19 = vxor.u32 2147483648, %v846_v16 }
  0x20   :  { %v428_v43 = vxor.u32 2147483648, %v808_v40  ;;  %v812_v45 = vld [vmem:[%s1416_s0 + $0x208] sm:$0xff]  ;;  %805 = vst [vmem:[%s1417_s1 + $0x1c8] sm:$0xff] %v412_v41  ;;  %v850_v18 = vld [vmem:[%s1416_s0 + $0x98] sm:$0xff]  ;;  %839 = vst [vmem:[%s1417_s1 + $0x38] sm:$0xff] %v548_v9  ;;  %v588_v20 = vxor.u32 2147483648, %v848_v17 }
  0x21   :  { %v814_v46 = vld [vmem:[%s1416_s0 + $0xc8] sm:$0xff]  ;;  %v444_v48 = vxor.u32 2147483648, %v812_v45  ;;  %807 = vst [vmem:[%s1417_s1 + $0x88] sm:$0xff] %v420_v42  ;;  %v596_v21 = vxor.u32 2147483648, %v850_v18  ;;  %v852_v22 = vld [vmem:[%s1416_s0 + $0x1f8] sm:$0xff]  ;;  %841 = vst [vmem:[%s1417_s1 + $0x198] sm:$0xff] %v556_v13 }
  0x22   :  { %v452_v49 = vxor.u32 2147483648, %v814_v46  ;;  %v816_v50 = vld [vmem:[%s1416_s0 + $0x228] sm:$0xff]  ;;  %809 = vst [vmem:[%s1417_s1 + $0x1e8] sm:$0xff] %v428_v43  ;;  %v854_v23 = vld [vmem:[%s1416_s0 + $0xb8] sm:$0xff]  ;;  %843 = vst [vmem:[%s1417_s1 + $0x58] sm:$0xff] %v564_v14  ;;  %v604_v25 = vxor.u32 2147483648, %v852_v22 }
  0x23   :  { %v818_v51 = vld [vmem:[%s1416_s0 + $0xe8] sm:$0xff]  ;;  %v460_v53 = vxor.u32 2147483648, %v816_v50  ;;  %813 = vst [vmem:[%s1417_s1 + $0x208] sm:$0xff] %v444_v48  ;;  %v856_v24 = vld [vmem:[%s1416_s0 + $0x218] sm:$0xff]  ;;  %845 = vst [vmem:[%s1417_s1 + $0x1b8] sm:$0xff] %v572_v15  ;;  %v612_v26 = vxor.u32 2147483648, %v854_v23 }
  0x24   :  { %v820_v52 = vld [vmem:[%s1416_s0 + $0x248] sm:$0xff]  ;;  %v468_v54 = vxor.u32 2147483648, %v818_v51  ;;  %815 = vst [vmem:[%s1417_s1 + $0xc8] sm:$0xff] %v452_v49  ;;  %v620_v27 = vxor.u32 2147483648, %v856_v24  ;;  %v858_v28 = vld [vmem:[%s1416_s0 + $0xd8] sm:$0xff]  ;;  %847 = vst [vmem:[%s1417_s1 + $0x78] sm:$0xff] %v580_v19 }
  0x25   :  { %v476_v55 = vxor.u32 2147483648, %v820_v52  ;;  %v822_v56 = vld [vmem:[%s1416_s0 + $0x108] sm:$0xff]  ;;  %817 = vst [vmem:[%s1417_s1 + $0x228] sm:$0xff] %v460_v53  ;;  %v860_v29 = vld [vmem:[%s1416_s0 + $0x238] sm:$0xff]  ;;  %849 = vst [vmem:[%s1417_s1 + $0x1d8] sm:$0xff] %v588_v20  ;;  %v628_v31 = vxor.u32 2147483648, %v858_v28 }
  0x26   :  { %v824_v57 = vld [vmem:[%s1416_s0 + $0x268] sm:$0xff]  ;;  %v484_v59 = vxor.u32 2147483648, %v822_v56  ;;  %819 = vst [vmem:[%s1417_s1 + $0xe8] sm:$0xff] %v468_v54  ;;  %v862_v30 = vld [vmem:[%s1416_s0 + $0xf8] sm:$0xff]  ;;  %851 = vst [vmem:[%s1417_s1 + $0x98] sm:$0xff] %v596_v21  ;;  %v636_v32 = vxor.u32 2147483648, %v860_v29 }
  0x27   :  { %v826_v58 = vld [vmem:[%s1416_s0 + $0x128] sm:$0xff]  ;;  %v492_v60 = vxor.u32 2147483648, %v824_v57  ;;  %821 = vst [vmem:[%s1417_s1 + $0x248] sm:$0xff] %v476_v55  ;;  %v644_v33 = vxor.u32 2147483648, %v862_v30  ;;  %v864_v34 = vld [vmem:[%s1416_s0 + $0x258] sm:$0xff]  ;;  %853 = vst [vmem:[%s1417_s1 + $0x1f8] sm:$0xff] %v604_v25 }
  0x28   :  { %v500_v61 = vxor.u32 2147483648, %v826_v58  ;;  %v828_v62 = vld [vmem:[%s1416_s0 + $0x288] sm:$0xff]  ;;  %823 = vst [vmem:[%s1417_s1 + $0x108] sm:$0xff] %v484_v59  ;;  %v866_v35 = vld [vmem:[%s1416_s0 + $0x118] sm:$0xff]  ;;  %855 = vst [vmem:[%s1417_s1 + $0xb8] sm:$0xff] %v612_v26  ;;  %v652_v37 = vxor.u32 2147483648, %v864_v34 }
  0x29   :  { %v830_v63 = vld [vmem:[%s1416_s0 + $0x148] sm:$0xff]  ;;  %v508_v1 = vxor.u32 2147483648, %v828_v62  ;;  %825 = vst [vmem:[%s1417_s1 + $0x268] sm:$0xff] %v492_v60  ;;  %v868_v36 = vld [vmem:[%s1416_s0 + $0x278] sm:$0xff]  ;;  %857 = vst [vmem:[%s1417_s1 + $0x218] sm:$0xff] %v620_v27  ;;  %v660_v38 = vxor.u32 2147483648, %v866_v35 }
  0x2a   :  { %v832_v0 = vld [vmem:[%s1416_s0 + $0x2a8] sm:$0xff]  ;;  %v516_v2 = vxor.u32 2147483648, %v830_v63  ;;  %827 = vst [vmem:[%s1417_s1 + $0x128] sm:$0xff] %v500_v61  ;;  %v668_v39 = vxor.u32 2147483648, %v868_v36  ;;  %v870_v40 = vld [vmem:[%s1416_s0 + $0x138] sm:$0xff]  ;;  %859 = vst [vmem:[%s1417_s1 + $0xd8] sm:$0xff] %v628_v31 }
  0x2b   :  { %v524_v3 = vxor.u32 2147483648, %v832_v0  ;;  %829 = vst [vmem:[%s1417_s1 + $0x288] sm:$0xff] %v508_v1  ;;  %v872_v41 = vld [vmem:[%s1416_s0 + $0x298] sm:$0xff]  ;;  %861 = vst [vmem:[%s1417_s1 + $0x238] sm:$0xff] %v636_v32  ;;  %v676_v43 = vxor.u32 2147483648, %v870_v40 }
  0x2c   :  { %831 = vst [vmem:[%s1417_s1 + $0x148] sm:$0xff] %v516_v2  ;;  %v874_v42 = vld [vmem:[%s1416_s0 + $0x158] sm:$0xff]  ;;  %863 = vst [vmem:[%s1417_s1 + $0xf8] sm:$0xff] %v644_v33  ;;  %v684_v44 = vxor.u32 2147483648, %v872_v41 }
  0x2d   :  { %833 = vst [vmem:[%s1417_s1 + $0x2a8] sm:$0xff] %v524_v3  ;;  %v692_v45 = vxor.u32 2147483648, %v874_v42  ;;  %v876_v46 = vld [vmem:[%s1416_s0 + $0x2b8] sm:$0xff]  ;;  %865 = vst [vmem:[%s1417_s1 + $0x258] sm:$0xff] %v652_v37 }
  0x2e   :  { %867 = vst [vmem:[%s1417_s1 + $0x118] sm:$0xff] %v660_v38  ;;  %869 = vst [vmem:[%s1417_s1 + $0x278] sm:$0xff] %v668_v39  ;;  %v700_v47 = vxor.u32 2147483648, %v876_v46 }
  0x2f   :  { %871 = vst [vmem:[%s1417_s1 + $0x138] sm:$0xff] %v676_v43  ;;  %873 = vst [vmem:[%s1417_s1 + $0x298] sm:$0xff] %v684_v44 }
  0x30   :  { %875 = vst [vmem:[%s1417_s1 + $0x158] sm:$0xff] %v692_v45  ;;  %877 = vst [vmem:[%s1417_s1 + $0x2b8] sm:$0xff] %v700_v47 }

// kernel: squeeze.380
= control target key start
LH: loop header
LB: loop body
LE: loop exit
PB: predicated region body
PF: predicated region fallthrough
CT: control target
= control target key end

     0   :  { %s103_s8 = smov 112   ;;  %s104_s11 = smov 80   ;;  %vm4_vm0 = vcmask 130048   ;;  %s157_s0 = inlined_call_operand.vmem [shape: f32[2,1,16,16], index: 0, kind: input, shape index: {}]   ;;  %s158_s1 = inlined_call_operand.hbm [shape: f32[4,128], index: 1, kind: output, shape index: {}]  }
   0x1   :  { %v64_v0 = vld [vmem:[%s157_s0 + $0x7] ss:$8 sm:$0xf]   ;;  %v66_v1 = vld [vmem:[%s157_s0 + $0x5] ss:$8 sm:$0xf]  }
   0x2   :  { %8 = vrot.lane.b32.xlu0 %v64_v0, %s103_s8  ;;  %20 = vrot.lane.b32.xlu1 %v66_v1, %s104_s11  ;;  %v65_v2 = vld [vmem:[%s157_s0 + $0x6] ss:$8 sm:$0xf]   ;;  %v67_v3 = vld [vmem:[%s157_s0 + $0x4] ss:$8 sm:$0xf]  }
   0x3   :  { %s105_s16 = smov 96   ;;  %v3_v4 = vld [vmem:[%s157_s0] ss:$8 sm:$0xf]   ;;  %s106_s19 = smov 64  }
   0x4   :  { %v68_v5 = vld [vmem:[%s157_s0 + $0x3] ss:$8 sm:$0xf]   ;;  %5 = vst.msk [vmem:[#allocation2] sm:$0xf] %vm4_vm0, %v3_v4  }
   0x6   :  { %14 = vrot.lane.b32.xlu0 %v65_v2, %s105_s16  ;;  %26 = vrot.lane.b32.xlu1 %v67_v3, %s106_s19 }
   0x7   :  { %2 = vsyncpa [#allocation1], 0  ;;  %v69_v6 = vld [vmem:[%s157_s0 + $0x2] ss:$8 sm:$0xf]   ;;  %s107_s24 = smov 48  }
   0x8   :  { %s108_s25 = smov 32   ;;  %v70_v7 = vld [vmem:[%s157_s0 + $0x1] ss:$8 sm:$0xf]   ;;  %s109_s0 = smov 16   ;;  %vm10_vm1 = vcmask 1048448  }
   0x9   :  { %vm16_vm2 = vcmask 917248   ;;  %vm22_vm3 = vcmask 786048   ;;  %vm28_vm4 = vcmask 654848   ;;  %vm34_vm5 = vcmask 523648   ;;  %s110_s28 = smov [#allocation0]  }
   0xa   :  { %32 = vrot.lane.b32.xlu0 %v68_v5, %s107_s24  ;;  %38 = vrot.lane.b32.xlu1 %v69_v6, %s108_s25  ;;  %vm40_vm6 = vcmask 392448   ;;  %vm46_vm7 = vcmask 261248   ;;  %s58_s29 = sshll.u32 %s110_s28, 4  ;;  %s59_s29 = int_to_ptr.vmem [resolvable:$true] %s58_s29 }
   0xb   :  { %s79_s30 = scalar_lea.vmem %s59_s29, 64  ;;  %p84_p1 = scmp.lt.s32.totalorder %s59_s29, %s59_s29 }
   0xc   :  { %p80_p0 = scmp.ne.s32.totalorder %s59_s29, %s79_s30  ;;  %p85_p2 = scmp.lt.s32.totalorder %s79_s30, %s79_s30 }
   0xe   :  { %44 = vrot.lane.b32.xlu0 %v70_v7, %s109_s0  ;;  %p86_p3 = por %p85_p2, %p84_p1 }
  0x10   :  { %p87_p4 = pnand %p86_p3, %p80_p0 }
  0x74   :  { %v9_v8 = vpop.permute.xlu0 %8   ;;  %v21_v9 = vpop.permute.xlu1 %20  }
  0x75   :  { %11 = vst.msk [vmem:[#allocation2] sm:$0xf] %vm10_vm1, %v9_v8  }
  0x78   :  { %v15_v10 = vpop.permute.xlu0 %14   ;;  %v27_v11 = vpop.permute.xlu1 %26  }
  0x79   :  { %17 = vst.msk [vmem:[#allocation2] sm:$0xf] %vm16_vm2, %v15_v10  }
  0x7a   :  { %23 = vst.msk [vmem:[#allocation2] sm:$0xf] %vm22_vm3, %v21_v9  }
  0x7b   :  { %29 = vst.msk [vmem:[#allocation2] sm:$0xf] %vm28_vm4, %v27_v11  }
  0x7c   :  { %v33_v12 = vpop.permute.xlu0 %32   ;;  %v39_v13 = vpop.permute.xlu1 %38  }
  0x7d   :  { %35 = vst.msk [vmem:[#allocation2] sm:$0xf] %vm34_vm5, %v33_v12  }
  0x7e   :  { %41 = vst.msk [vmem:[#allocation2] sm:$0xf] %vm40_vm6, %v39_v13  }
  0x80   :  { %v45_v14 = vpop.permute.xlu0 %44  }
  0x81   :  { %47 = vst.msk [vmem:[#allocation2] sm:$0xf] %vm46_vm7, %v45_v14  }
  0x88   :  { %v51_v15 = vld [vmem:[#allocation2] sm:$0xf] }
  0x89   :  { %53 = vst [vmem:[#allocation0] sm:$0xf] %v51_v15 }
  0x8a   :  { %90 = shalt.err (!%p87_p4)
}
  0x8b   :  { %s91_s4 = scalar_lea.hbm %s158_s1, 64 }
  0x8c   :  { %p92_p5 = scmp.ne.s32.totalorder %s158_s1, %s91_s4  ;;  %p95_p6 = scmp.lt.u32.totalorder %s91_s4, %s158_s1 }
  0x8e   :  { %p97_p7 = pnand %p95_p6, %p92_p5 }
  0x90   :  { %100 = shalt.err (!%p97_p7)
}
  0x91   :  { %61 = dma.vmem_to_hbm [thread:$0]  %s59_s29, 64, %s158_s1, [#allocation1]  }
  0x92   :  { %101 = dma.done.wait [#allocation1], 64  }
  0x93   :  { %102 = vsyncadd [#allocation1], 4294967232 }
  0x94   :  { %63 = vsyncpa [#allocation1], 1 }

// kernel: neg.24
= control target key start
LH: loop header
LB: loop body
LE: loop exit
PB: predicated region body
PF: predicated region fallthrough
CT: control target
= control target key end

     0   :  { %s648_s0 = inlined_call_operand.vmem [shape: f32[5,2,2,16,16], index: 0, kind: input, shape index: {}]   ;;  %s649_s1 = inlined_call_operand.vmem [shape: f32[5,2,2,16,16], index: 1, kind: output, shape index: {}]  }
   0x1   :  { %v2_v0 = vld [vmem:[%s648_s0] sm:$0xff]  ;;  %v338_v19 = vld [vmem:[%s648_s0 + $0x10] sm:$0xff]  ;;  %v358_v38 = vld [vmem:[%s648_s0 + $0x8] sm:$0xff] }
   0x2   :  { %v320_v1 = vld [vmem:[%s648_s0 + $0xa0] sm:$0xff]  ;;  %v5_v3 = vxor.u32 2147483648, %v2_v0  ;;  %v340_v20 = vld [vmem:[%s648_s0 + $0xb0] sm:$0xff]  ;;  %v84_v22 = vxor.u32 2147483648, %v338_v19  ;;  %v164_v41 = vxor.u32 2147483648, %v358_v38  ;;  %v360_v42 = vld [vmem:[%s648_s0 + $0xa8] sm:$0xff] }
   0x3   :  { %v322_v2 = vld [vmem:[%s648_s0 + $0x20] sm:$0xff]  ;;  %v12_v4 = vxor.u32 2147483648, %v320_v1  ;;  %v92_v23 = vxor.u32 2147483648, %v340_v20  ;;  %v342_v24 = vld [vmem:[%s648_s0 + $0x30] sm:$0xff]  ;;  %v362_v43 = vld [vmem:[%s648_s0 + $0x28] sm:$0xff]  ;;  %v172_v45 = vxor.u32 2147483648, %v360_v42 }
   0x4   :  { %v20_v5 = vxor.u32 2147483648, %v322_v2  ;;  %v324_v6 = vld [vmem:[%s648_s0 + $0xc0] sm:$0xff]  ;;  %7 = vst [vmem:[%s649_s1] sm:$0xff] %v5_v3  ;;  %v344_v25 = vld [vmem:[%s648_s0 + $0xd0] sm:$0xff]  ;;  %v100_v27 = vxor.u32 2147483648, %v342_v24  ;;  %339 = vst [vmem:[%s649_s1 + $0x10] sm:$0xff] %v84_v22  ;;  %v180_v46 = vxor.u32 2147483648, %v362_v43 }
   0x5   :  { %v326_v7 = vld [vmem:[%s648_s0 + $0x40] sm:$0xff]  ;;  %v28_v9 = vxor.u32 2147483648, %v324_v6  ;;  %321 = vst [vmem:[%s649_s1 + $0xa0] sm:$0xff] %v12_v4  ;;  %v346_v26 = vld [vmem:[%s648_s0 + $0x50] sm:$0xff]  ;;  %v108_v28 = vxor.u32 2147483648, %v344_v25  ;;  %341 = vst [vmem:[%s649_s1 + $0xb0] sm:$0xff] %v92_v23 }
   0x6   :  { %v328_v8 = vld [vmem:[%s648_s0 + $0xe0] sm:$0xff]  ;;  %v36_v10 = vxor.u32 2147483648, %v326_v7  ;;  %323 = vst [vmem:[%s649_s1 + $0x20] sm:$0xff] %v20_v5  ;;  %v116_v29 = vxor.u32 2147483648, %v346_v26  ;;  %v348_v30 = vld [vmem:[%s648_s0 + $0xf0] sm:$0xff]  ;;  %343 = vst [vmem:[%s649_s1 + $0x30] sm:$0xff] %v100_v27 }
   0x7   :  { %v44_v11 = vxor.u32 2147483648, %v328_v8  ;;  %v330_v12 = vld [vmem:[%s648_s0 + $0x60] sm:$0xff]  ;;  %325 = vst [vmem:[%s649_s1 + $0xc0] sm:$0xff] %v28_v9  ;;  %v350_v31 = vld [vmem:[%s648_s0 + $0x70] sm:$0xff]  ;;  %v124_v33 = vxor.u32 2147483648, %v348_v30  ;;  %345 = vst [vmem:[%s649_s1 + $0xd0] sm:$0xff] %v108_v28 }
   0x8   :  { %v332_v13 = vld [vmem:[%s648_s0 + $0x100] sm:$0xff]  ;;  %v52_v15 = vxor.u32 2147483648, %v330_v12  ;;  %327 = vst [vmem:[%s649_s1 + $0x40] sm:$0xff] %v36_v10  ;;  %v352_v32 = vld [vmem:[%s648_s0 + $0x110] sm:$0xff]  ;;  %v132_v34 = vxor.u32 2147483648, %v350_v31  ;;  %347 = vst [vmem:[%s649_s1 + $0x50] sm:$0xff] %v116_v29 }
   0x9   :  { %v334_v14 = vld [vmem:[%s648_s0 + $0x80] sm:$0xff]  ;;  %v60_v16 = vxor.u32 2147483648, %v332_v13  ;;  %329 = vst [vmem:[%s649_s1 + $0xe0] sm:$0xff] %v44_v11  ;;  %v140_v35 = vxor.u32 2147483648, %v352_v32  ;;  %v354_v36 = vld [vmem:[%s648_s0 + $0x90] sm:$0xff]  ;;  %v364_v44 = vld [vmem:[%s648_s0 + $0xc8] sm:$0xff] }
   0xa   :  { %v68_v17 = vxor.u32 2147483648, %v334_v14  ;;  %v336_v18 = vld [vmem:[%s648_s0 + $0x120] sm:$0xff]  ;;  %331 = vst [vmem:[%s649_s1 + $0x60] sm:$0xff] %v52_v15  ;;  %v356_v37 = vld [vmem:[%s648_s0 + $0x130] sm:$0xff]  ;;  %v148_v39 = vxor.u32 2147483648, %v354_v36  ;;  %349 = vst [vmem:[%s649_s1 + $0xf0] sm:$0xff] %v124_v33 }
   0xb   :  { %v76_v21 = vxor.u32 2147483648, %v336_v18  ;;  %333 = vst [vmem:[%s649_s1 + $0x100] sm:$0xff] %v60_v16  ;;  %v156_v40 = vxor.u32 2147483648, %v356_v37  ;;  %351 = vst [vmem:[%s649_s1 + $0x70] sm:$0xff] %v132_v34  ;;  %v188_v47 = vxor.u32 2147483648, %v364_v44  ;;  %v366_v48 = vld [vmem:[%s648_s0 + $0x48] sm:$0xff] }
   0xc   :  { %335 = vst [vmem:[%s649_s1 + $0x80] sm:$0xff] %v68_v17  ;;  %353 = vst [vmem:[%s649_s1 + $0x110] sm:$0xff] %v140_v35  ;;  %v368_v49 = vld [vmem:[%s648_s0 + $0xe8] sm:$0xff]  ;;  %v196_v51 = vxor.u32 2147483648, %v366_v48  ;;  %v378_v60 = vld [vmem:[%s648_s0 + $0x18] sm:$0xff] }
   0xd   :  { %337 = vst [vmem:[%s649_s1 + $0x120] sm:$0xff] %v76_v21  ;;  %v370_v50 = vld [vmem:[%s648_s0 + $0x68] sm:$0xff]  ;;  %355 = vst [vmem:[%s649_s1 + $0x90] sm:$0xff] %v148_v39  ;;  %v204_v52 = vxor.u32 2147483648, %v368_v49  ;;  %v380_v61 = vld [vmem:[%s648_s0 + $0xb8] sm:$0xff]  ;;  %v244_v63 = vxor.u32 2147483648, %v378_v60 }
   0xe   :  { %357 = vst [vmem:[%s649_s1 + $0x130] sm:$0xff] %v156_v40  ;;  %359 = vst [vmem:[%s649_s1 + $0x8] sm:$0xff] %v164_v41  ;;  %v212_v53 = vxor.u32 2147483648, %v370_v50  ;;  %v372_v54 = vld [vmem:[%s648_s0 + $0x108] sm:$0xff]  ;;  %v382_v62 = vld [vmem:[%s648_s0 + $0x38] sm:$0xff]  ;;  %v252_v0 = vxor.u32 2147483648, %v380_v61 }
   0xf   :  { %v374_v55 = vld [vmem:[%s648_s0 + $0x88] sm:$0xff]  ;;  %361 = vst [vmem:[%s649_s1 + $0xa8] sm:$0xff] %v172_v45  ;;  %363 = vst [vmem:[%s649_s1 + $0x28] sm:$0xff] %v180_v46  ;;  %v220_v57 = vxor.u32 2147483648, %v372_v54  ;;  %v260_v1 = vxor.u32 2147483648, %v382_v62  ;;  %v384_v2 = vld [vmem:[%s648_s0 + $0xd8] sm:$0xff] }
  0x10   :  { %v376_v56 = vld [vmem:[%s648_s0 + $0x128] sm:$0xff]  ;;  %365 = vst [vmem:[%s649_s1 + $0xc8] sm:$0xff] %v188_v47  ;;  %v228_v58 = vxor.u32 2147483648, %v374_v55  ;;  %367 = vst [vmem:[%s649_s1 + $0x48] sm:$0xff] %v196_v51  ;;  %v386_v3 = vld [vmem:[%s648_s0 + $0x58] sm:$0xff]  ;;  %v268_v5 = vxor.u32 2147483648, %v384_v2 }
  0x11   :  { %v236_v59 = vxor.u32 2147483648, %v376_v56  ;;  %369 = vst [vmem:[%s649_s1 + $0xe8] sm:$0xff] %v204_v52  ;;  %371 = vst [vmem:[%s649_s1 + $0x68] sm:$0xff] %v212_v53  ;;  %v388_v4 = vld [vmem:[%s648_s0 + $0xf8] sm:$0xff]  ;;  %v276_v6 = vxor.u32 2147483648, %v386_v3 }
  0x12   :  { %373 = vst [vmem:[%s649_s1 + $0x108] sm:$0xff] %v220_v57  ;;  %375 = vst [vmem:[%s649_s1 + $0x88] sm:$0xff] %v228_v58  ;;  %v284_v7 = vxor.u32 2147483648, %v388_v4  ;;  %v390_v8 = vld [vmem:[%s648_s0 + $0x78] sm:$0xff] }
  0x13   :  { %377 = vst [vmem:[%s649_s1 + $0x128] sm:$0xff] %v236_v59  ;;  %v392_v9 = vld [vmem:[%s648_s0 + $0x118] sm:$0xff]  ;;  %379 = vst [vmem:[%s649_s1 + $0x18] sm:$0xff] %v244_v63  ;;  %v292_v11 = vxor.u32 2147483648, %v390_v8 }
  0x14   :  { %v394_v10 = vld [vmem:[%s648_s0 + $0x98] sm:$0xff]  ;;  %381 = vst [vmem:[%s649_s1 + $0xb8] sm:$0xff] %v252_v0  ;;  %383 = vst [vmem:[%s649_s1 + $0x38] sm:$0xff] %v260_v1  ;;  %v300_v12 = vxor.u32 2147483648, %v392_v9 }
  0x15   :  { %v308_v13 = vxor.u32 2147483648, %v394_v10  ;;  %v396_v14 = vld [vmem:[%s648_s0 + $0x138] sm:$0xff]  ;;  %385 = vst [vmem:[%s649_s1 + $0xd8] sm:$0xff] %v268_v5  ;;  %387 = vst [vmem:[%s649_s1 + $0x58] sm:$0xff] %v276_v6 }
  0x16   :  { %389 = vst [vmem:[%s649_s1 + $0xf8] sm:$0xff] %v284_v7  ;;  %v316_v15 = vxor.u32 2147483648, %v396_v14  ;;  %391 = vst [vmem:[%s649_s1 + $0x78] sm:$0xff] %v292_v11 }
  0x17   :  { %393 = vst [vmem:[%s649_s1 + $0x118] sm:$0xff] %v300_v12  ;;  %395 = vst [vmem:[%s649_s1 + $0x98] sm:$0xff] %v308_v13 }
  0x18   :  { %397 = vst [vmem:[%s649_s1 + $0x138] sm:$0xff] %v316_v15 }

// kernel: _forward.12
= control target key start
LH: loop header
LB: loop body
LE: loop exit
PB: predicated region body
PF: predicated region fallthrough
CT: control target
= control target key end

     0   :  { %s573_s0 = inlined_call_operand.<no memory space> [shape: f32[1,1], index: 0, kind: input, shape index: {}]   ;;  %s574_s2 = inlined_call_operand.vmem [shape: f32[44,128], index: 2, kind: input, shape index: {}]   ;;  %s575_s3 = inlined_call_operand.hbm [shape: f32[44,128], index: 3, kind: input, shape index: {}]   ;;  %s576_s4 = inlined_call_operand.vmem [shape: f32[44,128], index: 4, kind: input, shape index: {}]   ;;  %s577_s5 = inlined_call_operand.hbm [shape: f32[44,128], index: 5, kind: input, shape index: {}]   ;;  %s578_s6 = inlined_call_operand.vmem [shape: f32[44,128], index: 6, kind: input, shape index: {}]   ;;  %s579_s7 = inlined_call_operand.vmem [shape: f32[44,128], index: 7, kind: output, shape index: {0}]   ;;  %s580_s8 = inlined_call_operand.vmem [shape: f32[44,128], index: 8, kind: output, shape index: {1}]   ;;  %s581_s9 = inlined_call_operand.hbm [shape: f32[1,1], index: 9, kind: output, shape index: {2}]   ;;  %s582_s1 = inlined_call_operand.<no memory space> [shape: f32[1,1], index: 1, kind: input, shape index: {}]  }
   0x1   :  { %v15_v0 = vstv %s573_s0  ;;  %v17_v1 = vstv %s582_s1 }
   0x2   :  { %16 = vst [vmem:[#allocation2] sm:$0x1] %v15_v0  ;;  %18 = vst [vmem:[#allocation3] sm:$0x1] %v17_v1 }
   0x3   :  { %19 = vsyncpa [#allocation5], 0 }
   0x4   :  { %20 = vsyncpa [#allocation8], 0 }
   0x5   :  { %21 = vsyncpa [#allocation6], 0  ;;  %s385_s13 = smov [#allocation4]   ;;  %s313_s17 = scalar_lea.hbm %s575_s3, 768 }
   0x6   :  { %s33_s14 = sshll.u32 %s385_s13, 4  ;;  %p314_p0 = scmp.ne.s32.totalorder %s575_s3, %s313_s17  ;;  %s34_s14 = int_to_ptr.vmem [resolvable:$true] %s33_s14 }
   0x7   :  { %p317_p1 = scmp.lt.u32.totalorder %s313_s17, %s575_s3 }
   0x9   :  { %p319_p2 = pnand %p317_p1, %p314_p0 }
   0xb   :  { %322 = shalt.err (!%p319_p2)
}
   0xc   :  { %s323_s1 = scalar_lea.vmem %s34_s14, 768  ;;  %p328_p4 = scmp.lt.s32.totalorder %s34_s14, %s34_s14 }
   0xd   :  { %p324_p3 = scmp.ne.s32.totalorder %s34_s14, %s323_s1  ;;  %p329_p5 = scmp.lt.s32.totalorder %s323_s1, %s323_s1 }
   0xf   :  { %p330_p6 = por %p329_p5, %p328_p4 }
  0x11   :  { %p331_p7 = pnand %p330_p6, %p324_p3 }
  0x13   :  { %334 = shalt.err (!%p331_p7)
}
  0x14   :  { %s386_s21 = smov 128   ;;  %s387_s22 = smov 8  }
  0x15   :  { %39 = dma.hbm_to_vmem [thread:$0]  %s575_s3, 768, %s34_s14, [#allocation5], %s386_s21, %s386_s21, %s387_s22  }
  0x16   :  { %s388_s25 = smov [#allocation7]   ;;  %s335_s29 = scalar_lea.hbm %s577_s5, 768 }
  0x17   :  { %s47_s26 = sshll.u32 %s388_s25, 4  ;;  %p336_p8 = scmp.ne.s32.totalorder %s577_s5, %s335_s29  ;;  %s48_s26 = int_to_ptr.vmem [resolvable:$true] %s47_s26 }
  0x18   :  { %p339_p9 = scmp.lt.u32.totalorder %s335_s29, %s577_s5 }
  0x1a   :  { %p341_p10 = pnand %p339_p9, %p336_p8 }
  0x1c   :  { %344 = shalt.err (!%p341_p10)
}
  0x1d   :  { %s345_s13 = scalar_lea.vmem %s48_s26, 768  ;;  %p350_p12 = scmp.lt.s32.totalorder %s48_s26, %s48_s26 }
  0x1e   :  { %p346_p11 = scmp.ne.s32.totalorder %s48_s26, %s345_s13  ;;  %p351_p13 = scmp.lt.s32.totalorder %s345_s13, %s345_s13 }
  0x20   :  { %p352_p0 = por %p351_p13, %p350_p12 }
  0x22   :  { %p353_p1 = pnand %p352_p0, %p346_p11 }
  0x24   :  { %356 = shalt.err (!%p353_p1)
}
  0x25   :  { %53 = dma.hbm_to_vmem [thread:$0]  %s577_s5, 768, %s48_s26, [#allocation8], %s386_s21, %s386_s21, %s387_s22  }
  0x26   :  { %379 = dma.done.wait [#allocation5], 768  }
  0x27   :  { %380 = vsyncadd [#allocation5], 4294966528 }
  0x28   :  { %381 = dma.done.wait [#allocation8], 768  }
  0x29   :  { %382 = vsyncadd [#allocation8], 4294966528  ;;  %v389_v2 = vmov 0   ;;  %v283_v3 = vld [vmem:[#allocation3] ss:$0 sm:$0xff]  ;;  %v74_v5 = vld [vmem:[#allocation4] sm:$0xff] }
  0x2a   :  { %299 = vset.pattern.permute.xlu0 %v389_v2  ;;  %300 = vset.pattern.permute.xlu1 %v389_v2  ;;  %v284_v4 = vld [vmem:[#allocation2] ss:$0 sm:$0xff]  ;;  %v75_v7 = vld [vmem:[#allocation4 + $0x8] sm:$0xff]  ;;  %v76_v8 = vld [vmem:[#allocation4 + $0x10] sm:$0xff]  ;;  %vm244_vm0 = vcmask 1043456   ;;  %vm257_vm1 = vcmask 0  }
  0x2b   :  { %141 = vperm.xlu0 %299, %v283_v3   ;;  %163 = vperm.xlu1 %300, %v284_v4   ;;  %v62_v6 = vld [vmem:[%s574_s2] sm:$0xff]  ;;  %v63_v10 = vld [vmem:[%s574_s2 + $0x8] sm:$0xff]  ;;  %v64_v14 = vld [vmem:[%s574_s2 + $0x10] sm:$0xff] }
  0x2c   :  { %v77_v9 = vld [vmem:[#allocation4 + $0x18] sm:$0xff]  ;;  %v78_v11 = vld [vmem:[#allocation4 + $0x20] sm:$0xff]  ;;  %v79_v12 = vld [vmem:[#allocation4 + $0x28] sm:$0xf]  ;;  %v68_v28 = vmul.f32 0.84779125, %v62_v6 }
  0x2d   :  { %v80_v13 = vld [vmem:[%s576_s4] sm:$0xff]  ;;  %v81_v15 = vld [vmem:[%s576_s4 + $0x8] sm:$0xff]  ;;  %v82_v16 = vld [vmem:[%s576_s4 + $0x10] sm:$0xff]  ;;  %v69_v35 = vmul.f32 0.84779125, %v63_v10 }
  0x2e   :  { %v83_v17 = vld [vmem:[%s576_s4 + $0x18] sm:$0xff]  ;;  %v84_v19 = vld [vmem:[%s576_s4 + $0x20] sm:$0xff]  ;;  %v85_v20 = vld [vmem:[%s576_s4 + $0x28] sm:$0xf]  ;;  %v86_v23 = vmul.f32 %v80_v13, %v74_v5  ;;  %v87_v29 = vmul.f32 %v81_v15, %v75_v7  ;;  %v88_v30 = vmul.f32 %v82_v16, %v76_v8  ;;  %v70_v42 = vmul.f32 0.84779125, %v64_v14 }
  0x2f   :  { %v65_v18 = vld [vmem:[%s574_s2 + $0x18] sm:$0xff]  ;;  %v66_v22 = vld [vmem:[%s574_s2 + $0x20] sm:$0xff]  ;;  %v95_v26 = vld [vmem:[#allocation7 + $0x18] sm:$0xff]  ;;  %v89_v31 = vmul.f32 %v83_v17, %v77_v9  ;;  %v90_v36 = vmul.f32 %v84_v19, %v78_v11  ;;  %v91_v37 = vmul.f32 %v85_v20, %v79_v12 }
  0x30   :  { %v92_v21 = vld [vmem:[#allocation7] sm:$0xff]  ;;  %v93_v24 = vld [vmem:[#allocation7 + $0x8] sm:$0xff]  ;;  %v94_v25 = vld [vmem:[#allocation7 + $0x10] sm:$0xff]  ;;  %v71_v48 = vmul.f32 0.84779125, %v65_v18 }
  0x31   :  { %v67_v27 = vld [vmem:[%s574_s2 + $0x28] sm:$0xf]  ;;  %v96_v32 = vld [vmem:[#allocation7 + $0x20] sm:$0xff]  ;;  %v97_v33 = vld [vmem:[#allocation7 + $0x28] sm:$0xf] }
  0x32   :  { %v98_v34 = vld [vmem:[%s578_s6] sm:$0xff]  ;;  %v99_v38 = vld [vmem:[%s578_s6 + $0x8] sm:$0xff]  ;;  %v100_v39 = vld [vmem:[%s578_s6 + $0x10] sm:$0xff]  ;;  %v72_v52 = vmul.f32 0.84779125, %v66_v22 }
  0x33   :  { %v101_v40 = vld [vmem:[%s578_s6 + $0x18] sm:$0xff]  ;;  %v104_v41 = vmul.f32 %v98_v34, %v92_v21  ;;  %v102_v43 = vld [vmem:[%s578_s6 + $0x20] sm:$0xff]  ;;  %v103_v44 = vld [vmem:[%s578_s6 + $0x28] sm:$0xf]  ;;  %v105_v45 = vmul.f32 %v99_v38, %v93_v24  ;;  %v106_v46 = vmul.f32 %v100_v39, %v94_v25  ;;  %v73_v56 = vmul.f32 0.84779125, %v67_v27 }
  0x34   :  { %v107_v47 = vmul.f32 %v101_v40, %v95_v26  ;;  %v108_v49 = vmul.f32 %v102_v43, %v96_v32  ;;  %v109_v50 = vmul.f32 %v103_v44, %v97_v33 }
  0x35   :  { %v110_v51 = vadd.f32 %v104_v41, %v86_v23  ;;  %v111_v53 = vadd.f32 %v105_v45, %v87_v29  ;;  %v112_v54 = vadd.f32 %v106_v46, %v88_v30 }
  0x36   :  { %v113_v55 = vadd.f32 %v107_v47, %v89_v31  ;;  %v114_v57 = vadd.f32 %v108_v49, %v90_v36  ;;  %v115_v58 = vadd.f32 %v109_v50, %v91_v37 }
  0x37   :  { %v116_v59 = vmul.f32 -0.42389563, %v110_v51  ;;  %v117_v60 = vmul.f32 -0.42389563, %v111_v53  ;;  %v118_v61 = vmul.f32 -0.42389563, %v112_v54 }
  0x38   :  { %v119_v62 = vmul.f32 -0.42389563, %v113_v55  ;;  %v120_v63 = vmul.f32 -0.42389563, %v114_v57  ;;  %v121_v0 = vmul.f32 -0.42389563, %v115_v58 }
  0x39   :  { %v122_v1 = vadd.f32 %v116_v59, %v68_v28  ;;  %v123_v2 = vadd.f32 %v117_v60, %v69_v35  ;;  %v124_v3 = vadd.f32 %v118_v61, %v70_v42 }
  0x3a   :  { %v125_v4 = vadd.f32 %v119_v62, %v71_v48  ;;  %v126_v5 = vadd.f32 %v120_v63, %v72_v52  ;;  %v127_v6 = vadd.f32 %v121_v0, %v73_v56 }
  0x3b   :  { %128 = vst [vmem:[%s579_s7] sm:$0xff] %v122_v1  ;;  %129 = vst [vmem:[%s579_s7 + $0x8] sm:$0xff] %v123_v2 }
  0x3c   :  { %130 = vst [vmem:[%s579_s7 + $0x10] sm:$0xff] %v124_v3  ;;  %131 = vst [vmem:[%s579_s7 + $0x18] sm:$0xff] %v125_v4 }
  0x3d   :  { %132 = vst [vmem:[%s579_s7 + $0x20] sm:$0xff] %v126_v5  ;;  %133 = vst [vmem:[%s579_s7 + $0x28] sm:$0xf] %v127_v6 }
  0xaa   :  { %v142_v7 = vpop.permute.xlu0 %141  ;;  %v164_v12 = vpop.permute.xlu1 %163 }
  0xab   :  { %v144_v8 = vmul.f32 %v142_v7, %v122_v1  ;;  %v145_v9 = vmul.f32 %v142_v7, %v123_v2  ;;  %v146_v10 = vmul.f32 %v142_v7, %v124_v3  ;;  %v147_v11 = vmul.f32 %v142_v7, %v125_v4 }
  0xac   :  { %v148_v13 = vmul.f32 %v142_v7, %v126_v5  ;;  %v149_v14 = vmul.f32 %v142_v7, %v127_v6 }
  0xad   :  { %v285_v15 = vround.rtne.f32 %v144_v8  ;;  %v286_v16 = vround.rtne.f32 %v145_v9  ;;  %v287_v17 = vround.rtne.f32 %v146_v10  ;;  %v288_v18 = vround.rtne.f32 %v147_v11 }
  0xae   :  { %v289_v19 = vround.rtne.f32 %v148_v13  ;;  %v290_v20 = vround.rtne.f32 %v149_v14 }
  0xaf   :  { %v166_v21 = vmul.f32 %v285_v15, %v164_v12  ;;  %v167_v22 = vmul.f32 %v286_v16, %v164_v12  ;;  %v168_v23 = vmul.f32 %v287_v17, %v164_v12  ;;  %v169_v24 = vmul.f32 %v288_v18, %v164_v12 }
  0xb0   :  { %v170_v25 = vmul.f32 %v289_v19, %v164_v12  ;;  %v171_v26 = vmul.f32 %v290_v20, %v164_v12  ;;  %v203_v27 = vand.u32 2147483647, %v285_v15  ;;  %v204_v28 = vand.u32 2147483647, %v286_v16 }
  0xb1   :  { %172 = vst [vmem:[%s580_s8] sm:$0xff] %v166_v21  ;;  %173 = vst [vmem:[%s580_s8 + $0x8] sm:$0xff] %v167_v22  ;;  %v205_v29 = vand.u32 2147483647, %v287_v17  ;;  %v206_v30 = vand.u32 2147483647, %v288_v18 }
  0xb2   :  { %174 = vst [vmem:[%s580_s8 + $0x10] sm:$0xff] %v168_v23  ;;  %175 = vst [vmem:[%s580_s8 + $0x18] sm:$0xff] %v169_v24  ;;  %v207_v31 = vand.u32 2147483647, %v289_v19  ;;  %v209_v32 = vadd.f32 1.0, %v203_v27  ;;  %v210_v33 = vadd.f32 1.0, %v204_v28 }
  0xb3   :  { %176 = vst [vmem:[%s580_s8 + $0x20] sm:$0xff] %v170_v25  ;;  %177 = vst [vmem:[%s580_s8 + $0x28] sm:$0xf] %v171_v26  ;;  %v208_v34 = vand.u32 2147483647, %v290_v20  ;;  %v211_v35 = vadd.f32 1.0, %v205_v29 }
  0xb4   :  { %v212_v36 = vadd.f32 1.0, %v206_v30  ;;  %301 = vlog2.f32 %v209_v32  ;;  %v213_v37 = vadd.f32 1.0, %v207_v31  ;;  %s390_s8 = smov [#allocation9]  }
  0xb5   :  { %303 = vlog2.f32 %v210_v33  ;;  %v214_v38 = vadd.f32 1.0, %v208_v34  ;;  %s269_s18 = sshll.u32 %s390_s8, 4  ;;  %s270_s18 = int_to_ptr.vmem [resolvable:$true] %s269_s18 }
  0xb6   :  { %305 = vlog2.f32 %v211_v35  ;;  %s357_s0 = scalar_lea.vmem %s270_s18, 16  ;;  %s361_s20 = scalar_lea.vmem %s270_s18, 32 }
  0xb7   :  { %307 = vlog2.f32 %v212_v36  ;;  %p358_p2 = scmp.ne.s32.totalorder %s270_s18, %s357_s0  ;;  %p362_p3 = scmp.lt.s32.totalorder %s270_s18, %s270_s18 }
  0xb8   :  { %309 = vlog2.f32 %v213_v37  ;;  %p363_p4 = scmp.lt.s32.totalorder %s361_s20, %s357_s0 }
  0xb9   :  { %311 = vlog2.f32 %v214_v38 }
  0xba   :  { %p364_p5 = por %p363_p4, %p362_p3 }
  0xbc   :  { %p365_p6 = pnand %p364_p5, %p358_p2 }
  0xbe   :  { %v302_v39 = vpop.eup %301 }
  0xbf   :  { %v304_v40 = vpop.eup %303  ;;  %v216_v41 = vmul.f32 0.6931472, %v302_v39 }
  0xc0   :  { %v306_v42 = vpop.eup %305  ;;  %v218_v43 = vmul.f32 0.6931472, %v304_v40 }
  0xc1   :  { %v308_v44 = vpop.eup %307  ;;  %v220_v45 = vmul.f32 0.6931472, %v306_v42  ;;  %v228_v46 = vmul.f32 1.442695, %v216_v41 }
  0xc2   :  { %v310_v47 = vpop.eup %309  ;;  %v222_v48 = vmul.f32 0.6931472, %v308_v44  ;;  %v229_v49 = vmul.f32 1.442695, %v218_v43 }
  0xc3   :  { %v312_v50 = vpop.eup %311  ;;  %v224_v51 = vmul.f32 0.6931472, %v310_v47  ;;  %v230_v52 = vmul.f32 1.442695, %v220_v45 }
  0xc4   :  { %v226_v53 = vmul.f32 0.6931472, %v312_v50  ;;  %v231_v54 = vmul.f32 1.442695, %v222_v48  ;;  %v240_v55 = vadd.f32 %v229_v49, %v228_v46 }
  0xc5   :  { %v232_v56 = vmul.f32 1.442695, %v224_v51  ;;  %v236_v57 = vmul.f32 0.0, %v230_v52 }
  0xc6   :  { %v233_v58 = vmul.f32 1.442695, %v226_v53  ;;  %v237_v59 = vmul.f32 0.0, %v231_v54 }
  0xc7   :  { %v241_v60 = vadd.f32 %v240_v55, %v236_v57  ;;  %v238_v62 = vmul.f32 0.0, %v232_v56 }
  0xc8   :  { %v239_v61 = vmul.f32 0.0, %v233_v58 }
  0xc9   :  { %v242_v63 = vadd.f32 %v241_v60, %v237_v59 }
  0xca   :  { %v245_v1 = vsel %vm244_vm0, %v239_v61, 0.0 }
  0xcb   :  { %v243_v0 = vadd.f32 %v242_v63, %v238_v62 }
  0xcd   :  { %v246_v2 = vadd.f32 %v245_v1, %v243_v0 }
  0xcf   :  { %247 = vadd.xlane.f32.xlu0 %v246_v2 }
 0x15c   :  { %v248_v3 = vpop.xlane.xlu0 %247 }
 0x15d   :  { %v249_v4 = vrot.slane %v248_v3, 4 }
 0x15f   :  { %v250_v5 = vadd.f32 %v249_v4, %v248_v3 }
 0x161   :  { %v251_v6 = vrot.slane %v250_v5, 2 }
 0x163   :  { %v252_v7 = vadd.f32 %v251_v6, %v250_v5 }
 0x165   :  { %v253_v8 = vrot.slane %v252_v7, 1 }
 0x167   :  { %v254_v9 = vadd.f32 %v253_v8, %v252_v7 }
 0x169   :  { %291 = vpush %v254_v9 }
 0x19a   :  { %s292_s19 = spop %291 }
 0x19b   :  { %v256_v10 = vstv %s292_s19 }
 0x19c   :  { %258 = vst.msk [vmem:[#allocation9] sm:$0x1] %vm257_vm1, %v256_v10 }
 0x19d   :  { %368 = shalt.err (!%p365_p6)
}
 0x19e   :  { %s369_s21 = scalar_lea.hbm %s581_s9, 16 }
 0x19f   :  { %p370_p7 = scmp.ne.s32.totalorder %s581_s9, %s369_s21  ;;  %p373_p8 = scmp.lt.u32.totalorder %s369_s21, %s581_s9 }
 0x1a1   :  { %p375_p9 = pnand %p373_p8, %p370_p7 }
 0x1a3   :  { %378 = shalt.err (!%p375_p9)
}
 0x1a4   :  { %272 = dma.vmem_to_hbm [thread:$0]  %s270_s18, 16, %s581_s9, [#allocation6]  }
 0x1a5   :  { %383 = dma.done.wait [#allocation6], 16  }
 0x1a6   :  { %384 = vsyncadd [#allocation6], 4294967280 }
 0x1a7   :  { %280 = vsyncpa [#allocation5], 1 }
 0x1a8   :  { %281 = vsyncpa [#allocation8], 1 }
 0x1a9   :  { %282 = vsyncpa [#allocation6], 1 }

// kernel: _forward.13
= control target key start
LH: loop header
LB: loop body
LE: loop exit
PB: predicated region body
PF: predicated region fallthrough
CT: control target
= control target key end

     0   :  { %10 = vsyncpa [#allocation3], 0  ;;  %s308_s0 = inlined_call_operand.vmem [shape: f32[44,128], index: 0, kind: input, shape index: {}]   ;;  %s309_s1 = inlined_call_operand.hbm [shape: f32[44,128], index: 1, kind: input, shape index: {}]   ;;  %s310_s2 = inlined_call_operand.vmem [shape: f32[44,128], index: 2, kind: input, shape index: {}]   ;;  %s311_s3 = inlined_call_operand.hbm [shape: f32[44,128], index: 3, kind: input, shape index: {}]   ;;  %s312_s4 = inlined_call_operand.vmem [shape: f32[44,128], index: 4, kind: input, shape index: {}]   ;;  %s313_s5 = inlined_call_operand.vmem [shape: f32[44,128], index: 5, kind: output, shape index: {}]  }
   0x1   :  { %11 = vsyncpa [#allocation5], 0  ;;  %s178_s18 = smov [#allocation2]   ;;  %s130_s22 = scalar_lea.hbm %s309_s1, 768 }
   0x2   :  { %s19_s19 = sshll.u32 %s178_s18, 4  ;;  %p131_p0 = scmp.ne.s32.totalorder %s309_s1, %s130_s22  ;;  %s20_s19 = int_to_ptr.vmem [resolvable:$true] %s19_s19 }
   0x3   :  { %p134_p1 = scmp.lt.u32.totalorder %s130_s22, %s309_s1 }
   0x5   :  { %p136_p2 = pnand %p134_p1, %p131_p0 }
   0x7   :  { %139 = shalt.err (!%p136_p2)
}
   0x8   :  { %s140_s27 = scalar_lea.vmem %s20_s19, 768  ;;  %p145_p4 = scmp.lt.s32.totalorder %s20_s19, %s20_s19 }
   0x9   :  { %p141_p3 = scmp.ne.s32.totalorder %s20_s19, %s140_s27  ;;  %p146_p5 = scmp.lt.s32.totalorder %s140_s27, %s140_s27 }
   0xb   :  { %p147_p6 = por %p146_p5, %p145_p4 }
   0xd   :  { %p148_p7 = pnand %p147_p6, %p141_p3 }
   0xf   :  { %151 = shalt.err (!%p148_p7)
}
  0x10   :  { %s179_s28 = smov 128   ;;  %s180_s29 = smov 8  }
  0x11   :  { %25 = dma.hbm_to_vmem [thread:$0]  %s309_s1, 768, %s20_s19, [#allocation3], %s179_s28, %s179_s28, %s180_s29  }
  0x12   :  { %s181_s7 = smov [#allocation4]   ;;  %s152_s11 = scalar_lea.hbm %s311_s3, 768 }
  0x13   :  { %s33_s8 = sshll.u32 %s181_s7, 4  ;;  %p153_p8 = scmp.ne.s32.totalorder %s311_s3, %s152_s11  ;;  %s34_s8 = int_to_ptr.vmem [resolvable:$true] %s33_s8 }
  0x14   :  { %p156_p9 = scmp.lt.u32.totalorder %s152_s11, %s311_s3 }
  0x16   :  { %p158_p10 = pnand %p156_p9, %p153_p8 }
  0x18   :  { %161 = shalt.err (!%p158_p10)
}
  0x19   :  { %s162_s16 = scalar_lea.vmem %s34_s8, 768  ;;  %p167_p12 = scmp.lt.s32.totalorder %s34_s8, %s34_s8 }
  0x1a   :  { %p163_p11 = scmp.ne.s32.totalorder %s34_s8, %s162_s16  ;;  %p168_p13 = scmp.lt.s32.totalorder %s162_s16, %s162_s16 }
  0x1c   :  { %p169_p0 = por %p168_p13, %p167_p12 }
  0x1e   :  { %p170_p1 = pnand %p169_p0, %p163_p11 }
  0x20   :  { %173 = shalt.err (!%p170_p1)
}
  0x21   :  { %39 = dma.hbm_to_vmem [thread:$0]  %s311_s3, 768, %s34_s8, [#allocation5], %s179_s28, %s179_s28, %s180_s29  }
  0x22   :  { %174 = dma.done.wait [#allocation3], 768  }
  0x23   :  { %175 = vsyncadd [#allocation3], 4294966528 }
  0x24   :  { %176 = dma.done.wait [#allocation5], 768  }
  0x25   :  { %177 = vsyncadd [#allocation5], 4294966528  ;;  %v48_v0 = vld [vmem:[%s308_s0] sm:$0xff]  ;;  %v78_v4 = vld [vmem:[#allocation4] sm:$0xff] }
  0x26   :  { %v60_v1 = vld [vmem:[#allocation2] sm:$0xff]  ;;  %v49_v6 = vld [vmem:[%s308_s0 + $0x8] sm:$0xff]  ;;  %v79_v10 = vld [vmem:[#allocation4 + $0x8] sm:$0xff]  ;;  %v54_v15 = vmul.f32 1.2247449, %v48_v0 }
  0x27   :  { %v66_v2 = vld [vmem:[%s310_s2] sm:$0xff]  ;;  %v61_v8 = vld [vmem:[#allocation2 + $0x8] sm:$0xff]  ;;  %v50_v13 = vld [vmem:[%s308_s0 + $0x10] sm:$0xff]  ;;  %v55_v27 = vmul.f32 1.2247449, %v49_v6 }
  0x28   :  { %v72_v3 = vmul.f32 %v66_v2, %v60_v1  ;;  %v84_v5 = vld [vmem:[%s312_s4] sm:$0xff]  ;;  %v67_v9 = vld [vmem:[%s310_s2 + $0x8] sm:$0xff]  ;;  %v62_v14 = vld [vmem:[#allocation2 + $0x10] sm:$0xff]  ;;  %v56_v33 = vmul.f32 1.2247449, %v50_v13 }
  0x29   :  { %v90_v7 = vmul.f32 %v84_v5, %v78_v4  ;;  %v73_v11 = vmul.f32 %v67_v9, %v61_v8  ;;  %v85_v12 = vld [vmem:[%s312_s4 + $0x8] sm:$0xff]  ;;  %v68_v18 = vld [vmem:[%s310_s2 + $0x10] sm:$0xff]  ;;  %v80_v19 = vld [vmem:[#allocation4 + $0x10] sm:$0xff] }
  0x2a   :  { %v91_v17 = vmul.f32 %v85_v12, %v79_v10  ;;  %v86_v20 = vld [vmem:[%s312_s4 + $0x10] sm:$0xff]  ;;  %v74_v21 = vmul.f32 %v68_v18, %v62_v14  ;;  %v51_v23 = vld [vmem:[%s308_s0 + $0x18] sm:$0xff]  ;;  %v81_v30 = vld [vmem:[#allocation4 + $0x18] sm:$0xff] }
  0x2b   :  { %v96_v16 = vadd.f32 %v90_v7, %v72_v3  ;;  %v92_v22 = vmul.f32 %v86_v20, %v80_v19  ;;  %v63_v24 = vld [vmem:[#allocation2 + $0x18] sm:$0xff]  ;;  %v52_v32 = vld [vmem:[%s308_s0 + $0x20] sm:$0xff]  ;;  %v82_v38 = vld [vmem:[#allocation4 + $0x20] sm:$0xff]  ;;  %v57_v41 = vmul.f32 1.2247449, %v51_v23 }
  0x2c   :  { %v69_v25 = vld [vmem:[%s310_s2 + $0x18] sm:$0xff]  ;;  %v97_v28 = vadd.f32 %v91_v17, %v73_v11  ;;  %v64_v36 = vld [vmem:[#allocation2 + $0x20] sm:$0xff]  ;;  %v65_v44 = vld [vmem:[#allocation2 + $0x28] sm:$0xf]  ;;  %v58_v47 = vmul.f32 1.2247449, %v52_v32 }
  0x2d   :  { %v102_v26 = vmul.f32 0.5, %v96_v16  ;;  %v75_v29 = vmul.f32 %v69_v25, %v63_v24  ;;  %v87_v31 = vld [vmem:[%s312_s4 + $0x18] sm:$0xff]  ;;  %v98_v34 = vadd.f32 %v92_v22, %v74_v21  ;;  %v70_v37 = vld [vmem:[%s310_s2 + $0x20] sm:$0xff]  ;;  %v71_v49 = vld [vmem:[%s310_s2 + $0x28] sm:$0xf] }
  0x2e   :  { %v93_v35 = vmul.f32 %v87_v31, %v81_v30  ;;  %v103_v40 = vmul.f32 0.5, %v97_v28  ;;  %v76_v42 = vmul.f32 %v70_v37, %v64_v36  ;;  %v88_v43 = vld [vmem:[%s312_s4 + $0x20] sm:$0xff]  ;;  %v53_v51 = vld [vmem:[%s308_s0 + $0x28] sm:$0xf]  ;;  %v77_v52 = vmul.f32 %v71_v49, %v65_v44  ;;  %v83_v53 = vld [vmem:[#allocation4 + $0x28] sm:$0xf] }
  0x2f   :  { %v108_v39 = vadd.f32 %v102_v26, %v54_v15  ;;  %v104_v45 = vmul.f32 0.5, %v98_v34  ;;  %v94_v48 = vmul.f32 %v88_v43, %v82_v38  ;;  %v89_v54 = vld [vmem:[%s312_s4 + $0x28] sm:$0xf]  ;;  %v59_v61 = vmul.f32 1.2247449, %v53_v51 }
  0x30   :  { %v99_v46 = vadd.f32 %v93_v35, %v75_v29  ;;  %v109_v50 = vadd.f32 %v103_v40, %v55_v27  ;;  %v95_v58 = vmul.f32 %v89_v54, %v83_v53 }
  0x31   :  { %114 = vst [vmem:[%s313_s5] sm:$0xff] %v108_v39  ;;  %v110_v55 = vadd.f32 %v104_v45, %v56_v33  ;;  %v100_v57 = vadd.f32 %v94_v48, %v76_v42 }
  0x32   :  { %v105_v56 = vmul.f32 0.5, %v99_v46  ;;  %115 = vst [vmem:[%s313_s5 + $0x8] sm:$0xff] %v109_v50  ;;  %v101_v62 = vadd.f32 %v95_v58, %v77_v52 }
  0x33   :  { %116 = vst [vmem:[%s313_s5 + $0x10] sm:$0xff] %v110_v55  ;;  %v106_v60 = vmul.f32 0.5, %v100_v57 }
  0x34   :  { %v111_v59 = vadd.f32 %v105_v56, %v57_v41  ;;  %v107_v0 = vmul.f32 0.5, %v101_v62 }
  0x35   :  { %v112_v63 = vadd.f32 %v106_v60, %v58_v47 }
  0x36   :  { %117 = vst [vmem:[%s313_s5 + $0x18] sm:$0xff] %v111_v59  ;;  %v113_v1 = vadd.f32 %v107_v0, %v59_v61 }
  0x37   :  { %118 = vst [vmem:[%s313_s5 + $0x20] sm:$0xff] %v112_v63 }
  0x38   :  { %119 = vst [vmem:[%s313_s5 + $0x28] sm:$0xf] %v113_v1 }
  0x39   :  { %124 = vsyncpa [#allocation3], 1 }
  0x3a   :  { %125 = vsyncpa [#allocation5], 1 }

// kernel: _forward.14
= control target key start
LH: loop header
LB: loop body
LE: loop exit
PB: predicated region body
PF: predicated region fallthrough
CT: control target
= control target key end

     0   :  { %s438_s0 = inlined_call_operand.<no memory space> [shape: f32[1,1], index: 0, kind: input, shape index: {}]   ;;  %s439_s2 = inlined_call_operand.vmem [shape: f32[20,128], index: 2, kind: input, shape index: {}]   ;;  %s440_s3 = inlined_call_operand.hbm [shape: f32[20,128], index: 3, kind: input, shape index: {}]   ;;  %s441_s4 = inlined_call_operand.vmem [shape: f32[20,128], index: 4, kind: input, shape index: {}]   ;;  %s442_s5 = inlined_call_operand.hbm [shape: f32[20,128], index: 5, kind: input, shape index: {}]   ;;  %s443_s6 = inlined_call_operand.vmem [shape: f32[20,128], index: 6, kind: input, shape index: {}]   ;;  %s444_s7 = inlined_call_operand.vmem [shape: f32[20,128], index: 7, kind: output, shape index: {0}]   ;;  %s445_s8 = inlined_call_operand.vmem [shape: f32[20,128], index: 8, kind: output, shape index: {1}]   ;;  %s446_s9 = inlined_call_operand.hbm [shape: f32[1,1], index: 9, kind: output, shape index: {2}]   ;;  %s447_s1 = inlined_call_operand.<no memory space> [shape: f32[1,1], index: 1, kind: input, shape index: {}]  }
   0x1   :  { %v15_v0 = vstv %s438_s0  ;;  %v17_v1 = vstv %s447_s1 }
   0x2   :  { %16 = vst [vmem:[#allocation2] sm:$0x1] %v15_v0  ;;  %18 = vst [vmem:[#allocation3] sm:$0x1] %v17_v1 }
   0x3   :  { %19 = vsyncpa [#allocation5], 0 }
   0x4   :  { %20 = vsyncpa [#allocation8], 0 }
   0x5   :  { %21 = vsyncpa [#allocation6], 0  ;;  %s295_s13 = smov [#allocation4]   ;;  %s223_s17 = scalar_lea.hbm %s440_s3, 384 }
   0x6   :  { %s33_s14 = sshll.u32 %s295_s13, 4  ;;  %p224_p0 = scmp.ne.s32.totalorder %s440_s3, %s223_s17  ;;  %s34_s14 = int_to_ptr.vmem [resolvable:$true] %s33_s14 }
   0x7   :  { %p227_p1 = scmp.lt.u32.totalorder %s223_s17, %s440_s3 }
   0x9   :  { %p229_p2 = pnand %p227_p1, %p224_p0 }
   0xb   :  { %232 = shalt.err (!%p229_p2)
}
   0xc   :  { %s233_s1 = scalar_lea.vmem %s34_s14, 384  ;;  %p238_p4 = scmp.lt.s32.totalorder %s34_s14, %s34_s14 }
   0xd   :  { %p234_p3 = scmp.ne.s32.totalorder %s34_s14, %s233_s1  ;;  %p239_p5 = scmp.lt.s32.totalorder %s233_s1, %s233_s1 }
   0xf   :  { %p240_p6 = por %p239_p5, %p238_p4 }
  0x11   :  { %p241_p7 = pnand %p240_p6, %p234_p3 }
  0x13   :  { %244 = shalt.err (!%p241_p7)
}
  0x14   :  { %s296_s21 = smov 128   ;;  %s297_s22 = smov 8  }
  0x15   :  { %39 = dma.hbm_to_vmem [thread:$0]  %s440_s3, 384, %s34_s14, [#allocation5], %s296_s21, %s296_s21, %s297_s22  }
  0x16   :  { %s298_s25 = smov [#allocation7]   ;;  %s245_s29 = scalar_lea.hbm %s442_s5, 384 }
  0x17   :  { %s47_s26 = sshll.u32 %s298_s25, 4  ;;  %p246_p8 = scmp.ne.s32.totalorder %s442_s5, %s245_s29  ;;  %s48_s26 = int_to_ptr.vmem [resolvable:$true] %s47_s26 }
  0x18   :  { %p249_p9 = scmp.lt.u32.totalorder %s245_s29, %s442_s5 }
  0x1a   :  { %p251_p10 = pnand %p249_p9, %p246_p8 }
  0x1c   :  { %254 = shalt.err (!%p251_p10)
}
  0x1d   :  { %s255_s13 = scalar_lea.vmem %s48_s26, 384  ;;  %p260_p12 = scmp.lt.s32.totalorder %s48_s26, %s48_s26 }
  0x1e   :  { %p256_p11 = scmp.ne.s32.totalorder %s48_s26, %s255_s13  ;;  %p261_p13 = scmp.lt.s32.totalorder %s255_s13, %s255_s13 }
  0x20   :  { %p262_p0 = por %p261_p13, %p260_p12 }
  0x22   :  { %p263_p1 = pnand %p262_p0, %p256_p11 }
  0x24   :  { %266 = shalt.err (!%p263_p1)
}
  0x25   :  { %53 = dma.hbm_to_vmem [thread:$0]  %s442_s5, 384, %s48_s26, [#allocation8], %s296_s21, %s296_s21, %s297_s22  }
  0x26   :  { %289 = dma.done.wait [#allocation5], 384  }
  0x27   :  { %290 = vsyncadd [#allocation5], 4294966912 }
  0x28   :  { %291 = dma.done.wait [#allocation8], 384  }
  0x29   :  { %292 = vsyncadd [#allocation8], 4294966912  ;;  %v299_v2 = vmov 0   ;;  %v202_v3 = vld [vmem:[#allocation3] ss:$0 sm:$0xff]  ;;  %v68_v5 = vld [vmem:[#allocation4] sm:$0xff] }
  0x2a   :  { %215 = vset.pattern.permute.xlu0 %v299_v2  ;;  %216 = vset.pattern.permute.xlu1 %v299_v2  ;;  %v203_v4 = vld [vmem:[#allocation2] ss:$0 sm:$0xff]  ;;  %v63_v7 = vld [vmem:[%s439_s2 + $0x8] sm:$0xff]  ;;  %v64_v10 = vld [vmem:[%s439_s2 + $0x10] sm:$0xf]  ;;  %vm163_vm0 = vcmask 1043456  }
  0x2b   :  { %105 = vperm.xlu0 %215, %v202_v3   ;;  %121 = vperm.xlu1 %216, %v203_v4   ;;  %v62_v6 = vld [vmem:[%s439_s2] sm:$0xff]  ;;  %v69_v8 = vld [vmem:[#allocation4 + $0x8] sm:$0xff]  ;;  %v70_v11 = vld [vmem:[#allocation4 + $0x10] sm:$0xf]  ;;  %v66_v27 = vmul.f32 0.84779125, %v63_v7 }
  0x2c   :  { %v71_v9 = vld [vmem:[%s441_s4] sm:$0xff]  ;;  %v72_v12 = vld [vmem:[%s441_s4 + $0x8] sm:$0xff]  ;;  %v73_v13 = vld [vmem:[%s441_s4 + $0x10] sm:$0xf]  ;;  %v65_v26 = vmul.f32 0.84779125, %v62_v6 }
  0x2d   :  { %v74_v14 = vmul.f32 %v71_v9, %v68_v5  ;;  %v75_v15 = vmul.f32 %v72_v12, %v69_v8  ;;  %v76_v16 = vmul.f32 %v73_v13, %v70_v11  ;;  %v77_v17 = vld [vmem:[#allocation7] sm:$0xff]  ;;  %v78_v18 = vld [vmem:[#allocation7 + $0x8] sm:$0xff]  ;;  %v79_v19 = vld [vmem:[#allocation7 + $0x10] sm:$0xf]  ;;  %v67_v28 = vmul.f32 0.84779125, %v64_v10 }
  0x2e   :  { %v80_v20 = vld [vmem:[%s443_s6] sm:$0xff]  ;;  %v81_v21 = vld [vmem:[%s443_s6 + $0x8] sm:$0xff]  ;;  %v82_v22 = vld [vmem:[%s443_s6 + $0x10] sm:$0xf]  ;;  %vm176_vm1 = vcmask 0  }
  0x2f   :  { %v83_v23 = vmul.f32 %v80_v20, %v77_v17  ;;  %v84_v24 = vmul.f32 %v81_v21, %v78_v18  ;;  %v85_v25 = vmul.f32 %v82_v22, %v79_v19 }
  0x31   :  { %v86_v29 = vadd.f32 %v83_v23, %v74_v14  ;;  %v87_v30 = vadd.f32 %v84_v24, %v75_v15  ;;  %v88_v31 = vadd.f32 %v85_v25, %v76_v16 }
  0x33   :  { %v89_v32 = vmul.f32 -0.42389563, %v86_v29  ;;  %v90_v33 = vmul.f32 -0.42389563, %v87_v30  ;;  %v91_v34 = vmul.f32 -0.42389563, %v88_v31 }
  0x35   :  { %v92_v35 = vadd.f32 %v89_v32, %v65_v26  ;;  %v93_v36 = vadd.f32 %v90_v33, %v66_v27  ;;  %v94_v37 = vadd.f32 %v91_v34, %v67_v28 }
  0x37   :  { %95 = vst [vmem:[%s444_s7] sm:$0xff] %v92_v35  ;;  %96 = vst [vmem:[%s444_s7 + $0x8] sm:$0xff] %v93_v36 }
  0x38   :  { %97 = vst [vmem:[%s444_s7 + $0x10] sm:$0xf] %v94_v37 }
  0xaa   :  { %v106_v38 = vpop.permute.xlu0 %105  ;;  %v122_v42 = vpop.permute.xlu1 %121 }
  0xab   :  { %v108_v39 = vmul.f32 %v106_v38, %v92_v35  ;;  %v109_v40 = vmul.f32 %v106_v38, %v93_v36  ;;  %v110_v41 = vmul.f32 %v106_v38, %v94_v37 }
  0xad   :  { %v204_v43 = vround.rtne.f32 %v108_v39  ;;  %v205_v44 = vround.rtne.f32 %v109_v40  ;;  %v206_v45 = vround.rtne.f32 %v110_v41 }
  0xaf   :  { %v124_v46 = vmul.f32 %v204_v43, %v122_v42  ;;  %v125_v47 = vmul.f32 %v205_v44, %v122_v42  ;;  %v126_v48 = vmul.f32 %v206_v45, %v122_v42  ;;  %v143_v49 = vand.u32 2147483647, %v204_v43 }
  0xb0   :  { %v144_v50 = vand.u32 2147483647, %v205_v44  ;;  %v145_v51 = vand.u32 2147483647, %v206_v45 }
  0xb1   :  { %127 = vst [vmem:[%s445_s8] sm:$0xff] %v124_v46  ;;  %128 = vst [vmem:[%s445_s8 + $0x8] sm:$0xff] %v125_v47  ;;  %v146_v52 = vadd.f32 1.0, %v143_v49 }
  0xb2   :  { %129 = vst [vmem:[%s445_s8 + $0x10] sm:$0xf] %v126_v48  ;;  %v147_v53 = vadd.f32 1.0, %v144_v50  ;;  %v148_v54 = vadd.f32 1.0, %v145_v51  ;;  %s300_s8 = smov [#allocation9]  }
  0xb3   :  { %217 = vlog2.f32 %v146_v52  ;;  %s188_s16 = sshll.u32 %s300_s8, 4  ;;  %s189_s16 = int_to_ptr.vmem [resolvable:$true] %s188_s16 }
  0xb4   :  { %219 = vlog2.f32 %v147_v53  ;;  %s267_s18 = scalar_lea.vmem %s189_s16, 16  ;;  %s271_s5 = scalar_lea.vmem %s189_s16, 32 }
  0xb5   :  { %221 = vlog2.f32 %v148_v54  ;;  %p268_p2 = scmp.ne.s32.totalorder %s189_s16, %s267_s18  ;;  %p272_p3 = scmp.lt.s32.totalorder %s189_s16, %s189_s16 }
  0xb6   :  { %p273_p4 = scmp.lt.s32.totalorder %s271_s5, %s267_s18 }
  0xb8   :  { %p274_p5 = por %p273_p4, %p272_p3 }
  0xba   :  { %p275_p6 = pnand %p274_p5, %p268_p2 }
  0xbd   :  { %v218_v55 = vpop.eup %217 }
  0xbe   :  { %v220_v56 = vpop.eup %219  ;;  %v150_v58 = vmul.f32 0.6931472, %v218_v55 }
  0xbf   :  { %v222_v57 = vpop.eup %221  ;;  %v152_v59 = vmul.f32 0.6931472, %v220_v56 }
  0xc0   :  { %v154_v60 = vmul.f32 0.6931472, %v222_v57  ;;  %v156_v63 = vmul.f32 1.442695, %v150_v58 }
  0xc1   :  { %v157_v61 = vmul.f32 1.442695, %v152_v59 }
  0xc2   :  { %v158_v62 = vmul.f32 1.442695, %v154_v60 }
  0xc3   :  { %v160_v0 = vmul.f32 0.0, %v157_v61 }
  0xc4   :  { %v161_v1 = vmul.f32 0.0, %v158_v62 }
  0xc5   :  { %v162_v2 = vadd.f32 %v160_v0, %v156_v63 }
  0xc6   :  { %v164_v3 = vsel %vm163_vm0, %v161_v1, 0.0 }
  0xc7   :  { %v165_v4 = vadd.f32 %v164_v3, %v162_v2 }
  0xc9   :  { %166 = vadd.xlane.f32.xlu0 %v165_v4 }
 0x156   :  { %v167_v5 = vpop.xlane.xlu0 %166 }
 0x157   :  { %v168_v6 = vrot.slane %v167_v5, 4 }
 0x159   :  { %v169_v7 = vadd.f32 %v168_v6, %v167_v5 }
 0x15b   :  { %v170_v8 = vrot.slane %v169_v7, 2 }
 0x15d   :  { %v171_v9 = vadd.f32 %v170_v8, %v169_v7 }
 0x15f   :  { %v172_v10 = vrot.slane %v171_v9, 1 }
 0x161   :  { %v173_v11 = vadd.f32 %v172_v10, %v171_v9 }
 0x163   :  { %207 = vpush %v173_v11 }
 0x194   :  { %s208_s17 = spop %207 }
 0x195   :  { %v175_v12 = vstv %s208_s17 }
 0x196   :  { %177 = vst.msk [vmem:[#allocation9] sm:$0x1] %vm176_vm1, %v175_v12 }
 0x197   :  { %278 = shalt.err (!%p275_p6)
}
 0x198   :  { %s279_s20 = scalar_lea.hbm %s446_s9, 16 }
 0x199   :  { %p280_p7 = scmp.ne.s32.totalorder %s446_s9, %s279_s20  ;;  %p283_p8 = scmp.lt.u32.totalorder %s279_s20, %s446_s9 }
 0x19b   :  { %p285_p9 = pnand %p283_p8, %p280_p7 }
 0x19d   :  { %288 = shalt.err (!%p285_p9)
}
 0x19e   :  { %191 = dma.vmem_to_hbm [thread:$0]  %s189_s16, 16, %s446_s9, [#allocation6]  }
 0x19f   :  { %293 = dma.done.wait [#allocation6], 16  }
 0x1a0   :  { %294 = vsyncadd [#allocation6], 4294967280 }
 0x1a1   :  { %199 = vsyncpa [#allocation5], 1 }
 0x1a2   :  { %200 = vsyncpa [#allocation8], 1 }
 0x1a3   :  { %201 = vsyncpa [#allocation6], 1 }

// kernel: _forward.15
= control target key start
LH: loop header
LB: loop body
LE: loop exit
PB: predicated region body
PF: predicated region fallthrough
CT: control target
= control target key end

     0   :  { %10 = vsyncpa [#allocation3], 0  ;;  %s236_s0 = inlined_call_operand.vmem [shape: f32[20,128], index: 0, kind: input, shape index: {}]   ;;  %s237_s1 = inlined_call_operand.hbm [shape: f32[20,128], index: 1, kind: input, shape index: {}]   ;;  %s238_s2 = inlined_call_operand.vmem [shape: f32[20,128], index: 2, kind: input, shape index: {}]   ;;  %s239_s3 = inlined_call_operand.hbm [shape: f32[20,128], index: 3, kind: input, shape index: {}]   ;;  %s240_s4 = inlined_call_operand.vmem [shape: f32[20,128], index: 4, kind: input, shape index: {}]   ;;  %s241_s5 = inlined_call_operand.vmem [shape: f32[20,128], index: 5, kind: output, shape index: {}]  }
   0x1   :  { %11 = vsyncpa [#allocation5], 0  ;;  %s142_s18 = smov [#allocation2]   ;;  %s94_s22 = scalar_lea.hbm %s237_s1, 384 }
   0x2   :  { %s19_s19 = sshll.u32 %s142_s18, 4  ;;  %p95_p0 = scmp.ne.s32.totalorder %s237_s1, %s94_s22  ;;  %s20_s19 = int_to_ptr.vmem [resolvable:$true] %s19_s19 }
   0x3   :  { %p98_p1 = scmp.lt.u32.totalorder %s94_s22, %s237_s1 }
   0x5   :  { %p100_p2 = pnand %p98_p1, %p95_p0 }
   0x7   :  { %103 = shalt.err (!%p100_p2)
}
   0x8   :  { %s104_s27 = scalar_lea.vmem %s20_s19, 384  ;;  %p109_p4 = scmp.lt.s32.totalorder %s20_s19, %s20_s19 }
   0x9   :  { %p105_p3 = scmp.ne.s32.totalorder %s20_s19, %s104_s27  ;;  %p110_p5 = scmp.lt.s32.totalorder %s104_s27, %s104_s27 }
   0xb   :  { %p111_p6 = por %p110_p5, %p109_p4 }
   0xd   :  { %p112_p7 = pnand %p111_p6, %p105_p3 }
   0xf   :  { %115 = shalt.err (!%p112_p7)
}
  0x10   :  { %s143_s28 = smov 128   ;;  %s144_s29 = smov 8  }
  0x11   :  { %25 = dma.hbm_to_vmem [thread:$0]  %s237_s1, 384, %s20_s19, [#allocation3], %s143_s28, %s143_s28, %s144_s29  }
  0x12   :  { %s145_s7 = smov [#allocation4]   ;;  %s116_s11 = scalar_lea.hbm %s239_s3, 384 }
  0x13   :  { %s33_s8 = sshll.u32 %s145_s7, 4  ;;  %p117_p8 = scmp.ne.s32.totalorder %s239_s3, %s116_s11  ;;  %s34_s8 = int_to_ptr.vmem [resolvable:$true] %s33_s8 }
  0x14   :  { %p120_p9 = scmp.lt.u32.totalorder %s116_s11, %s239_s3 }
  0x16   :  { %p122_p10 = pnand %p120_p9, %p117_p8 }
  0x18   :  { %125 = shalt.err (!%p122_p10)
}
  0x19   :  { %s126_s16 = scalar_lea.vmem %s34_s8, 384  ;;  %p131_p12 = scmp.lt.s32.totalorder %s34_s8, %s34_s8 }
  0x1a   :  { %p127_p11 = scmp.ne.s32.totalorder %s34_s8, %s126_s16  ;;  %p132_p13 = scmp.lt.s32.totalorder %s126_s16, %s126_s16 }
  0x1c   :  { %p133_p0 = por %p132_p13, %p131_p12 }
  0x1e   :  { %p134_p1 = pnand %p133_p0, %p127_p11 }
  0x20   :  { %137 = shalt.err (!%p134_p1)
}
  0x21   :  { %39 = dma.hbm_to_vmem [thread:$0]  %s239_s3, 384, %s34_s8, [#allocation5], %s143_s28, %s143_s28, %s144_s29  }
  0x22   :  { %138 = dma.done.wait [#allocation3], 384  }
  0x23   :  { %139 = vsyncadd [#allocation3], 4294966912 }
  0x24   :  { %140 = dma.done.wait [#allocation5], 384  }
  0x25   :  { %141 = vsyncadd [#allocation5], 4294966912  ;;  %v54_v0 = vld [vmem:[#allocation2] sm:$0xff]  ;;  %v63_v4 = vld [vmem:[#allocation4] sm:$0xff] }
  0x26   :  { %v57_v1 = vld [vmem:[%s238_s2] sm:$0xff]  ;;  %v55_v7 = vld [vmem:[#allocation2 + $0x8] sm:$0xff]  ;;  %v56_v13 = vld [vmem:[#allocation2 + $0x10] sm:$0xf] }
  0x27   :  { %v48_v2 = vld [vmem:[%s236_s0] sm:$0xff]  ;;  %v60_v3 = vmul.f32 %v57_v1, %v54_v0  ;;  %v58_v8 = vld [vmem:[%s238_s2 + $0x8] sm:$0xff]  ;;  %v59_v17 = vld [vmem:[%s238_s2 + $0x10] sm:$0xf] }
  0x28   :  { %v66_v5 = vld [vmem:[%s240_s4] sm:$0xff]  ;;  %v49_v10 = vld [vmem:[%s236_s0 + $0x8] sm:$0xff]  ;;  %v61_v11 = vmul.f32 %v58_v8, %v55_v7  ;;  %v51_v14 = vmul.f32 1.2247449, %v48_v2  ;;  %v50_v19 = vld [vmem:[%s236_s0 + $0x10] sm:$0xf]  ;;  %v62_v20 = vmul.f32 %v59_v17, %v56_v13 }
  0x29   :  { %v69_v6 = vmul.f32 %v66_v5, %v63_v4  ;;  %v64_v9 = vld [vmem:[#allocation4 + $0x8] sm:$0xff]  ;;  %v67_v12 = vld [vmem:[%s240_s4 + $0x8] sm:$0xff]  ;;  %v68_v21 = vld [vmem:[%s240_s4 + $0x10] sm:$0xf]  ;;  %v52_v23 = vmul.f32 1.2247449, %v49_v10 }
  0x2a   :  { %v70_v16 = vmul.f32 %v67_v12, %v64_v9  ;;  %v65_v18 = vld [vmem:[#allocation4 + $0x10] sm:$0xf]  ;;  %v53_v28 = vmul.f32 1.2247449, %v50_v19 }
  0x2b   :  { %v72_v15 = vadd.f32 %v69_v6, %v60_v3  ;;  %v71_v25 = vmul.f32 %v68_v21, %v65_v18 }
  0x2c   :  { %v73_v24 = vadd.f32 %v70_v16, %v61_v11 }
  0x2d   :  { %v75_v22 = vmul.f32 0.5, %v72_v15  ;;  %v74_v29 = vadd.f32 %v71_v25, %v62_v20 }
  0x2e   :  { %v76_v27 = vmul.f32 0.5, %v73_v24 }
  0x2f   :  { %v78_v26 = vadd.f32 %v75_v22, %v51_v14  ;;  %v77_v31 = vmul.f32 0.5, %v74_v29 }
  0x30   :  { %v79_v30 = vadd.f32 %v76_v27, %v52_v23 }
  0x31   :  { %81 = vst [vmem:[%s241_s5] sm:$0xff] %v78_v26  ;;  %v80_v32 = vadd.f32 %v77_v31, %v53_v28 }
  0x32   :  { %82 = vst [vmem:[%s241_s5 + $0x8] sm:$0xff] %v79_v30 }
  0x33   :  { %83 = vst [vmem:[%s241_s5 + $0x10] sm:$0xf] %v80_v32 }
  0x34   :  { %88 = vsyncpa [#allocation3], 1 }
  0x35   :  { %89 = vsyncpa [#allocation5], 1 }

// kernel: _forward.16
= control target key start
LH: loop header
LB: loop body
LE: loop exit
PB: predicated region body
PF: predicated region fallthrough
CT: control target
= control target key end

     0   :  { %s245_s0 = inlined_call_operand.<no memory space> [shape: f32[1,1], index: 0, kind: input, shape index: {}]   ;;  %s246_s2 = inlined_call_operand.vmem [shape: f32[8,128], index: 2, kind: input, shape index: {}]   ;;  %s247_s3 = inlined_call_operand.vmem [shape: f32[8,128], index: 3, kind: input, shape index: {}]   ;;  %s248_s4 = inlined_call_operand.vmem [shape: f32[8,128], index: 4, kind: input, shape index: {}]   ;;  %s249_s5 = inlined_call_operand.vmem [shape: f32[8,128], index: 5, kind: input, shape index: {}]   ;;  %s250_s6 = inlined_call_operand.vmem [shape: f32[8,128], index: 6, kind: input, shape index: {}]   ;;  %s251_s7 = inlined_call_operand.vmem [shape: f32[8,128], index: 7, kind: output, shape index: {0}]   ;;  %s252_s8 = inlined_call_operand.vmem [shape: f32[8,128], index: 8, kind: output, shape index: {1}]   ;;  %s253_s9 = inlined_call_operand.hbm [shape: f32[1,1], index: 9, kind: output, shape index: {2}]   ;;  %s254_s1 = inlined_call_operand.<no memory space> [shape: f32[1,1], index: 1, kind: input, shape index: {}]  }
   0x1   :  { %v15_v0 = vstv %s245_s0  ;;  %v17_v1 = vstv %s254_s1 }
   0x2   :  { %16 = vst [vmem:[#allocation2] sm:$0x1] %v15_v0  ;;  %18 = vst [vmem:[#allocation3] sm:$0x1] %v17_v1 }
   0x3   :  { %v153_v4 = vmov 0   ;;  %v36_v5 = vld [vmem:[%s247_s3] sm:$0xff] }
   0x4   :  { %125 = vset.pattern.permute.xlu0 %v153_v4  ;;  %126 = vset.pattern.permute.xlu1 %v153_v4  ;;  %v37_v6 = vld [vmem:[%s248_s4] sm:$0xff] }
   0x5   :  { %v39_v7 = vld [vmem:[%s249_s5] sm:$0xff]  ;;  %v38_v9 = vmul.f32 %v37_v6, %v36_v5 }
   0x6   :  { %v34_v8 = vld [vmem:[%s246_s2] sm:$0xff] }
   0x7   :  { %v40_v10 = vld [vmem:[%s250_s6] sm:$0xff] }
   0x9   :  { %v116_v2 = vld [vmem:[#allocation3] ss:$0 sm:$0xff]  ;;  %v117_v3 = vld [vmem:[#allocation2] ss:$0 sm:$0xff] }
   0xa   :  { %53 = vperm.xlu0 %125, %v116_v2   ;;  %65 = vperm.xlu1 %126, %v117_v3  }
   0xb   :  { %19 = vsyncpa [#allocation5], 0  ;;  %v41_v11 = vmul.f32 %v40_v10, %v39_v7  ;;  %v35_v12 = vmul.f32 0.84779125, %v34_v8  ;;  %v70_v23 = vlaneseq  ;;  %v154_v27 = vmov 0.0   ;;  %s155_s6 = smov [#allocation4]  }
   0xc   :  { %vm92_vm1 = vcmask 0  }
   0xd   :  { %v42_v13 = vadd.f32 %v41_v11, %v38_v9  ;;  %v71_v24 = vshrl.u32 %v70_v23, 7 }
   0xf   :  { %v43_v14 = vmul.f32 -0.42389563, %v42_v13  ;;  %vm72_vm0 = vcmp.lt.s32.totalorder %v71_v24, 4 }
  0x10   :  { %v118_v28 = vsel %vm72_vm0, 1.0, %v154_v27 }
  0x11   :  { %v44_v15 = vadd.f32 %v43_v14, %v35_v12 }
  0x13   :  { %45 = vst [vmem:[%s251_s7] sm:$0xff] %v44_v15  ;;  %s104_s7 = sshll.u32 %s155_s6, 4  ;;  %s105_s7 = int_to_ptr.vmem [resolvable:$true] %s104_s7 }
  0x14   :  { %s129_s21 = scalar_lea.vmem %s105_s7, 16  ;;  %s133_s22 = scalar_lea.vmem %s105_s7, 32 }
  0x15   :  { %p130_p0 = scmp.ne.s32.totalorder %s105_s7, %s129_s21  ;;  %p134_p1 = scmp.lt.s32.totalorder %s105_s7, %s105_s7 }
  0x16   :  { %p135_p2 = scmp.lt.s32.totalorder %s133_s22, %s129_s21 }
  0x18   :  { %p136_p3 = por %p135_p2, %p134_p1 }
  0x1a   :  { %p137_p4 = pnand %p136_p3, %p130_p0 }
  0x89   :  { %v54_v16 = vpop.permute.xlu0 %53  ;;  %v66_v18 = vpop.permute.xlu1 %65 }
  0x8a   :  { %v56_v17 = vmul.f32 %v54_v16, %v44_v15 }
  0x8c   :  { %v119_v19 = vround.rtne.f32 %v56_v17 }
  0x8e   :  { %v75_v20 = vand.u32 2147483647, %v119_v19  ;;  %v68_v21 = vmul.f32 %v119_v19, %v66_v18 }
  0x90   :  { %v76_v22 = vadd.f32 1.0, %v75_v20  ;;  %69 = vst [vmem:[%s252_s8] sm:$0xff] %v68_v21 }
  0x92   :  { %127 = vlog2.f32 %v76_v22 }
  0x9c   :  { %v128_v25 = vpop.eup %127 }
  0x9d   :  { %v78_v26 = vmul.f32 0.6931472, %v128_v25 }
  0x9f   :  { %v80_v29 = vmul.f32 1.442695, %v78_v26 }
  0xa1   :  { %v81_v30 = vmul.f32 %v118_v28, %v80_v29 }
  0xa3   :  { %82 = vadd.xlane.f32.xlu0 %v81_v30 }
 0x130   :  { %v83_v31 = vpop.xlane.xlu0 %82 }
 0x131   :  { %v84_v32 = vrot.slane %v83_v31, 4 }
 0x133   :  { %v85_v33 = vadd.f32 %v84_v32, %v83_v31 }
 0x135   :  { %v86_v34 = vrot.slane %v85_v33, 2 }
 0x137   :  { %v87_v35 = vadd.f32 %v86_v34, %v85_v33 }
 0x139   :  { %v88_v36 = vrot.slane %v87_v35, 1 }
 0x13b   :  { %v89_v37 = vadd.f32 %v88_v36, %v87_v35 }
 0x13d   :  { %120 = vpush %v89_v37 }
 0x16e   :  { %s121_s8 = spop %120 }
 0x16f   :  { %v91_v38 = vstv %s121_s8 }
 0x170   :  { %93 = vst.msk [vmem:[#allocation4] sm:$0x1] %vm92_vm1, %v91_v38 }
 0x171   :  { %140 = shalt.err (!%p137_p4)
}
 0x172   :  { %s141_s25 = scalar_lea.hbm %s253_s9, 16 }
 0x173   :  { %p142_p5 = scmp.ne.s32.totalorder %s253_s9, %s141_s25  ;;  %p145_p6 = scmp.lt.u32.totalorder %s141_s25, %s253_s9 }
 0x175   :  { %p147_p7 = pnand %p145_p6, %p142_p5 }
 0x177   :  { %150 = shalt.err (!%p147_p7)
}
 0x178   :  { %107 = dma.vmem_to_hbm [thread:$0]  %s105_s7, 16, %s253_s9, [#allocation5]  }
 0x179   :  { %151 = dma.done.wait [#allocation5], 16  }
 0x17a   :  { %152 = vsyncadd [#allocation5], 4294967280 }
 0x17b   :  { %115 = vsyncpa [#allocation5], 1 }

// kernel: _forward.17
= control target key start
LH: loop header
LB: loop body
LE: loop exit
PB: predicated region body
PF: predicated region fallthrough
CT: control target
= control target key end

     0   :  { %s291_s0 = inlined_call_operand.<no memory space> [shape: f32[1,1], index: 0, kind: input, shape index: {}]   ;;  %s292_s2 = inlined_call_operand.vmem [shape: f32[8,128], index: 2, kind: input, shape index: {}]   ;;  %s293_s3 = inlined_call_operand.vmem [shape: f32[8,128], index: 3, kind: input, shape index: {}]   ;;  %s294_s4 = inlined_call_operand.vmem [shape: f32[8,128], index: 4, kind: input, shape index: {}]   ;;  %s295_s5 = inlined_call_operand.vmem [shape: f32[8,128], index: 5, kind: input, shape index: {}]   ;;  %s296_s6 = inlined_call_operand.vmem [shape: f32[8,128], index: 6, kind: input, shape index: {}]   ;;  %s297_s7 = inlined_call_operand.hbm [shape: f32[8,128], index: 7, kind: output, shape index: {0}]   ;;  %s298_s8 = inlined_call_operand.vmem [shape: f32[8,128], index: 8, kind: output, shape index: {1}]   ;;  %s299_s9 = inlined_call_operand.hbm [shape: f32[1,1], index: 9, kind: output, shape index: {2}]   ;;  %s300_s1 = inlined_call_operand.<no memory space> [shape: f32[1,1], index: 1, kind: input, shape index: {}]  }
   0x1   :  { %v15_v0 = vstv %s291_s0  ;;  %v17_v1 = vstv %s300_s1 }
   0x2   :  { %16 = vst [vmem:[#allocation2] sm:$0x1] %v15_v0  ;;  %18 = vst [vmem:[#allocation3] sm:$0x1] %v17_v1 }
   0x3   :  { %19 = vsyncpa [#allocation5], 0  ;;  %v189_v4 = vmov 0   ;;  %v37_v5 = vld [vmem:[%s293_s3] sm:$0xff] }
   0x4   :  { %137 = vset.pattern.permute.xlu0 %v189_v4  ;;  %138 = vset.pattern.permute.xlu1 %v189_v4  ;;  %v38_v6 = vld [vmem:[%s294_s4] sm:$0xff] }
   0x5   :  { %v40_v7 = vld [vmem:[%s295_s5] sm:$0xff]  ;;  %v39_v9 = vmul.f32 %v38_v6, %v37_v5 }
   0x6   :  { %v35_v8 = vld [vmem:[%s292_s2] sm:$0xff] }
   0x7   :  { %v41_v10 = vld [vmem:[%s296_s6] sm:$0xff] }
   0x9   :  { %v127_v2 = vld [vmem:[#allocation3] ss:$0 sm:$0xff]  ;;  %v128_v3 = vld [vmem:[#allocation2] ss:$0 sm:$0xff] }
   0xa   :  { %54 = vperm.xlu0 %137, %v127_v2   ;;  %66 = vperm.xlu1 %138, %v128_v3  }
   0xb   :  { %20 = vsyncpa [#allocation7], 0  ;;  %v42_v11 = vmul.f32 %v41_v10, %v40_v7  ;;  %v36_v12 = vmul.f32 1.2247449, %v35_v8  ;;  %v71_v23 = vlaneseq  ;;  %v190_v27 = vmov 0.0   ;;  %s191_s4 = smov [#allocation4]  }
   0xc   :  { %s101_s5 = sshll.u32 %s191_s4, 4  ;;  %s102_s5 = int_to_ptr.vmem [resolvable:$true] %s101_s5 }
   0xd   :  { %v43_v13 = vadd.f32 %v42_v11, %v39_v9  ;;  %v72_v24 = vshrl.u32 %v71_v23, 7  ;;  %s141_s6 = scalar_lea.vmem %s102_s5, 128  ;;  %p146_p1 = scmp.lt.s32.totalorder %s102_s5, %s102_s5 }
   0xe   :  { %p142_p0 = scmp.ne.s32.totalorder %s102_s5, %s141_s6  ;;  %p147_p2 = scmp.lt.s32.totalorder %s141_s6, %s141_s6 }
   0xf   :  { %v44_v14 = vmul.f32 0.5, %v43_v13  ;;  %vm73_vm0 = vcmp.lt.s32.totalorder %v72_v24, 4 }
  0x10   :  { %v129_v28 = vsel %vm73_vm0, 1.0, %v190_v27  ;;  %p148_p3 = por %p147_p2, %p146_p1 }
  0x11   :  { %v45_v15 = vadd.f32 %v44_v14, %v36_v12 }
  0x12   :  { %p149_p4 = pnand %p148_p3, %p142_p0 }
  0x13   :  { %46 = vst [vmem:[#allocation4] sm:$0xff] %v45_v15 }
  0x89   :  { %v55_v16 = vpop.permute.xlu0 %54  ;;  %v67_v18 = vpop.permute.xlu1 %66 }
  0x8a   :  { %v57_v17 = vmul.f32 %v55_v16, %v45_v15 }
  0x8c   :  { %v130_v19 = vround.rtne.f32 %v57_v17 }
  0x8e   :  { %v76_v20 = vand.u32 2147483647, %v130_v19  ;;  %v69_v21 = vmul.f32 %v130_v19, %v67_v18 }
  0x90   :  { %v77_v22 = vadd.f32 1.0, %v76_v20  ;;  %70 = vst [vmem:[%s298_s8] sm:$0xff] %v69_v21 }
  0x92   :  { %139 = vlog2.f32 %v77_v22 }
  0x9c   :  { %v140_v25 = vpop.eup %139 }
  0x9d   :  { %v79_v26 = vmul.f32 0.6931472, %v140_v25 }
  0x9f   :  { %v81_v29 = vmul.f32 1.442695, %v79_v26 }
  0xa1   :  { %v82_v30 = vmul.f32 %v129_v28, %v81_v29 }
  0xa3   :  { %83 = vadd.xlane.f32.xlu0 %v82_v30 }
  0xa4   :  { %152 = shalt.err (!%p149_p4)
}
  0xa5   :  { %s153_s22 = scalar_lea.hbm %s297_s7, 128 }
  0xa6   :  { %p154_p5 = scmp.ne.s32.totalorder %s297_s7, %s153_s22  ;;  %p157_p6 = scmp.lt.u32.totalorder %s153_s22, %s297_s7 }
  0xa8   :  { %p159_p7 = pnand %p157_p6, %p154_p5 }
  0xaa   :  { %162 = shalt.err (!%p159_p7)
}
  0xab   :  { %104 = dma.vmem_to_hbm [thread:$0]  %s102_s5, 128, %s297_s7, [#allocation5]   ;;  %vm93_vm1 = vcmask 0  }
  0xac   :  { %s192_s29 = smov [#allocation6]  }
  0xad   :  { %s113_s30 = sshll.u32 %s192_s29, 4  ;;  %s114_s30 = int_to_ptr.vmem [resolvable:$true] %s113_s30 }
  0xae   :  { %s163_s11 = scalar_lea.vmem %s114_s30, 16  ;;  %s167_s12 = scalar_lea.vmem %s114_s30, 32 }
  0xaf   :  { %p164_p8 = scmp.ne.s32.totalorder %s114_s30, %s163_s11  ;;  %p168_p9 = scmp.lt.s32.totalorder %s114_s30, %s114_s30 }
  0xb0   :  { %p169_p10 = scmp.lt.s32.totalorder %s167_s12, %s163_s11 }
  0xb2   :  { %p170_p11 = por %p169_p10, %p168_p9 }
  0xb4   :  { %p171_p12 = pnand %p170_p11, %p164_p8 }
 0x130   :  { %v84_v31 = vpop.xlane.xlu0 %83 }
 0x131   :  { %v85_v32 = vrot.slane %v84_v31, 4 }
 0x133   :  { %v86_v33 = vadd.f32 %v85_v32, %v84_v31 }
 0x135   :  { %v87_v34 = vrot.slane %v86_v33, 2 }
 0x137   :  { %v88_v35 = vadd.f32 %v87_v34, %v86_v33 }
 0x139   :  { %v89_v36 = vrot.slane %v88_v35, 1 }
 0x13b   :  { %v90_v37 = vadd.f32 %v89_v36, %v88_v35 }
 0x13d   :  { %131 = vpush %v90_v37 }
 0x16e   :  { %s132_s10 = spop %131 }
 0x16f   :  { %v92_v38 = vstv %s132_s10 }
 0x170   :  { %94 = vst.msk [vmem:[#allocation6] sm:$0x1] %vm93_vm1, %v92_v38 }
 0x171   :  { %174 = shalt.err (!%p171_p12)
}
 0x172   :  { %s175_s14 = scalar_lea.hbm %s299_s9, 16 }
 0x173   :  { %p176_p13 = scmp.ne.s32.totalorder %s299_s9, %s175_s14  ;;  %p179_p0 = scmp.lt.u32.totalorder %s175_s14, %s299_s9 }
 0x175   :  { %p181_p1 = pnand %p179_p0, %p176_p13 }
 0x177   :  { %184 = shalt.err (!%p181_p1)
}
 0x178   :  { %116 = dma.vmem_to_hbm [thread:$0]  %s114_s30, 16, %s299_s9, [#allocation7]  }
 0x179   :  { %185 = dma.done.wait [#allocation5], 128  }
 0x17a   :  { %186 = vsyncadd [#allocation5], 4294967168 }
 0x17b   :  { %187 = dma.done.wait [#allocation7], 16  }
 0x17c   :  { %188 = vsyncadd [#allocation7], 4294967280 }
 0x17d   :  { %125 = vsyncpa [#allocation5], 1 }
 0x17e   :  { %126 = vsyncpa [#allocation7], 1 }

// kernel: _forward.18
= control target key start
LH: loop header
LB: loop body
LE: loop exit
PB: predicated region body
PF: predicated region fallthrough
CT: control target
= control target key end

     0   :  { %s84_s0 = inlined_call_operand.vmem [shape: f32[8,128], index: 0, kind: input, shape index: {}]   ;;  %s85_s1 = inlined_call_operand.vmem [shape: f32[8,128], index: 1, kind: input, shape index: {}]   ;;  %s86_s2 = inlined_call_operand.vmem [shape: f32[8,128], index: 2, kind: input, shape index: {}]   ;;  %s87_s3 = inlined_call_operand.vmem [shape: f32[8,128], index: 3, kind: input, shape index: {}]   ;;  %s88_s4 = inlined_call_operand.vmem [shape: f32[8,128], index: 4, kind: input, shape index: {}]   ;;  %s89_s5 = inlined_call_operand.vmem [shape: f32[8,128], index: 5, kind: output, shape index: {}]  }
   0x1   :  { %v22_v0 = vld [vmem:[%s85_s1] sm:$0xff] }
   0x2   :  { %v23_v1 = vld [vmem:[%s86_s2] sm:$0xff] }
   0x3   :  { %v20_v2 = vld [vmem:[%s84_s0] sm:$0xff]  ;;  %v24_v3 = vmul.f32 %v23_v1, %v22_v0 }
   0x4   :  { %v25_v4 = vld [vmem:[%s87_s3] sm:$0xff]  ;;  %v21_v7 = vmul.f32 0.8164966, %v20_v2 }
   0x5   :  { %v26_v5 = vld [vmem:[%s88_s4] sm:$0xff] }
   0x6   :  { %v27_v6 = vmul.f32 %v26_v5, %v25_v4 }
   0x8   :  { %v28_v8 = vadd.f32 %v27_v6, %v24_v3 }
   0xa   :  { %v29_v9 = vmul.f32 -0.4082483, %v28_v8 }
   0xc   :  { %v30_v10 = vadd.f32 %v29_v9, %v21_v7 }
   0xe   :  { %31 = vst [vmem:[%s89_s5] sm:$0xff] %v30_v10 }

// kernel: _forward.19
= control target key start
LH: loop header
LB: loop body
LE: loop exit
PB: predicated region body
PF: predicated region fallthrough
CT: control target
= control target key end

     0   :  { %s84_s0 = inlined_call_operand.vmem [shape: f32[4,128], index: 0, kind: input, shape index: {}]   ;;  %s85_s1 = inlined_call_operand.vmem [shape: f32[4,128], index: 1, kind: input, shape index: {}]   ;;  %s86_s2 = inlined_call_operand.vmem [shape: f32[4,128], index: 2, kind: input, shape index: {}]   ;;  %s87_s3 = inlined_call_operand.vmem [shape: f32[4,128], index: 3, kind: input, shape index: {}]   ;;  %s88_s4 = inlined_call_operand.vmem [shape: f32[4,128], index: 4, kind: input, shape index: {}]   ;;  %s89_s5 = inlined_call_operand.vmem [shape: f32[4,128], index: 5, kind: output, shape index: {}]  }
   0x1   :  { %v22_v0 = vld [vmem:[%s85_s1] sm:$0xf] }
   0x2   :  { %v23_v1 = vld [vmem:[%s86_s2] sm:$0xf] }
   0x3   :  { %v20_v2 = vld [vmem:[%s84_s0] sm:$0xf]  ;;  %v24_v3 = vmul.f32 %v23_v1, %v22_v0 }
   0x4   :  { %v25_v4 = vld [vmem:[%s87_s3] sm:$0xf]  ;;  %v21_v7 = vmul.f32 1.1795356, %v20_v2 }
   0x5   :  { %v26_v5 = vld [vmem:[%s88_s4] sm:$0xf] }
   0x6   :  { %v27_v6 = vmul.f32 %v26_v5, %v25_v4 }
   0x8   :  { %v28_v8 = vadd.f32 %v27_v6, %v24_v3 }
   0xa   :  { %v29_v9 = vmul.f32 0.5, %v28_v8 }
   0xc   :  { %v30_v10 = vadd.f32 %v29_v9, %v21_v7 }
   0xe   :  { %31 = vst [vmem:[%s89_s5] sm:$0xf] %v30_v10 }

// kernel: _forward.20
= control target key start
LH: loop header
LB: loop body
LE: loop exit
PB: predicated region body
PF: predicated region fallthrough
CT: control target
= control target key end

     0   :  { %10 = vsyncpa [#allocation3], 0  ;;  %s212_s0 = inlined_call_operand.vmem [shape: f32[12,128], index: 0, kind: input, shape index: {}]   ;;  %s213_s1 = inlined_call_operand.hbm [shape: f32[12,128], index: 1, kind: input, shape index: {}]   ;;  %s214_s2 = inlined_call_operand.vmem [shape: f32[12,128], index: 2, kind: input, shape index: {}]   ;;  %s215_s3 = inlined_call_operand.hbm [shape: f32[12,128], index: 3, kind: input, shape index: {}]   ;;  %s216_s4 = inlined_call_operand.vmem [shape: f32[12,128], index: 4, kind: input, shape index: {}]   ;;  %s217_s5 = inlined_call_operand.vmem [shape: f32[12,128], index: 5, kind: output, shape index: {}]  }
   0x1   :  { %11 = vsyncpa [#allocation5], 0  ;;  %s130_s18 = smov [#allocation2]   ;;  %s82_s22 = scalar_lea.hbm %s213_s1, 256 }
   0x2   :  { %s19_s19 = sshll.u32 %s130_s18, 4  ;;  %p83_p0 = scmp.ne.s32.totalorder %s213_s1, %s82_s22  ;;  %s20_s19 = int_to_ptr.vmem [resolvable:$true] %s19_s19 }
   0x3   :  { %p86_p1 = scmp.lt.u32.totalorder %s82_s22, %s213_s1 }
   0x5   :  { %p88_p2 = pnand %p86_p1, %p83_p0 }
   0x7   :  { %91 = shalt.err (!%p88_p2)
}
   0x8   :  { %s92_s27 = scalar_lea.vmem %s20_s19, 256  ;;  %p97_p4 = scmp.lt.s32.totalorder %s20_s19, %s20_s19 }
   0x9   :  { %p93_p3 = scmp.ne.s32.totalorder %s20_s19, %s92_s27  ;;  %p98_p5 = scmp.lt.s32.totalorder %s92_s27, %s92_s27 }
   0xb   :  { %p99_p6 = por %p98_p5, %p97_p4 }
   0xd   :  { %p100_p7 = pnand %p99_p6, %p93_p3 }
   0xf   :  { %103 = shalt.err (!%p100_p7)
}
  0x10   :  { %s131_s28 = smov 128   ;;  %s132_s29 = smov 8  }
  0x11   :  { %25 = dma.hbm_to_vmem [thread:$0]  %s213_s1, 256, %s20_s19, [#allocation3], %s131_s28, %s131_s28, %s132_s29  }
  0x12   :  { %s133_s7 = smov [#allocation4]   ;;  %s104_s11 = scalar_lea.hbm %s215_s3, 256 }
  0x13   :  { %s33_s8 = sshll.u32 %s133_s7, 4  ;;  %p105_p8 = scmp.ne.s32.totalorder %s215_s3, %s104_s11  ;;  %s34_s8 = int_to_ptr.vmem [resolvable:$true] %s33_s8 }
  0x14   :  { %p108_p9 = scmp.lt.u32.totalorder %s104_s11, %s215_s3 }
  0x16   :  { %p110_p10 = pnand %p108_p9, %p105_p8 }
  0x18   :  { %113 = shalt.err (!%p110_p10)
}
  0x19   :  { %s114_s16 = scalar_lea.vmem %s34_s8, 256  ;;  %p119_p12 = scmp.lt.s32.totalorder %s34_s8, %s34_s8 }
  0x1a   :  { %p115_p11 = scmp.ne.s32.totalorder %s34_s8, %s114_s16  ;;  %p120_p13 = scmp.lt.s32.totalorder %s114_s16, %s114_s16 }
  0x1c   :  { %p121_p0 = por %p120_p13, %p119_p12 }
  0x1e   :  { %p122_p1 = pnand %p121_p0, %p115_p11 }
  0x20   :  { %125 = shalt.err (!%p122_p1)
}
  0x21   :  { %39 = dma.hbm_to_vmem [thread:$0]  %s215_s3, 256, %s34_s8, [#allocation5], %s131_s28, %s131_s28, %s132_s29  }
  0x22   :  { %126 = dma.done.wait [#allocation3], 256  }
  0x23   :  { %127 = vsyncadd [#allocation3], 4294967040 }
  0x24   :  { %128 = dma.done.wait [#allocation5], 256  }
  0x25   :  { %129 = vsyncadd [#allocation5], 4294967040  ;;  %v52_v0 = vld [vmem:[#allocation2] sm:$0xff]  ;;  %v58_v4 = vld [vmem:[#allocation4] sm:$0xff] }
  0x26   :  { %v54_v1 = vld [vmem:[%s214_s2] sm:$0xff]  ;;  %v53_v7 = vld [vmem:[#allocation2 + $0x8] sm:$0xf]  ;;  %v59_v11 = vld [vmem:[#allocation4 + $0x8] sm:$0xf] }
  0x27   :  { %v48_v2 = vld [vmem:[%s212_s0] sm:$0xff]  ;;  %v56_v3 = vmul.f32 %v54_v1, %v52_v0  ;;  %v55_v8 = vld [vmem:[%s214_s2 + $0x8] sm:$0xf] }
  0x28   :  { %v60_v5 = vld [vmem:[%s216_s4] sm:$0xff]  ;;  %v49_v9 = vld [vmem:[%s212_s0 + $0x8] sm:$0xf]  ;;  %v57_v10 = vmul.f32 %v55_v8, %v53_v7  ;;  %v50_v13 = vmul.f32 0.8164966, %v48_v2 }
  0x29   :  { %v62_v6 = vmul.f32 %v60_v5, %v58_v4  ;;  %v61_v12 = vld [vmem:[%s216_s4 + $0x8] sm:$0xf]  ;;  %v51_v17 = vmul.f32 0.8164966, %v49_v9 }
  0x2a   :  { %v63_v15 = vmul.f32 %v61_v12, %v59_v11 }
  0x2b   :  { %v64_v14 = vadd.f32 %v62_v6, %v56_v3 }
  0x2c   :  { %v65_v18 = vadd.f32 %v63_v15, %v57_v10 }
  0x2d   :  { %v66_v16 = vmul.f32 -0.4082483, %v64_v14 }
  0x2e   :  { %v67_v20 = vmul.f32 -0.4082483, %v65_v18 }
  0x2f   :  { %v68_v19 = vadd.f32 %v66_v16, %v50_v13 }
  0x30   :  { %v69_v21 = vadd.f32 %v67_v20, %v51_v17 }
  0x31   :  { %70 = vst [vmem:[%s217_s5] sm:$0xff] %v68_v19 }
  0x32   :  { %71 = vst [vmem:[%s217_s5 + $0x8] sm:$0xf] %v69_v21 }
  0x33   :  { %76 = vsyncpa [#allocation3], 1 }
  0x34   :  { %77 = vsyncpa [#allocation5], 1 }

// kernel: squeeze.425
= control target key start
LH: loop header
LB: loop body
LE: loop exit
PB: predicated region body
PF: predicated region fallthrough
CT: control target
= control target key end

     0   :  { %s66_s8 = smov 80   ;;  %vm7_vm0 = vcmask 130048   ;;  %s67_s11 = smov 96   ;;  %s117_s0 = inlined_call_operand.vmem [shape: f32[4,128], index: 0, kind: input, shape index: {}]   ;;  %s118_s1 = inlined_call_operand.vmem [shape: f32[2,1,16,16], index: 1, kind: output, shape index: {}]  }
   0x1   :  { %v4_v0 = vld [vmem:[%s117_s0] sm:$0xf]  ;;  %s65_s0 = smov 112   ;;  %s68_s12 = smov 64  }
   0x2   :  { %5 = vst [vmem:[#allocation0] sm:$0xf] %v4_v0  ;;  %s69_s13 = smov 48   ;;  %s70_s14 = smov 32  }
   0x3   :  { %s71_s15 = smov 16  }
   0x9   :  { %v9_v1 = vld [vmem:[#allocation0] sm:$0xf]  }
   0xa   :  { %v21_v2 = vld [vmem:[#allocation0] sm:$0xf]   ;;  %10 = vrot.lane.b32.xlu0 %v9_v1, %s65_s0 }
   0xb   :  { %22 = vrot.lane.b32.xlu1 %v21_v2, %s66_s8  ;;  %v15_v3 = vld [vmem:[#allocation0] sm:$0xf]  }
   0xc   :  { %v27_v4 = vld [vmem:[#allocation0] sm:$0xf]  }
   0xd   :  { %v6_v5 = vld [vmem:[#allocation0] sm:$0xf]  }
   0xe   :  { %8 = vst.msk [vmem:[%s118_s1] ss:$8 sm:$0xf] %vm7_vm0, %v6_v5   ;;  %16 = vrot.lane.b32.xlu0 %v15_v3, %s67_s11  ;;  %v33_v6 = vld [vmem:[#allocation0] sm:$0xf]  }
   0xf   :  { %28 = vrot.lane.b32.xlu1 %v27_v4, %s68_s12  ;;  %v39_v7 = vld [vmem:[#allocation0] sm:$0xf]  }
  0x10   :  { %v45_v8 = vld [vmem:[#allocation0] sm:$0xf]  }
  0x12   :  { %34 = vrot.lane.b32.xlu0 %v33_v6, %s69_s13 }
  0x13   :  { %40 = vrot.lane.b32.xlu1 %v39_v7, %s70_s14 }
  0x16   :  { %46 = vrot.lane.b32.xlu0 %v45_v8, %s71_s15 }
  0x7c   :  { %v11_v9 = vpop.permute.xlu0 %10  }
  0x7d   :  { %v23_v10 = vpop.permute.xlu1 %22   ;;  %51 = vst.msk [vmem:[%s118_s1 + $0x1] ss:$8 sm:$0xf] %vm7_vm0, %v11_v9  }
  0x7e   :  { %53 = vst.msk [vmem:[%s118_s1 + $0x3] ss:$8 sm:$0xf] %vm7_vm0, %v23_v10  }
  0x80   :  { %v17_v11 = vpop.permute.xlu0 %16  }
  0x81   :  { %v29_v12 = vpop.permute.xlu1 %28   ;;  %52 = vst.msk [vmem:[%s118_s1 + $0x2] ss:$8 sm:$0xf] %vm7_vm0, %v17_v11  }
  0x82   :  { %54 = vst.msk [vmem:[%s118_s1 + $0x4] ss:$8 sm:$0xf] %vm7_vm0, %v29_v12  }
  0x84   :  { %v35_v13 = vpop.permute.xlu0 %34  }
  0x85   :  { %v41_v14 = vpop.permute.xlu1 %40   ;;  %55 = vst.msk [vmem:[%s118_s1 + $0x5] ss:$8 sm:$0xf] %vm7_vm0, %v35_v13  }
  0x86   :  { %56 = vst.msk [vmem:[%s118_s1 + $0x6] ss:$8 sm:$0xf] %vm7_vm0, %v41_v14  }
  0x88   :  { %v47_v15 = vpop.permute.xlu0 %46  }
  0x89   :  { %57 = vst.msk [vmem:[%s118_s1 + $0x7] ss:$8 sm:$0xf] %vm7_vm0, %v47_v15  }

// kernel: _forward.21
= control target key start
LH: loop header
LB: loop body
LE: loop exit
PB: predicated region body
PF: predicated region fallthrough
CT: control target
= control target key end

     0   :  { %s84_s0 = inlined_call_operand.vmem [shape: f32[8,128], index: 0, kind: input, shape index: {}]   ;;  %s85_s1 = inlined_call_operand.vmem [shape: f32[8,128], index: 1, kind: input, shape index: {}]   ;;  %s86_s2 = inlined_call_operand.vmem [shape: f32[8,128], index: 2, kind: input, shape index: {}]   ;;  %s87_s3 = inlined_call_operand.vmem [shape: f32[8,128], index: 3, kind: input, shape index: {}]   ;;  %s88_s4 = inlined_call_operand.vmem [shape: f32[8,128], index: 4, kind: input, shape index: {}]   ;;  %s89_s5 = inlined_call_operand.vmem [shape: f32[8,128], index: 5, kind: output, shape index: {}]  }
   0x1   :  { %v22_v0 = vld [vmem:[%s85_s1] sm:$0xff] }
   0x2   :  { %v23_v1 = vld [vmem:[%s86_s2] sm:$0xff] }
   0x3   :  { %v20_v2 = vld [vmem:[%s84_s0] sm:$0xff]  ;;  %v24_v3 = vmul.f32 %v23_v1, %v22_v0 }
   0x4   :  { %v25_v4 = vld [vmem:[%s87_s3] sm:$0xff]  ;;  %v21_v7 = vmul.f32 1.1795356, %v20_v2 }
   0x5   :  { %v26_v5 = vld [vmem:[%s88_s4] sm:$0xff] }
   0x6   :  { %v27_v6 = vmul.f32 %v26_v5, %v25_v4 }
   0x8   :  { %v28_v8 = vadd.f32 %v27_v6, %v24_v3 }
   0xa   :  { %v29_v9 = vmul.f32 0.5, %v28_v8 }
   0xc   :  { %v30_v10 = vadd.f32 %v29_v9, %v21_v7 }
   0xe   :  { %31 = vst [vmem:[%s89_s5] sm:$0xff] %v30_v10 }

// kernel: _forward.22
= control target key start
LH: loop header
LB: loop body
LE: loop exit
PB: predicated region body
PF: predicated region fallthrough
CT: control target
= control target key end

     0   :  { %10 = vsyncpa [#allocation3], 0  ;;  %s236_s0 = inlined_call_operand.vmem [shape: f32[20,128], index: 0, kind: input, shape index: {}]   ;;  %s237_s1 = inlined_call_operand.hbm [shape: f32[20,128], index: 1, kind: input, shape index: {}]   ;;  %s238_s2 = inlined_call_operand.vmem [shape: f32[20,128], index: 2, kind: input, shape index: {}]   ;;  %s239_s3 = inlined_call_operand.hbm [shape: f32[20,128], index: 3, kind: input, shape index: {}]   ;;  %s240_s4 = inlined_call_operand.vmem [shape: f32[20,128], index: 4, kind: input, shape index: {}]   ;;  %s241_s5 = inlined_call_operand.vmem [shape: f32[20,128], index: 5, kind: output, shape index: {}]  }
   0x1   :  { %11 = vsyncpa [#allocation5], 0  ;;  %s142_s18 = smov [#allocation2]   ;;  %s94_s22 = scalar_lea.hbm %s237_s1, 384 }
   0x2   :  { %s19_s19 = sshll.u32 %s142_s18, 4  ;;  %p95_p0 = scmp.ne.s32.totalorder %s237_s1, %s94_s22  ;;  %s20_s19 = int_to_ptr.vmem [resolvable:$true] %s19_s19 }
   0x3   :  { %p98_p1 = scmp.lt.u32.totalorder %s94_s22, %s237_s1 }
   0x5   :  { %p100_p2 = pnand %p98_p1, %p95_p0 }
   0x7   :  { %103 = shalt.err (!%p100_p2)
}
   0x8   :  { %s104_s27 = scalar_lea.vmem %s20_s19, 384  ;;  %p109_p4 = scmp.lt.s32.totalorder %s20_s19, %s20_s19 }
   0x9   :  { %p105_p3 = scmp.ne.s32.totalorder %s20_s19, %s104_s27  ;;  %p110_p5 = scmp.lt.s32.totalorder %s104_s27, %s104_s27 }
   0xb   :  { %p111_p6 = por %p110_p5, %p109_p4 }
   0xd   :  { %p112_p7 = pnand %p111_p6, %p105_p3 }
   0xf   :  { %115 = shalt.err (!%p112_p7)
}
  0x10   :  { %s143_s28 = smov 128   ;;  %s144_s29 = smov 8  }
  0x11   :  { %25 = dma.hbm_to_vmem [thread:$0]  %s237_s1, 384, %s20_s19, [#allocation3], %s143_s28, %s143_s28, %s144_s29  }
  0x12   :  { %s145_s7 = smov [#allocation4]   ;;  %s116_s11 = scalar_lea.hbm %s239_s3, 384 }
  0x13   :  { %s33_s8 = sshll.u32 %s145_s7, 4  ;;  %p117_p8 = scmp.ne.s32.totalorder %s239_s3, %s116_s11  ;;  %s34_s8 = int_to_ptr.vmem [resolvable:$true] %s33_s8 }
  0x14   :  { %p120_p9 = scmp.lt.u32.totalorder %s116_s11, %s239_s3 }
  0x16   :  { %p122_p10 = pnand %p120_p9, %p117_p8 }
  0x18   :  { %125 = shalt.err (!%p122_p10)
}
  0x19   :  { %s126_s16 = scalar_lea.vmem %s34_s8, 384  ;;  %p131_p12 = scmp.lt.s32.totalorder %s34_s8, %s34_s8 }
  0x1a   :  { %p127_p11 = scmp.ne.s32.totalorder %s34_s8, %s126_s16  ;;  %p132_p13 = scmp.lt.s32.totalorder %s126_s16, %s126_s16 }
  0x1c   :  { %p133_p0 = por %p132_p13, %p131_p12 }
  0x1e   :  { %p134_p1 = pnand %p133_p0, %p127_p11 }
  0x20   :  { %137 = shalt.err (!%p134_p1)
}
  0x21   :  { %39 = dma.hbm_to_vmem [thread:$0]  %s239_s3, 384, %s34_s8, [#allocation5], %s143_s28, %s143_s28, %s144_s29  }
  0x22   :  { %138 = dma.done.wait [#allocation3], 384  }
  0x23   :  { %139 = vsyncadd [#allocation3], 4294966912 }
  0x24   :  { %140 = dma.done.wait [#allocation5], 384  }
  0x25   :  { %141 = vsyncadd [#allocation5], 4294966912  ;;  %v54_v0 = vld [vmem:[#allocation2] sm:$0xff]  ;;  %v63_v4 = vld [vmem:[#allocation4] sm:$0xff] }
  0x26   :  { %v57_v1 = vld [vmem:[%s238_s2] sm:$0xff]  ;;  %v55_v7 = vld [vmem:[#allocation2 + $0x8] sm:$0xff]  ;;  %v56_v13 = vld [vmem:[#allocation2 + $0x10] sm:$0xf] }
  0x27   :  { %v48_v2 = vld [vmem:[%s236_s0] sm:$0xff]  ;;  %v60_v3 = vmul.f32 %v57_v1, %v54_v0  ;;  %v58_v8 = vld [vmem:[%s238_s2 + $0x8] sm:$0xff]  ;;  %v59_v17 = vld [vmem:[%s238_s2 + $0x10] sm:$0xf] }
  0x28   :  { %v66_v5 = vld [vmem:[%s240_s4] sm:$0xff]  ;;  %v49_v10 = vld [vmem:[%s236_s0 + $0x8] sm:$0xff]  ;;  %v61_v11 = vmul.f32 %v58_v8, %v55_v7  ;;  %v51_v14 = vmul.f32 0.8164966, %v48_v2  ;;  %v50_v19 = vld [vmem:[%s236_s0 + $0x10] sm:$0xf]  ;;  %v62_v20 = vmul.f32 %v59_v17, %v56_v13 }
  0x29   :  { %v69_v6 = vmul.f32 %v66_v5, %v63_v4  ;;  %v64_v9 = vld [vmem:[#allocation4 + $0x8] sm:$0xff]  ;;  %v67_v12 = vld [vmem:[%s240_s4 + $0x8] sm:$0xff]  ;;  %v68_v21 = vld [vmem:[%s240_s4 + $0x10] sm:$0xf]  ;;  %v52_v23 = vmul.f32 0.8164966, %v49_v10 }
  0x2a   :  { %v70_v16 = vmul.f32 %v67_v12, %v64_v9  ;;  %v65_v18 = vld [vmem:[#allocation4 + $0x10] sm:$0xf]  ;;  %v53_v28 = vmul.f32 0.8164966, %v50_v19 }
  0x2b   :  { %v72_v15 = vadd.f32 %v69_v6, %v60_v3  ;;  %v71_v25 = vmul.f32 %v68_v21, %v65_v18 }
  0x2c   :  { %v73_v24 = vadd.f32 %v70_v16, %v61_v11 }
  0x2d   :  { %v75_v22 = vmul.f32 -0.4082483, %v72_v15  ;;  %v74_v29 = vadd.f32 %v71_v25, %v62_v20 }
  0x2e   :  { %v76_v27 = vmul.f32 -0.4082483, %v73_v24 }
  0x2f   :  { %v78_v26 = vadd.f32 %v75_v22, %v51_v14  ;;  %v77_v31 = vmul.f32 -0.4082483, %v74_v29 }
  0x30   :  { %v79_v30 = vadd.f32 %v76_v27, %v52_v23 }
  0x31   :  { %81 = vst [vmem:[%s241_s5] sm:$0xff] %v78_v26  ;;  %v80_v32 = vadd.f32 %v77_v31, %v53_v28 }
  0x32   :  { %82 = vst [vmem:[%s241_s5 + $0x8] sm:$0xff] %v79_v30 }
  0x33   :  { %83 = vst [vmem:[%s241_s5 + $0x10] sm:$0xf] %v80_v32 }
  0x34   :  { %88 = vsyncpa [#allocation3], 1 }
  0x35   :  { %89 = vsyncpa [#allocation5], 1 }

// kernel: _forward.23
= control target key start
LH: loop header
LB: loop body
LE: loop exit
PB: predicated region body
PF: predicated region fallthrough
CT: control target
= control target key end

     0   :  { %10 = vsyncpa [#allocation3], 0  ;;  %s212_s0 = inlined_call_operand.vmem [shape: f32[16,128], index: 0, kind: input, shape index: {}]   ;;  %s213_s1 = inlined_call_operand.hbm [shape: f32[16,128], index: 1, kind: input, shape index: {}]   ;;  %s214_s2 = inlined_call_operand.vmem [shape: f32[16,128], index: 2, kind: input, shape index: {}]   ;;  %s215_s3 = inlined_call_operand.hbm [shape: f32[16,128], index: 3, kind: input, shape index: {}]   ;;  %s216_s4 = inlined_call_operand.vmem [shape: f32[16,128], index: 4, kind: input, shape index: {}]   ;;  %s217_s5 = inlined_call_operand.vmem [shape: f32[16,128], index: 5, kind: output, shape index: {}]  }
   0x1   :  { %11 = vsyncpa [#allocation5], 0  ;;  %s130_s18 = smov [#allocation2]   ;;  %s82_s22 = scalar_lea.hbm %s213_s1, 256 }
   0x2   :  { %s19_s19 = sshll.u32 %s130_s18, 4  ;;  %p83_p0 = scmp.ne.s32.totalorder %s213_s1, %s82_s22  ;;  %s20_s19 = int_to_ptr.vmem [resolvable:$true] %s19_s19 }
   0x3   :  { %p86_p1 = scmp.lt.u32.totalorder %s82_s22, %s213_s1 }
   0x5   :  { %p88_p2 = pnand %p86_p1, %p83_p0 }
   0x7   :  { %91 = shalt.err (!%p88_p2)
}
   0x8   :  { %s92_s27 = scalar_lea.vmem %s20_s19, 256  ;;  %p97_p4 = scmp.lt.s32.totalorder %s20_s19, %s20_s19 }
   0x9   :  { %p93_p3 = scmp.ne.s32.totalorder %s20_s19, %s92_s27  ;;  %p98_p5 = scmp.lt.s32.totalorder %s92_s27, %s92_s27 }
   0xb   :  { %p99_p6 = por %p98_p5, %p97_p4 }
   0xd   :  { %p100_p7 = pnand %p99_p6, %p93_p3 }
   0xf   :  { %103 = shalt.err (!%p100_p7)
}
  0x10   :  { %s131_s28 = smov 128   ;;  %s132_s29 = smov 8  }
  0x11   :  { %25 = dma.hbm_to_vmem [thread:$0]  %s213_s1, 256, %s20_s19, [#allocation3], %s131_s28, %s131_s28, %s132_s29  }
  0x12   :  { %s133_s7 = smov [#allocation4]   ;;  %s104_s11 = scalar_lea.hbm %s215_s3, 256 }
  0x13   :  { %s33_s8 = sshll.u32 %s133_s7, 4  ;;  %p105_p8 = scmp.ne.s32.totalorder %s215_s3, %s104_s11  ;;  %s34_s8 = int_to_ptr.vmem [resolvable:$true] %s33_s8 }
  0x14   :  { %p108_p9 = scmp.lt.u32.totalorder %s104_s11, %s215_s3 }
  0x16   :  { %p110_p10 = pnand %p108_p9, %p105_p8 }
  0x18   :  { %113 = shalt.err (!%p110_p10)
}
  0x19   :  { %s114_s16 = scalar_lea.vmem %s34_s8, 256  ;;  %p119_p12 = scmp.lt.s32.totalorder %s34_s8, %s34_s8 }
  0x1a   :  { %p115_p11 = scmp.ne.s32.totalorder %s34_s8, %s114_s16  ;;  %p120_p13 = scmp.lt.s32.totalorder %s114_s16, %s114_s16 }
  0x1c   :  { %p121_p0 = por %p120_p13, %p119_p12 }
  0x1e   :  { %p122_p1 = pnand %p121_p0, %p115_p11 }
  0x20   :  { %125 = shalt.err (!%p122_p1)
}
  0x21   :  { %39 = dma.hbm_to_vmem [thread:$0]  %s215_s3, 256, %s34_s8, [#allocation5], %s131_s28, %s131_s28, %s132_s29  }
  0x22   :  { %126 = dma.done.wait [#allocation3], 256  }
  0x23   :  { %127 = vsyncadd [#allocation3], 4294967040 }
  0x24   :  { %128 = dma.done.wait [#allocation5], 256  }
  0x25   :  { %129 = vsyncadd [#allocation5], 4294967040  ;;  %v52_v0 = vld [vmem:[#allocation2] sm:$0xff]  ;;  %v58_v4 = vld [vmem:[#allocation4] sm:$0xff] }
  0x26   :  { %v54_v1 = vld [vmem:[%s214_s2] sm:$0xff]  ;;  %v53_v7 = vld [vmem:[#allocation2 + $0x8] sm:$0xff]  ;;  %v59_v9 = vld [vmem:[#allocation4 + $0x8] sm:$0xff] }
  0x27   :  { %v48_v2 = vld [vmem:[%s212_s0] sm:$0xff]  ;;  %v56_v3 = vmul.f32 %v54_v1, %v52_v0  ;;  %v55_v8 = vld [vmem:[%s214_s2 + $0x8] sm:$0xff] }
  0x28   :  { %v60_v5 = vld [vmem:[%s216_s4] sm:$0xff]  ;;  %v49_v10 = vld [vmem:[%s212_s0 + $0x8] sm:$0xff]  ;;  %v57_v11 = vmul.f32 %v55_v8, %v53_v7  ;;  %v50_v13 = vmul.f32 1.1795356, %v48_v2 }
  0x29   :  { %v62_v6 = vmul.f32 %v60_v5, %v58_v4  ;;  %v61_v12 = vld [vmem:[%s216_s4 + $0x8] sm:$0xff]  ;;  %v51_v17 = vmul.f32 1.1795356, %v49_v10 }
  0x2a   :  { %v63_v15 = vmul.f32 %v61_v12, %v59_v9 }
  0x2b   :  { %v64_v14 = vadd.f32 %v62_v6, %v56_v3 }
  0x2c   :  { %v65_v18 = vadd.f32 %v63_v15, %v57_v11 }
  0x2d   :  { %v66_v16 = vmul.f32 0.5, %v64_v14 }
  0x2e   :  { %v67_v20 = vmul.f32 0.5, %v65_v18 }
  0x2f   :  { %v68_v19 = vadd.f32 %v66_v16, %v50_v13 }
  0x30   :  { %v69_v21 = vadd.f32 %v67_v20, %v51_v17 }
  0x31   :  { %70 = vst [vmem:[%s217_s5] sm:$0xff] %v68_v19 }
  0x32   :  { %71 = vst [vmem:[%s217_s5 + $0x8] sm:$0xff] %v69_v21 }
  0x33   :  { %76 = vsyncpa [#allocation3], 1 }
  0x34   :  { %77 = vsyncpa [#allocation5], 1 }

</bundles_post_ra>
